<compile_context>
chip_gen: v5e
topology: v5e:2x2
jax: 0.10.0
libtpu: 0.0.40
codegen_flags: <defaults>
</compile_context>

<pallas_src>
import functools

import jax
import jax.numpy as jnp
from jax.experimental import pallas as pl
from jax.experimental.pallas import tpu as pltpu


C1, C2, C3 = 16, 32, 64                            # conv channel widths of the module


# ---------------------------------------------------------------------------
# Fused forward kernel (single pallas_call, grid=(1,))
# ---------------------------------------------------------------------------

def _fused_forward_kernel(
    x_ref,                       # (B*H, W*Cin)  f32   input, width*channels on lanes
    w1_ref, b1_ref,              # (2, W*Cin,  W1*C1) bf16 ; (1, W1*C1) f32
    w2_ref, b2_ref,              # (2, Q1*C1,  W2*C2) bf16 ; (1, W2*C2) f32
    w3_ref, b3_ref,              # (2, W2*C2,  W3*C3) bf16 ; (1, W3*C3) f32
    fcw_ref, fcb_ref,            # (W3*C3, E) bf16 (avgpool folded in) ; (1, E) f32
    l1b_ref, l2b_ref,            # (1, 4E) f32 ; (1, 4E) f32
    l3w_ref, l3b_ref,            # (1, 4E) f32 ; (1, 1) f32
    l1w_hbm, l2w_hbm,            # (E, 4E) bf16, (4E, 4E) bf16 -- pl.ANY (HBM), manual DMA
    out_ref,                     # (B, 1) f32
    l1w_vmem, l2w_vmem, dma_sem, # VMEM scratch for head weights + DMA semaphores
    *, B, H, W, Cin,
):
    f32 = jnp.float32
    H1, W1 = H - 1, W - 1            # conv1 output spatial (15, 15)
    P1, Q1 = H1 // 2, W1 // 2        # maxpool output        (7, 7)
    H2, W2 = P1 - 1, Q1 - 1          # conv2 output          (6, 6)
    H3, W3 = H2 - 1, W2 - 1          # conv3 output          (5, 5)

    # ---- kick off the MLP-head weight DMAs now; wait right before they're used ----
    l1_cp = pltpu.make_async_copy(l1w_hbm, l1w_vmem, dma_sem.at[0])
    l2_cp = pltpu.make_async_copy(l2w_hbm, l2w_vmem, dma_sem.at[1])
    l1_cp.start()
    l2_cp.start()

    # ---- conv1 (k=2) + ReLU : 2 batched two-diagonal MXU dots -----------------------
    # Result row r uses input rows (r, r+1): rows b*H + i (i in [0, H1)) are batch b's
    # conv rows; rows at batch seams (b*H + H1 .. b*H + H - 1) are garbage and are
    # never read downstream.
    R1 = B * H - 1
    acc = None
    for di in range(2):
        part = jnp.dot(x_ref[di:di + R1, :], w1_ref[di].astype(f32),
                       preferred_element_type=f32)
        acc = part if acc is None else acc + part
    a1 = jnp.maximum(acc + b1_ref[...], 0.0)                   # (R1, W1*C1)

    # ---- MaxPool2d(2) (floor semantics: 15 -> 7), pure value ops, one assembly ------
    # width-pair max (all batches at once)
    cmax = [jnp.maximum(a1[:, (2 * q) * C1:(2 * q + 1) * C1],
                        a1[:, (2 * q + 1) * C1:(2 * q + 2) * C1])
            for q in range(Q1)]
    a1w = jnp.concatenate(cmax, axis=1)                        # (R1, Q1*C1)
    # row-pair max, assembled into a dense batched pooled activation (no garbage rows)
    prow = []
    for b in range(B):
        for p in range(P1):
            r = b * H + 2 * p
            prow.append(jnp.maximum(a1w[r:r + 1, :], a1w[r + 1:r + 2, :]))
    p1 = jnp.concatenate(prow, axis=0)                         # (B*P1, Q1*C1)

    # ---- conv2 (k=2) + ReLU : 2 batched two-diagonal dots ---------------------------
    R2 = B * P1 - 1
    acc = None
    for di in range(2):
        part = jnp.dot(p1[di:di + R2, :], w2_ref[di].astype(f32),
                       preferred_element_type=f32)
        acc = part if acc is None else acc + part
    a2 = jnp.maximum(acc + b2_ref[...], 0.0)                   # (R2, W2*C2); seam rows garbage

    # ---- conv3 (k=2) + ReLU ----------------------------------------------------------
    R3 = B * P1 - 2
    acc = None
    for di in range(2):
        part = jnp.dot(a2[di:di + R3, :], w3_ref[di].astype(f32),
                       preferred_element_type=f32)
        acc = part if acc is None else acc + part
    a3 = jnp.maximum(acc + b3_ref[...], 0.0)                   # (R3, W3*C3); seam rows garbage

    # ---- AdaptiveAvgPool2d((1,1)) folded into fc: only the per-batch row-sum here ---
    rowsum = jnp.concatenate(
        [jnp.sum(a3[b * P1:b * P1 + H3, :], axis=0, keepdims=True) for b in range(B)],
        axis=0)                                                # (B, W3*C3)

    # ---- MLP head: fc -> l1 -> l2 -> l3 (l1w/l2w DMA hidden behind the convs) -------
    emb = jnp.dot(rowsum, fcw_ref[...].astype(f32),
                  preferred_element_type=f32) + fcb_ref[...]   # (B, E)
    l1_cp.wait()
    q = jnp.maximum(jnp.dot(emb, l1w_vmem[...].astype(f32),
                            preferred_element_type=f32) + l1b_ref[...], 0.0)
    l2_cp.wait()
    q = jnp.maximum(jnp.dot(q, l2w_vmem[...].astype(f32),
                            preferred_element_type=f32) + l2b_ref[...], 0.0)
    # l3 has a single output unit: lane reduction instead of an N=1 matmul.
    q3 = jnp.sum(q * l3w_ref[...], axis=1, keepdims=True) + l3b_ref[...]
    out_ref[...] = q3.astype(out_ref.dtype)


# ---------------------------------------------------------------------------
# Weight packing (one-time, wrapper-side glue on tiny weight tensors)
# ---------------------------------------------------------------------------

def _twodiag_conv_weight(w, w_in, w_out):
    """w: (O, Cin, 2, 2) conv weight -> (2, w_in*Cin, w_out*O) two-diagonal matrices.

    For vertical tap di: M[di][j_in*Cin + c, j_out*O + o] = w[o, c, di, j_in - j_out]
    when (j_in - j_out) in {0, 1}, else 0.  A dot of the (rows, w_in*Cin) activation
    slab (full width, channels minor on lanes) with M[di] applies BOTH horizontal taps
    of the 2x2 kernel at every output width position in one MXU pass.
    """
    O, Cin, _, _ = w.shape
    mats = []
    for di in range(2):
        bd = None
        for dj in range(2):
            sel = jnp.eye(w_in, w_out, k=-dj, dtype=jnp.float32)  # sel[j_out+dj, j_out]=1
            wm = w[:, :, di, dj].T.astype(jnp.float32)            # (Cin, O)
            term = jnp.einsum("jk,co->jcko", sel, wm).reshape(w_in * Cin, w_out * O)
            bd = term if bd is None else bd + term
        mats.append(bd)
    return jnp.stack(mats, axis=0)                                # (2, w_in*Cin, w_out*O)


def _tiled_bias(b, wo):
    return jnp.tile(b, wo).reshape(1, wo * b.shape[0]).astype(jnp.float32)


def pack_params(params, state_dim=(16, 16, 4)):
    """Pre-pack module parameters into kernel-ready arrays (done once)."""
    n, m, _ = state_dim
    H1, W1 = n - 1, m - 1
    P1, Q1 = H1 // 2, W1 // 2
    H2, W2 = P1 - 1, Q1 - 1
    H3, W3 = H2 - 1, W2 - 1
    bf16 = jnp.bfloat16
    # Avgpool folded into fc:  emb = rowsum(conv3) @ tile(fc_w.T, (W3,1)) / (H3*W3) + fc_b
    fcw_folded = jnp.tile(params["fc_w"].T, (W3, 1)) * (1.0 / float(H3 * W3))
    return dict(
        w1=_twodiag_conv_weight(params["conv1_w"], m, W1).astype(bf16),
        b1=_tiled_bias(params["conv1_b"], W1),
        w2=_twodiag_conv_weight(params["conv2_w"], Q1, W2).astype(bf16),
        b2=_tiled_bias(params["conv2_b"], W2),
        w3=_twodiag_conv_weight(params["conv3_w"], W2, W3).astype(bf16),
        b3=_tiled_bias(params["conv3_b"], W3),
        fcw=fcw_folded.astype(bf16), fcb=params["fc_b"].reshape(1, -1),
        l1w=params["l1_w"].T.astype(bf16), l1b=params["l1_b"].reshape(1, -1),
        l2w=params["l2_w"].T.astype(bf16), l2b=params["l2_b"].reshape(1, -1),
        l3w=params["l3_w"].astype(jnp.float32), l3b=params["l3_b"].reshape(1, -1),
    )


# ---------------------------------------------------------------------------
# Forward pass (== Value_net_CNN.forward) -- single pallas_call
# ---------------------------------------------------------------------------

def value_net_forward(packed, state_nchw):
    B, Cin, H, W = state_nchw.shape
    # layout glue: NCHW -> NHWC -> (B*H, W*Cin); width/channels end up on lanes.
    x = jnp.transpose(state_nchw, (0, 2, 3, 1)).astype(jnp.float32)
    x2d = x.reshape(B * H, W * Cin)

    E = packed["fcw"].shape[1]
    H1, W1 = H - 1, W - 1
    P1, Q1 = H1 // 2, W1 // 2
    W2 = Q1 - 1
    W3 = W2 - 1

    kernel = functools.partial(_fused_forward_kernel, B=B, H=H, W=W, Cin=Cin)

    def vspec(shape):
        nd = len(shape)
        return pl.BlockSpec(shape, lambda i, _nd=nd: (0,) * _nd)

    vmem_args = (x2d,
                 packed["w1"], packed["b1"],
                 packed["w2"], packed["b2"],
                 packed["w3"], packed["b3"],
                 packed["fcw"], packed["fcb"],
                 packed["l1b"], packed["l2b"],
                 packed["l3w"], packed["l3b"])
    hbm_args = (packed["l1w"], packed["l2w"])

    # Advisory cost hint for XLA's scheduler around the custom call.
    flops = 2 * (2 * (B * H - 1) * (W * Cin) * (W1 * C1)
                 + 2 * (B * P1 - 1) * (Q1 * C1) * (W2 * C2)
                 + 2 * (B * P1 - 2) * (W2 * C2) * (W3 * C3)
                 + B * (W3 * C3) * E + B * E * 4 * E + B * 4 * E * 4 * E + B * 4 * E)
    bytes_accessed = sum(a.size * a.dtype.itemsize for a in (vmem_args + hbm_args)) + B * 4

    return pl.pallas_call(
        kernel,
        grid=(1,),
        in_specs=[vspec(a.shape) for a in vmem_args]
                 + [pl.BlockSpec(memory_space=pl.ANY)] * len(hbm_args),
        out_specs=vspec((B, 1)),
        out_shape=jax.ShapeDtypeStruct((B, 1), jnp.float32),
        scratch_shapes=[
            pltpu.VMEM(packed["l1w"].shape, packed["l1w"].dtype),   # head weight buffers
            pltpu.VMEM(packed["l2w"].shape, packed["l2w"].dtype),
            pltpu.SemaphoreType.DMA((2,)),
        ],
        compiler_params=pltpu.CompilerParams(
            dimension_semantics=("arbitrary",)),
        cost_estimate=pl.CostEstimate(flops=flops, transcendentals=0,
                                      bytes_accessed=bytes_accessed),
    )(*vmem_args, *hbm_args)


# ---------------------------------------------------------------------------
# Parameter init (deterministic, mirrors shapes / init of the PyTorch module)
# ---------------------------------------------------------------------------

def init_value_net_params(key, state_dim=(16, 16, 4), vision_embedding=128):
    _, _, in_channel = state_dim
    keys = jax.random.split(key, 10)

    def linear_init(k, fan_in, fan_out):
        # mirrors init_params: N(0,1) rows normalized to unit L2 norm, bias 0
        w = jax.random.normal(k, (fan_out, fan_in), jnp.float32)
        w = w / jnp.sqrt(jnp.sum(w * w, axis=1, keepdims=True))
        return w, jnp.zeros((fan_out,), jnp.float32)

    def conv_init(k, out_c, in_c, ksz=2):
        fan_in = in_c * ksz * ksz
        bound = 1.0 / jnp.sqrt(fan_in)
        kw, kb = jax.random.split(k)
        w = jax.random.uniform(kw, (out_c, in_c, ksz, ksz), jnp.float32, -bound, bound)
        b = jax.random.uniform(kb, (out_c,), jnp.float32, -bound, bound)
        return w, b

    embedding = vision_embedding  # use_memory=False
    p = {}
    p["conv1_w"], p["conv1_b"] = conv_init(keys[0], C1, in_channel)
    p["conv2_w"], p["conv2_b"] = conv_init(keys[1], C2, C1)
    p["conv3_w"], p["conv3_b"] = conv_init(keys[2], C3, C2)
    p["fc_w"], p["fc_b"] = linear_init(keys[3], C3, vision_embedding)
    p["l1_w"], p["l1_b"] = linear_init(keys[4], embedding, 4 * embedding)
    p["l2_w"], p["l2_b"] = linear_init(keys[5], 4 * embedding, 4 * embedding)
    p["l3_w"], p["l3_b"] = linear_init(keys[6], 4 * embedding, 1)
    return p


# ---------------------------------------------------------------------------
# Pure-JAX reference (for a numerical sanity check of the fused kernel)
# ---------------------------------------------------------------------------

def reference_forward(params, state_nchw):
    x = jnp.transpose(state_nchw, (0, 2, 3, 1)).astype(jnp.float32)   # NHWC

    def conv2d_relu(x, w, b):
        O, Cin, kh, kw = w.shape
        B, H, W, _ = x.shape
        Ho, Wo = H - kh + 1, W - kw + 1
        y = jnp.zeros((B, Ho, Wo, O), jnp.float32)
        for di in range(kh):
            for dj in range(kw):
                y = y + jnp.einsum("bhwc,co->bhwo",
                                   x[:, di:di + Ho, dj:dj + Wo, :],
                                   w[:, :, di, dj].T)
        return jax.nn.relu(y + b)

    def maxpool2(x):
        B, H, W, C = x.shape
        Ho, Wo = H // 2, W // 2
        x = x[:, :2 * Ho, :2 * Wo, :]
        return jnp.maximum(
            jnp.maximum(x[:, 0::2, 0::2, :], x[:, 0::2, 1::2, :]),
            jnp.maximum(x[:, 1::2, 0::2, :], x[:, 1::2, 1::2, :]))

    x = conv2d_relu(x, params["conv1_w"], params["conv1_b"])
    x = maxpool2(x)
    x = conv2d_relu(x, params["conv2_w"], params["conv2_b"])
    x = conv2d_relu(x, params["conv3_w"], params["conv3_b"])
    x = jnp.mean(x, axis=(1, 2))                                     # (B, 64)
    emb = x @ params["fc_w"].T + params["fc_b"]
    q = jax.nn.relu(emb @ params["l1_w"].T + params["l1_b"])
    q = jax.nn.relu(q @ params["l2_w"].T + params["l2_b"])
    return q @ params["l3_w"].T + params["l3_b"]


# ---------------------------------------------------------------------------
# Main
# ---------------------------------------------------------------------------

if __name__ == "__main__":
    key = jax.random.PRNGKey(0)
    pkey, xkey = jax.random.split(key)

    state_dim = (16, 16, 4)          # (n, m, channels) as in the PyTorch module
    batch = 2
    params = init_value_net_params(pkey, state_dim=state_dim, vision_embedding=128)

    # PyTorch-style NCHW input
    state = jax.random.normal(
        xkey, (batch, state_dim[2], state_dim[0], state_dim[1]), jnp.float32)

    packed = pack_params(params, state_dim=state_dim)
    fwd = jax.jit(value_net_forward)
    out = fwd(packed, state)
    out = jax.block_until_ready(out)

    assert out.shape == (batch, 1), out.shape
    assert bool(jnp.all(jnp.isfinite(out)))

    # Numerical sanity check against a plain-JAX f32 reference.  Tolerance covers
    # bf16 weight storage (~0.4% per layer) on top of MXU-vs-XLA f32 differences;
    # a real layout / packing bug would be off by O(1).
    ref = reference_forward(params, state)
    assert bool(jnp.allclose(out, ref, rtol=5e-2, atol=5e-2)), (out, ref)

    print("KERNEL_OK")
</pallas_src>

<mosaic_0001>
module attributes {stable_mosaic.version = 11 : i64} {
  func.func @_fused_forward_kernel(%arg0: i32, %arg1: memref<32x64xf32, #tpu.memory_space<vmem>>, %arg2: memref<2x64x240xbf16, #tpu.memory_space<vmem>>, %arg3: memref<1x240xf32, #tpu.memory_space<vmem>>, %arg4: memref<2x112x192xbf16, #tpu.memory_space<vmem>>, %arg5: memref<1x192xf32, #tpu.memory_space<vmem>>, %arg6: memref<2x192x320xbf16, #tpu.memory_space<vmem>>, %arg7: memref<1x320xf32, #tpu.memory_space<vmem>>, %arg8: memref<320x128xbf16, #tpu.memory_space<vmem>>, %arg9: memref<1x128xf32, #tpu.memory_space<vmem>>, %arg10: memref<1x512xf32, #tpu.memory_space<vmem>>, %arg11: memref<1x512xf32, #tpu.memory_space<vmem>>, %arg12: memref<1x512xf32, #tpu.memory_space<vmem>>, %arg13: memref<1x1xf32, #tpu.memory_space<vmem>>, %arg14: memref<128x512xbf16, #tpu.memory_space<any>>, %arg15: memref<512x512xbf16, #tpu.memory_space<any>>, %arg16: memref<2x1xf32, #tpu.memory_space<vmem>>, %arg17: memref<128x512xbf16, #tpu.memory_space<vmem>>, %arg18: memref<512x512xbf16, #tpu.memory_space<vmem>>, %arg19: memref<2x!tpu.dma_semaphore, #tpu.memory_space<semaphore_mem>>) attributes {dimension_semantics = [#tpu.dimension_semantics<arbitrary>], iteration_bounds = array<i64: 1>, scalar_prefetch = 0 : i64, scratch_operands = 3 : i64, tpu.core_type = #tpu.core_type<tc>, window_params = [{pipeline_mode = #tpu.pipeline_mode<synchronous>, transform_indices = @transform_0, window_bounds = array<i64: 32, 64>}, {pipeline_mode = #tpu.pipeline_mode<synchronous>, transform_indices = @transform_1, window_bounds = array<i64: 2, 64, 240>}, {pipeline_mode = #tpu.pipeline_mode<synchronous>, transform_indices = @transform_2, window_bounds = array<i64: 1, 240>}, {pipeline_mode = #tpu.pipeline_mode<synchronous>, transform_indices = @transform_3, window_bounds = array<i64: 2, 112, 192>}, {pipeline_mode = #tpu.pipeline_mode<synchronous>, transform_indices = @transform_4, window_bounds = array<i64: 1, 192>}, {pipeline_mode = #tpu.pipeline_mode<synchronous>, transform_indices = @transform_5, window_bounds = array<i64: 2, 192, 320>}, {pipeline_mode = #tpu.pipeline_mode<synchronous>, transform_indices = @transform_6, window_bounds = array<i64: 1, 320>}, {pipeline_mode = #tpu.pipeline_mode<synchronous>, transform_indices = @transform_7, window_bounds = array<i64: 320, 128>}, {pipeline_mode = #tpu.pipeline_mode<synchronous>, transform_indices = @transform_8, window_bounds = array<i64: 1, 128>}, {pipeline_mode = #tpu.pipeline_mode<synchronous>, transform_indices = @transform_9, window_bounds = array<i64: 1, 512>}, {pipeline_mode = #tpu.pipeline_mode<synchronous>, transform_indices = @transform_10, window_bounds = array<i64: 1, 512>}, {pipeline_mode = #tpu.pipeline_mode<synchronous>, transform_indices = @transform_11, window_bounds = array<i64: 1, 512>}, {pipeline_mode = #tpu.pipeline_mode<synchronous>, transform_indices = @transform_12, window_bounds = array<i64: 1, 1>}, {}, {}, {pipeline_mode = #tpu.pipeline_mode<synchronous>, transform_indices = @transform_15, window_bounds = array<i64: 2, 1>}]} {
    %c0_i32 = arith.constant 0 : i32
    %0 = tpu.memref_slice %arg19[%c0_i32] : memref<2x!tpu.dma_semaphore, #tpu.memory_space<semaphore_mem>> -> memref<1x!tpu.dma_semaphore, #tpu.memory_space<semaphore_mem>>
    %1 = tpu.memref_squeeze %0 : memref<1x!tpu.dma_semaphore, #tpu.memory_space<semaphore_mem>> -> memref<!tpu.dma_semaphore, #tpu.memory_space<semaphore_mem>>
    tpu.enqueue_dma source(%arg14 : memref<128x512xbf16, #tpu.memory_space<any>>) target(%arg17 : memref<128x512xbf16, #tpu.memory_space<vmem>>) target_semaphore(%1 : memref<!tpu.dma_semaphore, #tpu.memory_space<semaphore_mem>>)
    %c1_i32 = arith.constant 1 : i32
    %2 = tpu.memref_slice %arg19[%c1_i32] : memref<2x!tpu.dma_semaphore, #tpu.memory_space<semaphore_mem>> -> memref<1x!tpu.dma_semaphore, #tpu.memory_space<semaphore_mem>>
    %3 = tpu.memref_squeeze %2 : memref<1x!tpu.dma_semaphore, #tpu.memory_space<semaphore_mem>> -> memref<!tpu.dma_semaphore, #tpu.memory_space<semaphore_mem>>
    tpu.enqueue_dma source(%arg15 : memref<512x512xbf16, #tpu.memory_space<any>>) target(%arg18 : memref<512x512xbf16, #tpu.memory_space<vmem>>) target_semaphore(%3 : memref<!tpu.dma_semaphore, #tpu.memory_space<semaphore_mem>>)
    %c0 = arith.constant 0 : index
    %c0_0 = arith.constant 0 : index
    %4 = vector.load %arg1[%c0, %c0_0] : memref<32x64xf32, #tpu.memory_space<vmem>>, vector<31x64xf32>
    %c0_1 = arith.constant 0 : index
    %c0_2 = arith.constant 0 : index
    %c0_3 = arith.constant 0 : index
    %5 = vector.load %arg2[%c0_1, %c0_2, %c0_3] : memref<2x64x240xbf16, #tpu.memory_space<vmem>>, vector<1x64x240xbf16>
    %6 = vector.shape_cast %5 : vector<1x64x240xbf16> to vector<64x240xbf16>
    %7 = arith.extf %6 : vector<64x240xbf16> to vector<64x240xf32>
    %cst = arith.constant dense<0.000000e+00> : vector<31x240xf32>
    %8 = tpu.matmul %4, %7, %cst {dimension_numbers = #tpu.dot_dimension_numbers<[1], [0], [0], [1], [0, 0, 1, 1], [], []>} : vector<31x64xf32>, vector<64x240xf32>, vector<31x240xf32> -> vector<31x240xf32>
    %c1 = arith.constant 1 : index
    %c0_4 = arith.constant 0 : index
    %9 = vector.load %arg1[%c1, %c0_4] : memref<32x64xf32, #tpu.memory_space<vmem>>, vector<31x64xf32>
    %c1_5 = arith.constant 1 : index
    %c0_6 = arith.constant 0 : index
    %c0_7 = arith.constant 0 : index
    %10 = vector.load %arg2[%c1_5, %c0_6, %c0_7] : memref<2x64x240xbf16, #tpu.memory_space<vmem>>, vector<1x64x240xbf16>
    %11 = vector.shape_cast %10 : vector<1x64x240xbf16> to vector<64x240xbf16>
    %12 = arith.extf %11 : vector<64x240xbf16> to vector<64x240xf32>
    %cst_8 = arith.constant dense<0.000000e+00> : vector<31x240xf32>
    %13 = tpu.matmul %9, %12, %cst_8 {dimension_numbers = #tpu.dot_dimension_numbers<[1], [0], [0], [1], [0, 0, 1, 1], [], []>} : vector<31x64xf32>, vector<64x240xf32>, vector<31x240xf32> -> vector<31x240xf32>
    %14 = arith.addf %8, %13 : vector<31x240xf32>
    %c0_9 = arith.constant 0 : index
    %c0_10 = arith.constant 0 : index
    %15 = vector.load %arg3[%c0_9, %c0_10] : memref<1x240xf32, #tpu.memory_space<vmem>>, vector<1x240xf32>
    %16 = vector.broadcast %15 : vector<1x240xf32> to vector<31x240xf32>
    %17 = arith.addf %14, %16 : vector<31x240xf32>
    %cst_11 = arith.constant 0.000000e+00 : f32
    %18 = vector.broadcast %cst_11 : f32 to vector<31x240xf32>
    %19 = arith.maximumf %17, %18 : vector<31x240xf32>
    %20 = vector.extract_strided_slice %19 {offsets = [0, 0], sizes = [31, 16], strides = [1, 1]} : vector<31x240xf32> to vector<31x16xf32>
    %21 = vector.extract_strided_slice %19 {offsets = [0, 16], sizes = [31, 16], strides = [1, 1]} : vector<31x240xf32> to vector<31x16xf32>
    %22 = arith.maximumf %20, %21 : vector<31x16xf32>
    %23 = vector.extract_strided_slice %19 {offsets = [0, 32], sizes = [31, 16], strides = [1, 1]} : vector<31x240xf32> to vector<31x16xf32>
    %24 = vector.extract_strided_slice %19 {offsets = [0, 48], sizes = [31, 16], strides = [1, 1]} : vector<31x240xf32> to vector<31x16xf32>
    %25 = arith.maximumf %23, %24 : vector<31x16xf32>
    %26 = vector.extract_strided_slice %19 {offsets = [0, 64], sizes = [31, 16], strides = [1, 1]} : vector<31x240xf32> to vector<31x16xf32>
    %27 = vector.extract_strided_slice %19 {offsets = [0, 80], sizes = [31, 16], strides = [1, 1]} : vector<31x240xf32> to vector<31x16xf32>
    %28 = arith.maximumf %26, %27 : vector<31x16xf32>
    %29 = vector.extract_strided_slice %19 {offsets = [0, 96], sizes = [31, 16], strides = [1, 1]} : vector<31x240xf32> to vector<31x16xf32>
    %30 = vector.extract_strided_slice %19 {offsets = [0, 112], sizes = [31, 16], strides = [1, 1]} : vector<31x240xf32> to vector<31x16xf32>
    %31 = arith.maximumf %29, %30 : vector<31x16xf32>
    %32 = vector.extract_strided_slice %19 {offsets = [0, 128], sizes = [31, 16], strides = [1, 1]} : vector<31x240xf32> to vector<31x16xf32>
    %33 = vector.extract_strided_slice %19 {offsets = [0, 144], sizes = [31, 16], strides = [1, 1]} : vector<31x240xf32> to vector<31x16xf32>
    %34 = arith.maximumf %32, %33 : vector<31x16xf32>
    %35 = vector.extract_strided_slice %19 {offsets = [0, 160], sizes = [31, 16], strides = [1, 1]} : vector<31x240xf32> to vector<31x16xf32>
    %36 = vector.extract_strided_slice %19 {offsets = [0, 176], sizes = [31, 16], strides = [1, 1]} : vector<31x240xf32> to vector<31x16xf32>
    %37 = arith.maximumf %35, %36 : vector<31x16xf32>
    %38 = vector.extract_strided_slice %19 {offsets = [0, 192], sizes = [31, 16], strides = [1, 1]} : vector<31x240xf32> to vector<31x16xf32>
    %39 = vector.extract_strided_slice %19 {offsets = [0, 208], sizes = [31, 16], strides = [1, 1]} : vector<31x240xf32> to vector<31x16xf32>
    %40 = arith.maximumf %38, %39 : vector<31x16xf32>
    %41 = tpu.concatenate %22, %25, %28, %31, %34, %37, %40 in 1 : vector<31x16xf32>, vector<31x16xf32>, vector<31x16xf32>, vector<31x16xf32>, vector<31x16xf32>, vector<31x16xf32>, vector<31x16xf32> -> vector<31x112xf32>
    %42 = vector.extract_strided_slice %41 {offsets = [0, 0], sizes = [1, 112], strides = [1, 1]} : vector<31x112xf32> to vector<1x112xf32>
    %43 = vector.extract_strided_slice %41 {offsets = [1, 0], sizes = [1, 112], strides = [1, 1]} : vector<31x112xf32> to vector<1x112xf32>
    %44 = arith.maximumf %42, %43 : vector<1x112xf32>
    %45 = vector.extract_strided_slice %41 {offsets = [2, 0], sizes = [1, 112], strides = [1, 1]} : vector<31x112xf32> to vector<1x112xf32>
    %46 = vector.extract_strided_slice %41 {offsets = [3, 0], sizes = [1, 112], strides = [1, 1]} : vector<31x112xf32> to vector<1x112xf32>
    %47 = arith.maximumf %45, %46 : vector<1x112xf32>
    %48 = vector.extract_strided_slice %41 {offsets = [4, 0], sizes = [1, 112], strides = [1, 1]} : vector<31x112xf32> to vector<1x112xf32>
    %49 = vector.extract_strided_slice %41 {offsets = [5, 0], sizes = [1, 112], strides = [1, 1]} : vector<31x112xf32> to vector<1x112xf32>
    %50 = arith.maximumf %48, %49 : vector<1x112xf32>
    %51 = vector.extract_strided_slice %41 {offsets = [6, 0], sizes = [1, 112], strides = [1, 1]} : vector<31x112xf32> to vector<1x112xf32>
    %52 = vector.extract_strided_slice %41 {offsets = [7, 0], sizes = [1, 112], strides = [1, 1]} : vector<31x112xf32> to vector<1x112xf32>
    %53 = arith.maximumf %51, %52 : vector<1x112xf32>
    %54 = vector.extract_strided_slice %41 {offsets = [8, 0], sizes = [1, 112], strides = [1, 1]} : vector<31x112xf32> to vector<1x112xf32>
    %55 = vector.extract_strided_slice %41 {offsets = [9, 0], sizes = [1, 112], strides = [1, 1]} : vector<31x112xf32> to vector<1x112xf32>
    %56 = arith.maximumf %54, %55 : vector<1x112xf32>
    %57 = vector.extract_strided_slice %41 {offsets = [10, 0], sizes = [1, 112], strides = [1, 1]} : vector<31x112xf32> to vector<1x112xf32>
    %58 = vector.extract_strided_slice %41 {offsets = [11, 0], sizes = [1, 112], strides = [1, 1]} : vector<31x112xf32> to vector<1x112xf32>
    %59 = arith.maximumf %57, %58 : vector<1x112xf32>
    %60 = vector.extract_strided_slice %41 {offsets = [12, 0], sizes = [1, 112], strides = [1, 1]} : vector<31x112xf32> to vector<1x112xf32>
    %61 = vector.extract_strided_slice %41 {offsets = [13, 0], sizes = [1, 112], strides = [1, 1]} : vector<31x112xf32> to vector<1x112xf32>
    %62 = arith.maximumf %60, %61 : vector<1x112xf32>
    %63 = vector.extract_strided_slice %41 {offsets = [16, 0], sizes = [1, 112], strides = [1, 1]} : vector<31x112xf32> to vector<1x112xf32>
    %64 = vector.extract_strided_slice %41 {offsets = [17, 0], sizes = [1, 112], strides = [1, 1]} : vector<31x112xf32> to vector<1x112xf32>
    %65 = arith.maximumf %63, %64 : vector<1x112xf32>
    %66 = vector.extract_strided_slice %41 {offsets = [18, 0], sizes = [1, 112], strides = [1, 1]} : vector<31x112xf32> to vector<1x112xf32>
    %67 = vector.extract_strided_slice %41 {offsets = [19, 0], sizes = [1, 112], strides = [1, 1]} : vector<31x112xf32> to vector<1x112xf32>
    %68 = arith.maximumf %66, %67 : vector<1x112xf32>
    %69 = vector.extract_strided_slice %41 {offsets = [20, 0], sizes = [1, 112], strides = [1, 1]} : vector<31x112xf32> to vector<1x112xf32>
    %70 = vector.extract_strided_slice %41 {offsets = [21, 0], sizes = [1, 112], strides = [1, 1]} : vector<31x112xf32> to vector<1x112xf32>
    %71 = arith.maximumf %69, %70 : vector<1x112xf32>
    %72 = vector.extract_strided_slice %41 {offsets = [22, 0], sizes = [1, 112], strides = [1, 1]} : vector<31x112xf32> to vector<1x112xf32>
    %73 = vector.extract_strided_slice %41 {offsets = [23, 0], sizes = [1, 112], strides = [1, 1]} : vector<31x112xf32> to vector<1x112xf32>
    %74 = arith.maximumf %72, %73 : vector<1x112xf32>
    %75 = vector.extract_strided_slice %41 {offsets = [24, 0], sizes = [1, 112], strides = [1, 1]} : vector<31x112xf32> to vector<1x112xf32>
    %76 = vector.extract_strided_slice %41 {offsets = [25, 0], sizes = [1, 112], strides = [1, 1]} : vector<31x112xf32> to vector<1x112xf32>
    %77 = arith.maximumf %75, %76 : vector<1x112xf32>
    %78 = vector.extract_strided_slice %41 {offsets = [26, 0], sizes = [1, 112], strides = [1, 1]} : vector<31x112xf32> to vector<1x112xf32>
    %79 = vector.extract_strided_slice %41 {offsets = [27, 0], sizes = [1, 112], strides = [1, 1]} : vector<31x112xf32> to vector<1x112xf32>
    %80 = arith.maximumf %78, %79 : vector<1x112xf32>
    %81 = vector.extract_strided_slice %41 {offsets = [28, 0], sizes = [1, 112], strides = [1, 1]} : vector<31x112xf32> to vector<1x112xf32>
    %82 = vector.extract_strided_slice %41 {offsets = [29, 0], sizes = [1, 112], strides = [1, 1]} : vector<31x112xf32> to vector<1x112xf32>
    %83 = arith.maximumf %81, %82 : vector<1x112xf32>
    %84 = tpu.concatenate %44, %47, %50, %53, %56, %59, %62, %65, %68, %71, %74, %77, %80, %83 in 0 : vector<1x112xf32>, vector<1x112xf32>, vector<1x112xf32>, vector<1x112xf32>, vector<1x112xf32>, vector<1x112xf32>, vector<1x112xf32>, vector<1x112xf32>, vector<1x112xf32>, vector<1x112xf32>, vector<1x112xf32>, vector<1x112xf32>, vector<1x112xf32>, vector<1x112xf32> -> vector<14x112xf32>
    %85 = vector.extract_strided_slice %84 {offsets = [0, 0], sizes = [13, 112], strides = [1, 1]} : vector<14x112xf32> to vector<13x112xf32>
    %c0_12 = arith.constant 0 : index
    %c0_13 = arith.constant 0 : index
    %c0_14 = arith.constant 0 : index
    %86 = vector.load %arg4[%c0_12, %c0_13, %c0_14] : memref<2x112x192xbf16, #tpu.memory_space<vmem>>, vector<1x112x192xbf16>
    %87 = vector.shape_cast %86 : vector<1x112x192xbf16> to vector<112x192xbf16>
    %88 = arith.extf %87 : vector<112x192xbf16> to vector<112x192xf32>
    %cst_15 = arith.constant dense<0.000000e+00> : vector<13x192xf32>
    %89 = tpu.matmul %85, %88, %cst_15 {dimension_numbers = #tpu.dot_dimension_numbers<[1], [0], [0], [1], [0, 0, 1, 1], [], []>} : vector<13x112xf32>, vector<112x192xf32>, vector<13x192xf32> -> vector<13x192xf32>
    %90 = vector.extract_strided_slice %84 {offsets = [1, 0], sizes = [13, 112], strides = [1, 1]} : vector<14x112xf32> to vector<13x112xf32>
    %c1_16 = arith.constant 1 : index
    %c0_17 = arith.constant 0 : index
    %c0_18 = arith.constant 0 : index
    %91 = vector.load %arg4[%c1_16, %c0_17, %c0_18] : memref<2x112x192xbf16, #tpu.memory_space<vmem>>, vector<1x112x192xbf16>
    %92 = vector.shape_cast %91 : vector<1x112x192xbf16> to vector<112x192xbf16>
    %93 = arith.extf %92 : vector<112x192xbf16> to vector<112x192xf32>
    %cst_19 = arith.constant dense<0.000000e+00> : vector<13x192xf32>
    %94 = tpu.matmul %90, %93, %cst_19 {dimension_numbers = #tpu.dot_dimension_numbers<[1], [0], [0], [1], [0, 0, 1, 1], [], []>} : vector<13x112xf32>, vector<112x192xf32>, vector<13x192xf32> -> vector<13x192xf32>
    %95 = arith.addf %89, %94 : vector<13x192xf32>
    %c0_20 = arith.constant 0 : index
    %c0_21 = arith.constant 0 : index
    %96 = vector.load %arg5[%c0_20, %c0_21] : memref<1x192xf32, #tpu.memory_space<vmem>>, vector<1x192xf32>
    %97 = vector.broadcast %96 : vector<1x192xf32> to vector<13x192xf32>
    %98 = arith.addf %95, %97 : vector<13x192xf32>
    %cst_22 = arith.constant 0.000000e+00 : f32
    %99 = vector.broadcast %cst_22 : f32 to vector<13x192xf32>
    %100 = arith.maximumf %98, %99 : vector<13x192xf32>
    %101 = vector.extract_strided_slice %100 {offsets = [0, 0], sizes = [12, 192], strides = [1, 1]} : vector<13x192xf32> to vector<12x192xf32>
    %c0_23 = arith.constant 0 : index
    %c0_24 = arith.constant 0 : index
    %c0_25 = arith.constant 0 : index
    %102 = vector.load %arg6[%c0_23, %c0_24, %c0_25] : memref<2x192x320xbf16, #tpu.memory_space<vmem>>, vector<1x192x320xbf16>
    %103 = vector.shape_cast %102 : vector<1x192x320xbf16> to vector<192x320xbf16>
    %104 = arith.extf %103 : vector<192x320xbf16> to vector<192x320xf32>
    %cst_26 = arith.constant dense<0.000000e+00> : vector<12x320xf32>
    %105 = tpu.matmul %101, %104, %cst_26 {dimension_numbers = #tpu.dot_dimension_numbers<[1], [0], [0], [1], [0, 0, 1, 1], [], []>} : vector<12x192xf32>, vector<192x320xf32>, vector<12x320xf32> -> vector<12x320xf32>
    %106 = vector.extract_strided_slice %100 {offsets = [1, 0], sizes = [12, 192], strides = [1, 1]} : vector<13x192xf32> to vector<12x192xf32>
    %c1_27 = arith.constant 1 : index
    %c0_28 = arith.constant 0 : index
    %c0_29 = arith.constant 0 : index
    %107 = vector.load %arg6[%c1_27, %c0_28, %c0_29] : memref<2x192x320xbf16, #tpu.memory_space<vmem>>, vector<1x192x320xbf16>
    %108 = vector.shape_cast %107 : vector<1x192x320xbf16> to vector<192x320xbf16>
    %109 = arith.extf %108 : vector<192x320xbf16> to vector<192x320xf32>
    %cst_30 = arith.constant dense<0.000000e+00> : vector<12x320xf32>
    %110 = tpu.matmul %106, %109, %cst_30 {dimension_numbers = #tpu.dot_dimension_numbers<[1], [0], [0], [1], [0, 0, 1, 1], [], []>} : vector<12x192xf32>, vector<192x320xf32>, vector<12x320xf32> -> vector<12x320xf32>
    %111 = arith.addf %105, %110 : vector<12x320xf32>
    %c0_31 = arith.constant 0 : index
    %c0_32 = arith.constant 0 : index
    %112 = vector.load %arg7[%c0_31, %c0_32] : memref<1x320xf32, #tpu.memory_space<vmem>>, vector<1x320xf32>
    %113 = vector.broadcast %112 : vector<1x320xf32> to vector<12x320xf32>
    %114 = arith.addf %111, %113 : vector<12x320xf32>
    %cst_33 = arith.constant 0.000000e+00 : f32
    %115 = vector.broadcast %cst_33 : f32 to vector<12x320xf32>
    %116 = arith.maximumf %114, %115 : vector<12x320xf32>
    %117 = vector.extract_strided_slice %116 {offsets = [0, 0], sizes = [5, 320], strides = [1, 1]} : vector<12x320xf32> to vector<5x320xf32>
    %cst_34 = arith.constant dense<0.000000e+00> : vector<320xf32>
    %118 = vector.multi_reduction <add>, %117, %cst_34 [0] : vector<5x320xf32> to vector<320xf32>
    %119 = vector.shape_cast %118 : vector<320xf32> to vector<1x320xf32>
    %120 = vector.extract_strided_slice %116 {offsets = [7, 0], sizes = [5, 320], strides = [1, 1]} : vector<12x320xf32> to vector<5x320xf32>
    %cst_35 = arith.constant dense<0.000000e+00> : vector<320xf32>
    %121 = vector.multi_reduction <add>, %120, %cst_35 [0] : vector<5x320xf32> to vector<320xf32>
    %122 = vector.shape_cast %121 : vector<320xf32> to vector<1x320xf32>
    %123 = tpu.concatenate %119, %122 in 0 : vector<1x320xf32>, vector<1x320xf32> -> vector<2x320xf32>
    %c0_36 = arith.constant 0 : index
    %c0_37 = arith.constant 0 : index
    %124 = vector.load %arg8[%c0_36, %c0_37] : memref<320x128xbf16, #tpu.memory_space<vmem>>, vector<320x128xbf16>
    %125 = arith.extf %124 : vector<320x128xbf16> to vector<320x128xf32>
    %cst_38 = arith.constant dense<0.000000e+00> : vector<2x128xf32>
    %126 = tpu.matmul %123, %125, %cst_38 {dimension_numbers = #tpu.dot_dimension_numbers<[1], [0], [0], [1], [0, 0, 1, 1], [], []>} : vector<2x320xf32>, vector<320x128xf32>, vector<2x128xf32> -> vector<2x128xf32>
    %c0_39 = arith.constant 0 : index
    %c0_40 = arith.constant 0 : index
    %127 = vector.load %arg9[%c0_39, %c0_40] : memref<1x128xf32, #tpu.memory_space<vmem>>, vector<1x128xf32>
    %128 = vector.broadcast %127 : vector<1x128xf32> to vector<2x128xf32>
    %129 = arith.addf %126, %128 : vector<2x128xf32>
    %c0_i32_41 = arith.constant 0 : i32
    %130 = tpu.memref_slice %arg19[%c0_i32_41] : memref<2x!tpu.dma_semaphore, #tpu.memory_space<semaphore_mem>> -> memref<1x!tpu.dma_semaphore, #tpu.memory_space<semaphore_mem>>
    %131 = tpu.memref_squeeze %130 : memref<1x!tpu.dma_semaphore, #tpu.memory_space<semaphore_mem>> -> memref<!tpu.dma_semaphore, #tpu.memory_space<semaphore_mem>>
    tpu.wait_dma2 semaphore(%131 : memref<!tpu.dma_semaphore, #tpu.memory_space<semaphore_mem>>) src(%arg14 : memref<128x512xbf16, #tpu.memory_space<any>>) dst(%arg17 : memref<128x512xbf16, #tpu.memory_space<vmem>>)
    %c0_42 = arith.constant 0 : index
    %c0_43 = arith.constant 0 : index
    %132 = vector.load %arg17[%c0_42, %c0_43] : memref<128x512xbf16, #tpu.memory_space<vmem>>, vector<128x512xbf16>
    %133 = arith.extf %132 : vector<128x512xbf16> to vector<128x512xf32>
    %cst_44 = arith.constant dense<0.000000e+00> : vector<2x512xf32>
    %134 = tpu.matmul %129, %133, %cst_44 {dimension_numbers = #tpu.dot_dimension_numbers<[1], [0], [0], [1], [0, 0, 1, 1], [], []>} : vector<2x128xf32>, vector<128x512xf32>, vector<2x512xf32> -> vector<2x512xf32>
    %c0_45 = arith.constant 0 : index
    %c0_46 = arith.constant 0 : index
    %135 = vector.load %arg10[%c0_45, %c0_46] : memref<1x512xf32, #tpu.memory_space<vmem>>, vector<1x512xf32>
    %136 = vector.broadcast %135 : vector<1x512xf32> to vector<2x512xf32>
    %137 = arith.addf %134, %136 : vector<2x512xf32>
    %cst_47 = arith.constant 0.000000e+00 : f32
    %138 = vector.broadcast %cst_47 : f32 to vector<2x512xf32>
    %139 = arith.maximumf %137, %138 : vector<2x512xf32>
    %c1_i32_48 = arith.constant 1 : i32
    %140 = tpu.memref_slice %arg19[%c1_i32_48] : memref<2x!tpu.dma_semaphore, #tpu.memory_space<semaphore_mem>> -> memref<1x!tpu.dma_semaphore, #tpu.memory_space<semaphore_mem>>
    %141 = tpu.memref_squeeze %140 : memref<1x!tpu.dma_semaphore, #tpu.memory_space<semaphore_mem>> -> memref<!tpu.dma_semaphore, #tpu.memory_space<semaphore_mem>>
    tpu.wait_dma2 semaphore(%141 : memref<!tpu.dma_semaphore, #tpu.memory_space<semaphore_mem>>) src(%arg15 : memref<512x512xbf16, #tpu.memory_space<any>>) dst(%arg18 : memref<512x512xbf16, #tpu.memory_space<vmem>>)
    %c0_49 = arith.constant 0 : index
    %c0_50 = arith.constant 0 : index
    %142 = vector.load %arg18[%c0_49, %c0_50] : memref<512x512xbf16, #tpu.memory_space<vmem>>, vector<512x512xbf16>
    %143 = arith.extf %142 : vector<512x512xbf16> to vector<512x512xf32>
    %cst_51 = arith.constant dense<0.000000e+00> : vector<2x512xf32>
    %144 = tpu.matmul %139, %143, %cst_51 {dimension_numbers = #tpu.dot_dimension_numbers<[1], [0], [0], [1], [0, 0, 1, 1], [], []>} : vector<2x512xf32>, vector<512x512xf32>, vector<2x512xf32> -> vector<2x512xf32>
    %c0_52 = arith.constant 0 : index
    %c0_53 = arith.constant 0 : index
    %145 = vector.load %arg11[%c0_52, %c0_53] : memref<1x512xf32, #tpu.memory_space<vmem>>, vector<1x512xf32>
    %146 = vector.broadcast %145 : vector<1x512xf32> to vector<2x512xf32>
    %147 = arith.addf %144, %146 : vector<2x512xf32>
    %cst_54 = arith.constant 0.000000e+00 : f32
    %148 = vector.broadcast %cst_54 : f32 to vector<2x512xf32>
    %149 = arith.maximumf %147, %148 : vector<2x512xf32>
    %c0_55 = arith.constant 0 : index
    %c0_56 = arith.constant 0 : index
    %150 = vector.load %arg12[%c0_55, %c0_56] : memref<1x512xf32, #tpu.memory_space<vmem>>, vector<1x512xf32>
    %151 = vector.broadcast %150 : vector<1x512xf32> to vector<2x512xf32>
    %152 = arith.mulf %149, %151 : vector<2x512xf32>
    %cst_57 = arith.constant dense<0.000000e+00> : vector<2xf32>
    %153 = vector.multi_reduction <add>, %152, %cst_57 [1] : vector<2x512xf32> to vector<2xf32>
    %154 = vector.shape_cast %153 : vector<2xf32> to vector<2x1xf32>
    %c0_58 = arith.constant 0 : index
    %c0_59 = arith.constant 0 : index
    %155 = vector.load %arg13[%c0_58, %c0_59] : memref<1x1xf32, #tpu.memory_space<vmem>>, vector<1x1xf32>
    %156 = vector.broadcast %155 : vector<1x1xf32> to vector<2x1xf32>
    %157 = arith.addf %154, %156 : vector<2x1xf32>
    %c0_60 = arith.constant 0 : index
    %c0_61 = arith.constant 0 : index
    %158 = vector.load %arg16[%c0_60, %c0_61] : memref<2x1xf32, #tpu.memory_space<vmem>>, vector<2x1xf32>
    tpu.vector_store %arg16[%c0_60, %c0_61], %157 {strides = array<i32>} : memref<2x1xf32, #tpu.memory_space<vmem>>, vector<2x1xf32>,
    return
  }
  func.func @transform_0(%arg0: i32) -> (i32, i32) {
    %c0_i32 = arith.constant 0 : i32
    %c0_i32_0 = arith.constant 0 : i32
    %c0_i32_1 = arith.constant 0 : i32
    return %c0_i32, %c0_i32_0 : i32, i32
  }
  func.func @transform_1(%arg0: i32) -> (i32, i32, i32) {
    %c0_i32 = arith.constant 0 : i32
    %c0_i32_0 = arith.constant 0 : i32
    %c0_i32_1 = arith.constant 0 : i32
    %c0_i32_2 = arith.constant 0 : i32
    return %c0_i32, %c0_i32_0, %c0_i32_1 : i32, i32, i32
  }
  func.func @transform_2(%arg0: i32) -> (i32, i32) {
    %c0_i32 = arith.constant 0 : i32
    %c0_i32_0 = arith.constant 0 : i32
    %c0_i32_1 = arith.constant 0 : i32
    return %c0_i32, %c0_i32_0 : i32, i32
  }
  func.func @transform_3(%arg0: i32) -> (i32, i32, i32) {
    %c0_i32 = arith.constant 0 : i32
    %c0_i32_0 = arith.constant 0 : i32
    %c0_i32_1 = arith.constant 0 : i32
    %c0_i32_2 = arith.constant 0 : i32
    return %c0_i32, %c0_i32_0, %c0_i32_1 : i32, i32, i32
  }
  func.func @transform_4(%arg0: i32) -> (i32, i32) {
    %c0_i32 = arith.constant 0 : i32
    %c0_i32_0 = arith.constant 0 : i32
    %c0_i32_1 = arith.constant 0 : i32
    return %c0_i32, %c0_i32_0 : i32, i32
  }
  func.func @transform_5(%arg0: i32) -> (i32, i32, i32) {
    %c0_i32 = arith.constant 0 : i32
    %c0_i32_0 = arith.constant 0 : i32
    %c0_i32_1 = arith.constant 0 : i32
    %c0_i32_2 = arith.constant 0 : i32
    return %c0_i32, %c0_i32_0, %c0_i32_1 : i32, i32, i32
  }
  func.func @transform_6(%arg0: i32) -> (i32, i32) {
    %c0_i32 = arith.constant 0 : i32
    %c0_i32_0 = arith.constant 0 : i32
    %c0_i32_1 = arith.constant 0 : i32
    return %c0_i32, %c0_i32_0 : i32, i32
  }
  func.func @transform_7(%arg0: i32) -> (i32, i32) {
    %c0_i32 = arith.constant 0 : i32
    %c0_i32_0 = arith.constant 0 : i32
    %c0_i32_1 = arith.constant 0 : i32
    return %c0_i32, %c0_i32_0 : i32, i32
  }
  func.func @transform_8(%arg0: i32) -> (i32, i32) {
    %c0_i32 = arith.constant 0 : i32
    %c0_i32_0 = arith.constant 0 : i32
    %c0_i32_1 = arith.constant 0 : i32
    return %c0_i32, %c0_i32_0 : i32, i32
  }
  func.func @transform_9(%arg0: i32) -> (i32, i32) {
    %c0_i32 = arith.constant 0 : i32
    %c0_i32_0 = arith.constant 0 : i32
    %c0_i32_1 = arith.constant 0 : i32
    return %c0_i32, %c0_i32_0 : i32, i32
  }
  func.func @transform_10(%arg0: i32) -> (i32, i32) {
    %c0_i32 = arith.constant 0 : i32
    %c0_i32_0 = arith.constant 0 : i32
    %c0_i32_1 = arith.constant 0 : i32
    return %c0_i32, %c0_i32_0 : i32, i32
  }
  func.func @transform_11(%arg0: i32) -> (i32, i32) {
    %c0_i32 = arith.constant 0 : i32
    %c0_i32_0 = arith.constant 0 : i32
    %c0_i32_1 = arith.constant 0 : i32
    return %c0_i32, %c0_i32_0 : i32, i32
  }
  func.func @transform_12(%arg0: i32) -> (i32, i32) {
    %c0_i32 = arith.constant 0 : i32
    %c0_i32_0 = arith.constant 0 : i32
    %c0_i32_1 = arith.constant 0 : i32
    return %c0_i32, %c0_i32_0 : i32, i32
  }
  func.func @transform_15(%arg0: i32) -> (i32, i32) {
    %c0_i32 = arith.constant 0 : i32
    %c0_i32_0 = arith.constant 0 : i32
    %c0_i32_1 = arith.constant 0 : i32
    return %c0_i32, %c0_i32_0 : i32, i32
  }
}

</mosaic_0001>

<bundles_post_ra>
// kernel: value_net_forward.1
= control target key start
LH: loop header
LB: loop body
LE: loop exit
PB: predicated region body
PF: predicated region fallthrough
CT: control target
= control target key end

     0   :  { %s4616_s0 = inlined_call_operand.vmem [shape: f32[32,64], index: 0, kind: input, shape index: {}]   ;;  %s4617_s1 = inlined_call_operand.vmem [shape: bf16[2,64,240], index: 1, kind: input, shape index: {}]   ;;  %s4618_s2 = inlined_call_operand.vmem [shape: f32[1,240], index: 2, kind: input, shape index: {}]   ;;  %s4619_s3 = inlined_call_operand.vmem [shape: bf16[2,112,192], index: 3, kind: input, shape index: {}]   ;;  %s4620_s4 = inlined_call_operand.hbm [shape: f32[1,192], index: 4, kind: input, shape index: {}]   ;;  %s4621_s5 = inlined_call_operand.vmem [shape: bf16[2,192,320], index: 5, kind: input, shape index: {}]   ;;  %s4622_s6 = inlined_call_operand.hbm [shape: f32[1,320], index: 6, kind: input, shape index: {}]   ;;  %s4623_s7 = inlined_call_operand.hbm [shape: bf16[320,128], index: 7, kind: input, shape index: {}]   ;;  %s4624_s8 = inlined_call_operand.hbm [shape: f32[1,128], index: 8, kind: input, shape index: {}]   ;;  %s4625_s9 = inlined_call_operand.vmem [shape: f32[1,512], index: 9, kind: input, shape index: {}]   ;;  %s4626_s10 = inlined_call_operand.vmem [shape: f32[1,512], index: 10, kind: input, shape index: {}]   ;;  %s4627_s11 = inlined_call_operand.vmem [shape: f32[1,512], index: 11, kind: input, shape index: {}]   ;;  %s4628_s12 = inlined_call_operand.<no memory space> [shape: f32[1,1], index: 12, kind: input, shape index: {}]   ;;  %s4629_s13 = inlined_call_operand.vmem [shape: bf16[128,512], index: 13, kind: input, shape index: {}]   ;;  %s4630_s14 = inlined_call_operand.hbm [shape: bf16[512,512], index: 14, kind: input, shape index: {}]   ;;  %s4631_s15 = inlined_call_operand.vmem [shape: f32[2,1], index: 15, kind: output, shape index: {}]  }
   0x1   :  { %v20_v0 = vstv %s4628_s12 }
   0x2   :  { %21 = vst [vmem:[#allocation5] sm:$0x1] %v20_v0 }
   0x3   :  { %22 = vsyncpa [#allocation7], 0 }
   0x4   :  { %23 = vsyncpa [#allocation9], 0  ;;  %s51_s22 = sshll.u32 %s4622_s6, 4  ;;  %s52_s22 = int_to_ptr.hbm [resolvable:$true] %s51_s22 }
   0x5   :  { %24 = vsyncpa [#allocation12], 0  ;;  %s2928_s23 = smov [#allocation8]   ;;  %s38_s27 = sshll.u32 %s4620_s4, 4  ;;  %s39_s27 = int_to_ptr.hbm [resolvable:$true] %s38_s27 }
   0x6   :  { %s53_s24 = sshll.u32 %s2928_s23, 4  ;;  %s2929_s28 = smov [#allocation6]   ;;  %s54_s24 = int_to_ptr.vmem [resolvable:$true] %s53_s24 }
   0x7   :  { %56 = dma.hbm_to_vmem [thread:$0]  %s52_s22, 48, %s54_s24, [#allocation9]  }
   0x8   :  { %s40_s12 = sshll.u32 %s2929_s28, 4  ;;  %s61_s16 = sshll.u32 %s4623_s7, 4  ;;  %s41_s12 = int_to_ptr.vmem [resolvable:$true] %s40_s12  ;;  %s62_s16 = int_to_ptr.hbm [resolvable:$true] %s61_s16 }
   0x9   :  { %43 = dma.hbm_to_vmem [thread:$0]  %s39_s27, 32, %s41_s12, [#allocation7]  }
   0xa   :  { %s2930_s6 = smov [#allocation10]   ;;  %s75_s20 = sshll.u32 %s4624_s8, 4  ;;  %s76_s20 = int_to_ptr.hbm [resolvable:$true] %s75_s20 }
   0xb   :  { %s63_s17 = sshll.u32 %s2930_s6, 4  ;;  %s2931_s21 = smov 64   ;;  %s64_s17 = int_to_ptr.vmem [resolvable:$true] %s63_s17 }
   0xc   :  { %s2932_s4 = smov 4   ;;  %s2933_s22 = smov [#allocation11]  }
   0xd   :  { %69 = dma.hbm_to_vmem [thread:$0]  %s62_s16, 2560, %s64_s17, [#allocation9], %s2931_s21, %s2931_s21, %s2932_s4  }
   0xe   :  { %s77_s23 = sshll.u32 %s2933_s22, 4  ;;  %s78_s23 = int_to_ptr.vmem [resolvable:$true] %s77_s23 }
   0xf   :  { %80 = dma.hbm_to_vmem [thread:$0]  %s76_s20, 16, %s78_s23, [#allocation12]  }
  0x10   :  { %2918 = dma.done.wait [#allocation7], 32  }
  0x11   :  { %2919 = vsyncadd [#allocation7], 4294967264 }
  0x12   :  { %2920 = dma.done.wait [#allocation9], 2608  }
  0x13   :  { %2921 = vsyncadd [#allocation9], 4294964688 }
  0x14   :  { %2922 = dma.done.wait [#allocation12], 16  }
  0x15   :  { %2923 = vsyncadd [#allocation12], 4294967280  ;;  %v3040_v1 = vld [vmem:[%s4629_s13] sm:$0xff]  ;;  %v3045_v2 = vld [vmem:[%s4629_s13 + $0x8] sm:$0xff] }
  0x16   :  { %4679 = vst [vmem:[#allocation23_spill] sm:$0xff] %v3040_v1  ;;  %v3050_v3 = vld [vmem:[%s4629_s13 + $0x10] sm:$0xff]  ;;  %v3055_v4 = vld [vmem:[%s4629_s13 + $0x18] sm:$0xff]  ;;  %v3060_v5 = vld [vmem:[%s4629_s13 + $0x20] sm:$0xff] }
  0x17   :  { %4680 = vst [vmem:[#allocation24_spill] sm:$0xff] %v3045_v2  ;;  %v3065_v6 = vld [vmem:[%s4629_s13 + $0x28] sm:$0xff]  ;;  %v3070_v7 = vld [vmem:[%s4629_s13 + $0x30] sm:$0xff]  ;;  %v3075_v8 = vld [vmem:[%s4629_s13 + $0x38] sm:$0xff] }
  0x18   :  { %4681 = vst [vmem:[#allocation25_spill] sm:$0xff] %v3050_v3  ;;  %v3080_v9 = vld [vmem:[%s4629_s13 + $0x40] sm:$0xff]  ;;  %v3085_v10 = vld [vmem:[%s4629_s13 + $0x48] sm:$0xff]  ;;  %v3090_v11 = vld [vmem:[%s4629_s13 + $0x50] sm:$0xff] }
  0x19   :  { %4682 = vst [vmem:[#allocation26_spill] sm:$0xff] %v3055_v4  ;;  %v3095_v12 = vld [vmem:[%s4629_s13 + $0x58] sm:$0xff]  ;;  %v3100_v13 = vld [vmem:[%s4629_s13 + $0x60] sm:$0xff]  ;;  %v3105_v14 = vld [vmem:[%s4629_s13 + $0x68] sm:$0xff] }
  0x1a   :  { %4683 = vst [vmem:[#allocation27_spill] sm:$0xff] %v3060_v5  ;;  %v3110_v15 = vld [vmem:[%s4629_s13 + $0x70] sm:$0xff]  ;;  %v3115_v16 = vld [vmem:[%s4629_s13 + $0x78] sm:$0xff]  ;;  %v3120_v17 = vld [vmem:[%s4629_s13 + $0x80] sm:$0xff] }
  0x1b   :  { %4684 = vst [vmem:[#allocation28_spill] sm:$0xff] %v3065_v6  ;;  %v3125_v18 = vld [vmem:[%s4629_s13 + $0x88] sm:$0xff]  ;;  %v3130_v19 = vld [vmem:[%s4629_s13 + $0x90] sm:$0xff]  ;;  %v3135_v20 = vld [vmem:[%s4629_s13 + $0x98] sm:$0xff] }
  0x1c   :  { %4685 = vst [vmem:[#allocation29_spill] sm:$0xff] %v3070_v7  ;;  %v3140_v21 = vld [vmem:[%s4629_s13 + $0xa0] sm:$0xff]  ;;  %v3145_v22 = vld [vmem:[%s4629_s13 + $0xa8] sm:$0xff]  ;;  %v3150_v23 = vld [vmem:[%s4629_s13 + $0xb0] sm:$0xff] }
  0x1d   :  { %4686 = vst [vmem:[#allocation30_spill] sm:$0xff] %v3075_v8  ;;  %v3155_v24 = vld [vmem:[%s4629_s13 + $0xb8] sm:$0xff]  ;;  %v3160_v25 = vld [vmem:[%s4629_s13 + $0xc0] sm:$0xff]  ;;  %v3165_v26 = vld [vmem:[%s4629_s13 + $0xc8] sm:$0xff] }
  0x1e   :  { %4687 = vst [vmem:[#allocation31_spill] sm:$0xff] %v3080_v9  ;;  %v3170_v27 = vld [vmem:[%s4629_s13 + $0xd0] sm:$0xff]  ;;  %v3175_v28 = vld [vmem:[%s4629_s13 + $0xd8] sm:$0xff]  ;;  %v3180_v29 = vld [vmem:[%s4629_s13 + $0xe0] sm:$0xff] }
  0x1f   :  { %4688 = vst [vmem:[#allocation32_spill] sm:$0xff] %v3085_v10  ;;  %v3185_v30 = vld [vmem:[%s4629_s13 + $0xe8] sm:$0xff]  ;;  %v3190_v31 = vld [vmem:[%s4629_s13 + $0xf0] sm:$0xff]  ;;  %v3195_v32 = vld [vmem:[%s4629_s13 + $0xf8] sm:$0xff] }
  0x20   :  { %4689 = vst [vmem:[#allocation33_spill] sm:$0xff] %v3090_v11  ;;  %v210_v33 = vld [vmem:[%s4617_s1 + $0x38] sm:$0xff]  ;;  %v209_v34 = vld [vmem:[%s4617_s1 + $0x30] sm:$0xff]  ;;  %v208_v35 = vld [vmem:[%s4617_s1 + $0x28] sm:$0xff] }
  0x21   :  { %4690 = vst [vmem:[#allocation34_spill] sm:$0xff] %v3095_v12  ;;  %v225_v36 = vunpack.c.l.bf16 %v210_v33  ;;  %v226_v37 = vunpack.c.h.bf16 %v210_v33  ;;  %v223_v38 = vunpack.c.l.bf16 %v209_v34  ;;  %v224_v39 = vunpack.c.h.bf16 %v209_v34  ;;  %v2583_v40 = vld [vmem:[%s4617_s1 + $0x78] sm:$0xff]  ;;  %v2582_v41 = vld [vmem:[%s4617_s1 + $0x70] sm:$0xff]  ;;  %v207_v44 = vld [vmem:[%s4617_s1 + $0x20] sm:$0xff] }
  0x22   :  { %4691 = vst [vmem:[#allocation35_spill] sm:$0xff] %v3100_v13  ;;  %v254_v42 = vunpack.c.l.bf16 %v2583_v40  ;;  %v255_v43 = vunpack.c.h.bf16 %v2583_v40  ;;  %v2581_v45 = vld [vmem:[%s4617_s1 + $0x68] sm:$0xff]  ;;  %v221_v46 = vunpack.c.l.bf16 %v208_v35  ;;  %v222_v47 = vunpack.c.h.bf16 %v208_v35  ;;  %v2580_v50 = vld [vmem:[%s4617_s1 + $0x60] sm:$0xff]  ;;  %v206_v51 = vld [vmem:[%s4617_s1 + $0x18] sm:$0xff] }
  0x23   :  { %4692 = vst [vmem:[#allocation36_spill] sm:$0xff] %v3105_v14  ;;  %347 = vmatpush.msra.mxu2 %v225_v36  ;;  %376 = vmatpush.msra.mxu3 %v226_v37  ;;  %v252_v48 = vunpack.c.l.bf16 %v2582_v41  ;;  %v253_v49 = vunpack.c.h.bf16 %v2582_v41  ;;  %v250_v52 = vunpack.c.l.bf16 %v2581_v45  ;;  %v251_v53 = vunpack.c.h.bf16 %v2581_v45  ;;  %v2579_v56 = vld [vmem:[%s4617_s1 + $0x58] sm:$0xff]  ;;  %v205_v57 = vld [vmem:[%s4617_s1 + $0x10] sm:$0xff]  ;;  %v204_v63 = vld [vmem:[%s4617_s1 + $0x8] sm:$0xff] }
  0x24   :  { %4693 = vst [vmem:[#allocation37_spill] sm:$0xff] %v3115_v16  ;;  %277 = vmatpush.msra.mxu0 %v254_v42  ;;  %306 = vmatpush.msra.mxu1 %v255_v43  ;;  %v219_v54 = vunpack.c.l.bf16 %v207_v44  ;;  %v220_v55 = vunpack.c.h.bf16 %v207_v44  ;;  %v248_v58 = vunpack.c.l.bf16 %v2580_v50  ;;  %v249_v59 = vunpack.c.h.bf16 %v2580_v50  ;;  %v2578_v62 = vld [vmem:[%s4617_s1 + $0x50] sm:$0xff] }
  0x25   :  { %348 = vmatpush.msra.mxu2 %v223_v38  ;;  %377 = vmatpush.msra.mxu3 %v224_v39  ;;  %v217_v60 = vunpack.c.l.bf16 %v206_v51  ;;  %v218_v61 = vunpack.c.h.bf16 %v206_v51  ;;  %v246_v0 = vunpack.c.l.bf16 %v2579_v56  ;;  %v247_v33 = vunpack.c.h.bf16 %v2579_v56 }
  0x26   :  { %278 = vmatpush.msra.mxu0 %v252_v48  ;;  %307 = vmatpush.msra.mxu1 %v253_v49 }
  0x27   :  { %349 = vmatpush.msra.mxu2 %v221_v46  ;;  %378 = vmatpush.msra.mxu3 %v222_v47 }
  0x28   :  { %279 = vmatpush.msra.mxu0 %v250_v52  ;;  %308 = vmatpush.msra.mxu1 %v251_v53 }
  0x29   :  { %184 = vsyncadd [#allocation4], 4096  ;;  %350 = vmatpush.msra.mxu2 %v219_v54  ;;  %379 = vmatpush.msra.mxu3 %v220_v55  ;;  %v215_v34 = vunpack.c.l.bf16 %v205_v57  ;;  %v216_v35 = vunpack.c.h.bf16 %v205_v57  ;;  %v2577_v36 = vld [vmem:[%s4617_s1 + $0x48] sm:$0xff]  ;;  %v203_v37 = vld [vmem:[%s4617_s1] sm:$0xff]  ;;  %v244_v38 = vunpack.c.l.bf16 %v2578_v62  ;;  %v245_v39 = vunpack.c.h.bf16 %v2578_v62  ;;  %s2936_s20 = smov 96   ;;  %s2937_s4 = smov 48  }
  0x2a   :  { %280 = vmatpush.msra.mxu0 %v248_v58  ;;  %309 = vmatpush.msra.mxu1 %v249_v59  ;;  %v213_v40 = vunpack.c.l.bf16 %v204_v63  ;;  %v214_v41 = vunpack.c.h.bf16 %v204_v63  ;;  %v242_v42 = vunpack.c.l.bf16 %v2577_v36  ;;  %v243_v43 = vunpack.c.h.bf16 %v2577_v36  ;;  %v2576_v44 = vld [vmem:[%s4617_s1 + $0x40] sm:$0xff]  ;;  %v200_v51 = vld [vmem:[%s4616_s0 + $0x8] sm:$0xff]  ;;  %v201_v53 = vld [vmem:[%s4616_s0 + $0x10] sm:$0xff]  ;;  %s2938_s22 = smov 32   ;;  %s193_s7 = sshll.u32 %s4630_s14, 4  ;;  %s194_s7 = int_to_ptr.hbm [resolvable:$true] %s193_s7 }
  0x2b   :  { %351 = vmatpush.msra.mxu2 %v217_v60  ;;  %380 = vmatpush.msra.mxu3 %v218_v61  ;;  %v211_v45 = vunpack.c.l.bf16 %v203_v37  ;;  %v212_v46 = vunpack.c.h.bf16 %v203_v37  ;;  %v199_v47 = vld [vmem:[%s4616_s0] sm:$0xff]  ;;  %vm256_vm0 = vcmask 523264   ;;  %v240_v48 = vunpack.c.l.bf16 %v2576_v44  ;;  %v228_v52 = vld [vmem:[%s4616_s0 + $0x9] sm:$0xff]  ;;  %v229_v54 = vld [vmem:[%s4616_s0 + $0x11] sm:$0xff] }
  0x2c   :  { %281 = vmatpush.msra.mxu0 %v246_v0  ;;  %310 = vmatpush.msra.mxu1 %v247_v33  ;;  %v241_v49 = vunpack.c.h.bf16 %v2576_v44  ;;  %v227_v50 = vld [vmem:[%s4616_s0 + $0x1] sm:$0xff]  ;;  %v202_v55 = vld [vmem:[%s4616_s0 + $0x18] sm:$0x7f]  ;;  %vm539_vm1 = vcmask 130048   ;;  %vm544_vm2 = vcmask 261120   ;;  %vm549_vm3 = vcmask 392192  }
  0x2d   :  { %352 = vmatpush.msra.mxu2 %v215_v34  ;;  %381 = vmatpush.msra.mxu3 %v216_v35  ;;  %v230_v56 = vld [vmem:[%s4616_s0 + $0x19] sm:$0x7f]  ;;  %v397_v59 = vld [vmem:[%s4618_s2] sm:$0x3]  ;;  %s2934_s0 = smov 112   ;;  %s2935_s2 = smov 80  }
  0x2e   :  { %282 = vmatpush.msra.mxu0 %v244_v38  ;;  %311 = vmatpush.msra.mxu1 %v245_v39  ;;  %v400_v60 = vperm.slane %v397_v59, 1  ;;  %v399_v61 = vperm.slane %v397_v59, 0  ;;  %vm558_vm4 = vcmask 654336   ;;  %vm563_vm5 = vcmask 785408   ;;  %v2623_v1 = vld [vmem:[%s4621_s5 + $0x128] sm:$0xf] }
  0x2f   :  { %353 = vmatpush.msra.mxu2 %v213_v40  ;;  %382 = vmatpush.msra.mxu3 %v214_v41  ;;  %vm614_vm6 = vcmask 1040384   ;;  %vm616_vm7 = vcmask 1041408   ;;  %vm618_vm8 = vcmask 1042432   ;;  %vm620_vm9 = vcmask 1043456   ;;  %v3790_v4 = vld [vmem:[%s4621_s5] sm:$0xff] }
  0x30   :  { %283 = vmatpush.msra.mxu0 %v242_v42  ;;  %312 = vmatpush.msra.mxu1 %v243_v43  ;;  %vm622_vm10 = vcmask 1044480   ;;  %vm624_vm11 = vcmask 1045504   ;;  %vm626_vm12 = vcmask 1046528   ;;  %vm723_vm13 = vcmask 916480  }
  0x31   :  { %354 = vmatpush.msra.mxu2 %v211_v45  ;;  %383 = vmatpush.msra.mxu3 %v212_v46  ;;  %v1009_v3 = vunpack.c.l.bf16 %v2623_v1  ;;  %vm1409_vm14 = vcmask 520192  }
  0x32   :  { %2592 = vmatmul.msk.f32.vlgmr.msra.gmra.mxu2 %vm256_vm0, %v199_v47  ;;  %2596 = vmatmul.msk.f32.vlgmr.msra.gmra.mxu3 %vm256_vm0, %v199_v47 }
  0x33   :  { %284 = vmatpush.msra.mxu0 %v240_v48  ;;  %313 = vmatpush.msra.mxu1 %v241_v49 }
  0x34   :  { %2584 = vmatmul.msk.f32.vlgmr.msra.gmra.mxu0 %vm256_vm0, %v227_v50  ;;  %2588 = vmatmul.msk.f32.vlgmr.msra.gmra.mxu1 %vm256_vm0, %v227_v50 }
  0x3a   :  { %2593 = vmatmul.msk.f32.gmra.mxu2 %vm256_vm0, %v200_v51  ;;  %2597 = vmatmul.msk.f32.gmra.mxu3 %vm256_vm0, %v200_v51 }
  0x3c   :  { %2585 = vmatmul.msk.f32.gmra.mxu0 %vm256_vm0, %v228_v52  ;;  %2589 = vmatmul.msk.f32.gmra.mxu1 %vm256_vm0, %v228_v52 }
  0x42   :  { %2594 = vmatmul.msk.f32.gmra.mxu2 %vm256_vm0, %v201_v53  ;;  %2598 = vmatmul.msk.f32.gmra.mxu3 %vm256_vm0, %v201_v53 }
  0x44   :  { %2586 = vmatmul.msk.f32.gmra.mxu0 %vm256_vm0, %v229_v54  ;;  %2590 = vmatmul.msk.f32.gmra.mxu1 %vm256_vm0, %v229_v54 }
  0x4a   :  { %2595 = vmatmul.msk.f32.gmra.mxu2 %vm256_vm0, %v202_v55  ;;  %2599 = vmatmul.msk.f32.gmra.mxu3 %vm256_vm0, %v202_v55 }
  0x4c   :  { %2587 = vmatmul.msk.f32.gmra.mxu0 %vm256_vm0, %v230_v56  ;;  %2591 = vmatmul.msk.f32.gmra.mxu1 %vm256_vm0, %v230_v56 }
  0xb1   :  { %v286_v57 = vpop.f32.mrf.mxu0  ;;  %v315_v58 = vpop.f32.mrf.mxu1 }
  0xb5   :  { %v356_v62 = vpop.f32.mrf.mxu2  ;;  %v385_v63 = vpop.f32.mrf.mxu3 }
  0xb6   :  { %v357_v0 = vadd.f32 %v356_v62, %v286_v57  ;;  %v386_v33 = vadd.f32 %v385_v63, %v315_v58 }
  0xb8   :  { %v404_v34 = vadd.f32 %v400_v60, %v386_v33  ;;  %v403_v35 = vadd.f32 %v399_v61, %v357_v0 }
  0xb9   :  { %v289_v36 = vpop.f32.mrf.mxu0  ;;  %v318_v37 = vpop.f32.mrf.mxu1 }
  0xba   :  { %v412_v38 = vmax.f32 %v404_v34, 0.0  ;;  %v411_v39 = vmax.f32 %v403_v35, 0.0 }
  0xbc   :  { %443 = vrot.lane.b32.xlu1 %v412_v38, %s2934_s0  ;;  %423 = vrot.lane.b32.xlu0 %v411_v39, %s2934_s0 }
  0xbd   :  { %v359_v40 = vpop.f32.mrf.mxu2  ;;  %v388_v41 = vpop.f32.mrf.mxu3 }
  0xbe   :  { %v360_v42 = vadd.f32 %v359_v40, %v289_v36  ;;  %v389_v43 = vadd.f32 %v388_v41, %v318_v37 }
  0xc0   :  { %v405_v44 = vadd.f32 %v399_v61, %v360_v42  ;;  %v406_v45 = vadd.f32 %v400_v60, %v389_v43 }
  0xc1   :  { %v292_v46 = vpop.f32.mrf.mxu0  ;;  %v321_v47 = vpop.f32.mrf.mxu1 }
  0xc2   :  { %v413_v48 = vmax.f32 %v405_v44, 0.0  ;;  %v414_v49 = vmax.f32 %v406_v45, 0.0 }
  0xc4   :  { %445 = vrot.lane.b32.xlu2 %v414_v49, %s2934_s0  ;;  %425 = vrot.lane.b32.xlu0 %v413_v48, %s2934_s0 }
  0xc5   :  { %v362_v50 = vpop.f32.mrf.mxu2  ;;  %v391_v51 = vpop.f32.mrf.mxu3 }
  0xc6   :  { %v363_v52 = vadd.f32 %v362_v50, %v292_v46  ;;  %v392_v53 = vadd.f32 %v391_v51, %v321_v47 }
  0xc8   :  { %v407_v54 = vadd.f32 %v399_v61, %v363_v52  ;;  %v408_v55 = vadd.f32 %v400_v60, %v392_v53 }
  0xc9   :  { %v295_v58 = vpop.f32.mrf.mxu0  ;;  %v324_v59 = vpop.f32.mrf.mxu1 }
  0xca   :  { %v415_v56 = vmax.f32 %v407_v54, 0.0  ;;  %v416_v57 = vmax.f32 %v408_v55, 0.0  ;;  %v646_v54 = vld [vmem:[%s4619_s3 + $0x68] sm:$0xff] }
  0xcb   :  { %v673_v55 = vunpack.c.l.bf16 %v646_v54 }
  0xcc   :  { %427 = vrot.lane.b32.xlu1 %v415_v56, %s2934_s0  ;;  %447 = vrot.lane.b32.xlu0 %v416_v57, %s2934_s0 }
  0xcd   :  { %v365_v62 = vpop.f32.mrf.mxu2  ;;  %v394_v63 = vpop.f32.mrf.mxu3  ;;  %780 = vmatpush.msrb.mxu2 %v673_v55 }
  0xce   :  { %v366_v0 = vadd.f32 %v365_v62, %v295_v58  ;;  %v395_v33 = vadd.f32 %v394_v63, %v324_v59  ;;  %v645_v58 = vld [vmem:[%s4619_s3 + $0x60] sm:$0xff] }
  0xcf   :  { %v671_v63 = vunpack.c.l.bf16 %v645_v58 }
  0xd0   :  { %v409_v34 = vadd.f32 %v399_v61, %v366_v0  ;;  %v410_v35 = vadd.f32 %v400_v60, %v395_v33  ;;  %v672_v0 = vunpack.c.h.bf16 %v645_v58  ;;  %v644_v33 = vld [vmem:[%s4619_s3 + $0x58] sm:$0xff] }
  0xd1   :  { %781 = vmatpush.msrb.mxu2 %v671_v63  ;;  %v639_v63 = vld [vmem:[%s4619_s3 + $0x30] sm:$0xff] }
  0xd2   :  { %v417_v36 = vmax.f32 %v409_v34, 0.0  ;;  %v418_v37 = vmax.f32 %v410_v35, 0.0  ;;  %v643_v34 = vld [vmem:[%s4619_s3 + $0x50] sm:$0xff]  ;;  %v2613_v35 = vld [vmem:[%s4619_s3 + $0xd8] sm:$0xff] }
  0xd3   :  { %v716_v58 = vunpack.c.l.bf16 %v2613_v35 }
  0xd4   :  { %429 = vrot.lane.b32.xlu2 %v417_v36, %s2934_s0  ;;  %449 = vrot.lane.b32.xlu1 %v418_v37, %s2934_s0 }
  0xd5   :  { %730 = vmatpush.msrb.mxu0 %v716_v58 }
 0x12e   :  { %v424_v40 = vpop.permute.xlu0 %423  ;;  %v444_v60 = vpop.permute.xlu1 %443 }
 0x12f   :  { %v3296_v41 = vmax.f32 %v411_v39, %v424_v40  ;;  %v455_v42 = vmax.f32 %v412_v38, %v444_v60  ;;  %v446_v38 = vpop.permute.xlu2 %445  ;;  %v642_v40 = vld [vmem:[%s4619_s3 + $0x48] sm:$0xff]  ;;  %v667_v60 = vunpack.c.l.bf16 %v643_v34 }
 0x130   :  { %v456_v45 = vmax.f32 %v414_v49, %v446_v38  ;;  %v666_v38 = vunpack.c.h.bf16 %v642_v40 }
 0x131   :  { %487 = vrot.lane.b32.xlu1 %v3296_v41, %s2935_s2  ;;  %475 = vrot.lane.b32.xlu0 %v3296_v41, %s2936_s20 }
 0x132   :  { %463 = vrot.lane.b32.xlu2 %v3296_v41, %s2934_s0 }
 0x136   :  { %v426_v61 = vpop.permute.xlu0 %425 }
 0x137   :  { %v3304_v43 = vmax.f32 %v413_v48, %v426_v61  ;;  %v430_v46 = vpop.permute.xlu2 %429  ;;  %v668_v61 = vunpack.c.h.bf16 %v643_v34  ;;  %v660_v34 = vunpack.c.h.bf16 %v639_v63 }
 0x138   :  { %v3320_v47 = vmax.f32 %v417_v36, %v430_v46  ;;  %v669_v36 = vunpack.c.l.bf16 %v644_v33 }
 0x139   :  { %503 = vrot.lane.b32.xlu0 %v455_v42, %s2931_s21  ;;  %477 = vrot.lane.b32.xlu1 %v3304_v43, %s2936_s20 }
 0x13a   :  { %515 = vrot.lane.b32.xlu2 %v455_v42, %s2937_s4  ;;  %782 = vmatpush.msrb.mxu2 %v669_v36 }
 0x13c   :  { %783 = vmatpush.msrb.mxu2 %v667_v60  ;;  %v2610_v60 = vld [vmem:[%s4619_s3 + $0xc0] sm:$0xff] }
 0x13e   :  { %v428_v39 = vpop.permute.xlu1 %427  ;;  %v448_v48 = vpop.permute.xlu0 %447 }
 0x13f   :  { %v3309_v44 = vmax.f32 %v415_v56, %v428_v39  ;;  %v457_v49 = vmax.f32 %v416_v57, %v448_v48  ;;  %v674_v56 = vunpack.c.h.bf16 %v646_v54  ;;  %v665_v39 = vunpack.c.l.bf16 %v642_v40  ;;  %v640_v54 = vld [vmem:[%s4619_s3 + $0x38] sm:$0xff]  ;;  %v2611_v40 = vld [vmem:[%s4619_s3 + $0xc8] sm:$0xff] }
 0x140   :  { %v661_v55 = vunpack.c.l.bf16 %v640_v54 }
 0x141   :  { %467 = vrot.lane.b32.xlu0 %v3309_v44, %s2934_s0  ;;  %489 = vrot.lane.b32.xlu1 %v3304_v43, %s2935_s2 }
 0x142   :  { %527 = vrot.lane.b32.xlu2 %v455_v42, %s2938_s22  ;;  %803 = vmatpush.msrb.mxu3 %v674_v56  ;;  %v717_v42 = vunpack.c.h.bf16 %v2613_v35  ;;  %v662_v56 = vunpack.c.h.bf16 %v640_v54  ;;  %v638_v35 = vld [vmem:[%s4619_s3 + $0x28] sm:$0xff] }
 0x143   :  { %784 = vmatpush.msrb.mxu2 %v665_v39 }
 0x144   :  { %804 = vmatpush.msrb.mxu3 %v672_v0  ;;  %753 = vmatpush.msrb.mxu1 %v717_v42  ;;  %v2612_v0 = vld [vmem:[%s4619_s3 + $0xd0] sm:$0xff]  ;;  %v658_v42 = vunpack.c.h.bf16 %v638_v35 }
 0x145   :  { %v715_v36 = vunpack.c.h.bf16 %v2612_v0 }
 0x146   :  { %v450_v50 = vpop.permute.xlu1 %449 }
 0x147   :  { %v458_v51 = vmax.f32 %v418_v37, %v450_v50  ;;  %v670_v37 = vunpack.c.h.bf16 %v644_v33  ;;  %v659_v33 = vunpack.c.l.bf16 %v639_v63  ;;  %754 = vmatpush.msrb.mxu1 %v715_v36  ;;  %v636_v63 = vld [vmem:[%s4619_s3 + $0x18] sm:$0xff] }
 0x149   :  { %479 = vrot.lane.b32.xlu0 %v3309_v44, %s2936_s20  ;;  %505 = vrot.lane.b32.xlu1 %v456_v45, %s2931_s21 }
 0x14a   :  { %465 = vrot.lane.b32.xlu2 %v3304_v43, %s2934_s0  ;;  %805 = vmatpush.msrb.mxu3 %v670_v37  ;;  %v714_v37 = vunpack.c.l.bf16 %v2612_v0  ;;  %v653_v0 = vunpack.c.l.bf16 %v636_v63 }
 0x14c   :  { %806 = vmatpush.msrb.mxu3 %v668_v61  ;;  %v657_v61 = vunpack.c.l.bf16 %v638_v35  ;;  %731 = vmatpush.msrb.mxu0 %v714_v37 }
 0x14e   :  { %807 = vmatpush.msrb.mxu3 %v666_v38  ;;  %v713_v38 = vunpack.c.h.bf16 %v2611_v40 }
 0x150   :  { %755 = vmatpush.msrb.mxu1 %v713_v38 }
 0x151   :  { %491 = vrot.lane.b32.xlu0 %v3309_v44, %s2935_s2  ;;  %517 = vrot.lane.b32.xlu1 %v456_v45, %s2937_s4 }
 0x152   :  { %469 = vrot.lane.b32.xlu2 %v3320_v47, %s2934_s0 }
 0x159   :  { %529 = vrot.lane.b32.xlu1 %v456_v45, %s2938_s22  ;;  %507 = vrot.lane.b32.xlu0 %v457_v49, %s2931_s21  ;;  %v641_v45 = vld [vmem:[%s4619_s3 + $0x40] sm:$0xff] }
 0x15a   :  { %481 = vrot.lane.b32.xlu2 %v3320_v47, %s2936_s20  ;;  %v664_v50 = vunpack.c.h.bf16 %v641_v45 }
 0x15c   :  { %808 = vmatpush.msrb.mxu3 %v664_v50  ;;  %v637_v50 = vld [vmem:[%s4619_s3 + $0x20] sm:$0xff] }
 0x15d   :  { %v655_v58 = vunpack.c.l.bf16 %v637_v50 }
 0x15e   :  { %809 = vmatpush.msrb.mxu3 %v662_v56 }
 0x160   :  { %810 = vmatpush.msrb.mxu3 %v660_v34 }
 0x161   :  { %509 = vrot.lane.b32.xlu1 %v458_v51, %s2931_s21  ;;  %519 = vrot.lane.b32.xlu0 %v457_v49, %s2937_s4  ;;  %s2939_s21 = smov [#allocation3]  }
 0x162   :  { %493 = vrot.lane.b32.xlu2 %v3320_v47, %s2935_s2  ;;  %811 = vmatpush.msrb.mxu3 %v658_v42  ;;  %s195_s1 = sshll.u32 %s2939_s21, 4  ;;  %s196_s1 = int_to_ptr.vmem [resolvable:$true] %s195_s1 }
 0x163   :  { %198 = dma.hbm_to_vmem [thread:$0]  %s194_s7, 16384, %s196_s1, [#allocation4 + $0x1] }
 0x169   :  { %533 = vrot.lane.b32.xlu1 %v458_v51, %s2938_s22  ;;  %521 = vrot.lane.b32.xlu0 %v458_v51, %s2937_s4 }
 0x16a   :  { %531 = vrot.lane.b32.xlu2 %v457_v49, %s2938_s22  ;;  %v663_v49 = vunpack.c.l.bf16 %v641_v45  ;;  %v711_v45 = vunpack.c.h.bf16 %v2610_v60 }
 0x16c   :  { %785 = vmatpush.msrb.mxu2 %v663_v49  ;;  %v712_v49 = vunpack.c.l.bf16 %v2611_v40  ;;  %756 = vmatpush.msrb.mxu1 %v711_v45  ;;  %v635_v40 = vld [vmem:[%s4619_s3 + $0x10] sm:$0xff]  ;;  %v634_v45 = vld [vmem:[%s4619_s3 + $0x8] sm:$0xff] }
 0x16d   :  { %v651_v42 = vunpack.c.l.bf16 %v635_v40 }
 0x16e   :  { %786 = vmatpush.msrb.mxu2 %v661_v55  ;;  %732 = vmatpush.msrb.mxu0 %v712_v49  ;;  %v649_v49 = vunpack.c.l.bf16 %v634_v45 }
 0x170   :  { %787 = vmatpush.msrb.mxu2 %v659_v33  ;;  %v654_v33 = vunpack.c.h.bf16 %v636_v63  ;;  %v633_v63 = vld [vmem:[%s4619_s3] sm:$0xff] }
 0x172   :  { %788 = vmatpush.msrb.mxu2 %v657_v61  ;;  %v2608_v61 = vld [vmem:[%s4619_s3 + $0xb0] sm:$0xff] }
 0x173   :  { %v706_v38 = vunpack.c.l.bf16 %v2608_v61 }
 0x174   :  { %789 = vmatpush.msrb.mxu2 %v655_v58 }
 0x176   :  { %790 = vmatpush.msrb.mxu2 %v653_v0 }
 0x178   :  { %791 = vmatpush.msrb.mxu2 %v651_v42  ;;  %v2604_v42 = vld [vmem:[%s4619_s3 + $0x90] sm:$0xff] }
 0x17a   :  { %792 = vmatpush.msrb.mxu2 %v649_v49 }
 0x18c   :  { %v3332_v52 = vpop.permute.xlu2 %463 }
 0x18d   :  { %v540_v39 = vsel %vm539_vm1, %v3296_v41, %v3332_v52  ;;  %v656_v41 = vunpack.c.h.bf16 %v637_v50  ;;  %v710_v52 = vunpack.c.l.bf16 %v2610_v60  ;;  %v650_v50 = vunpack.c.h.bf16 %v634_v45  ;;  %v2603_v45 = vld [vmem:[%s4619_s3 + $0x88] sm:$0xff] }
 0x18e   :  { %v696_v49 = vunpack.c.l.bf16 %v2603_v45 }
 0x18f   :  { %812 = vmatpush.msrb.mxu3 %v656_v41  ;;  %733 = vmatpush.msrb.mxu0 %v710_v52  ;;  %v2606_v41 = vld [vmem:[%s4619_s3 + $0xa0] sm:$0xff] }
 0x191   :  { %813 = vmatpush.msrb.mxu3 %v654_v33  ;;  %v703_v33 = vunpack.c.h.bf16 %v2606_v41 }
 0x194   :  { %v3334_v53 = vpop.permute.xlu2 %515 }
 0x19c   :  { %v3339_v57 = vpop.permute.xlu2 %527 }
 0x1a3   :  { %v3344_v59 = vpop.permute.xlu1 %487  ;;  %v476_v62 = vpop.permute.xlu0 %475 }
 0x1a4   :  { %v3365_v51 = vpop.permute.xlu2 %465  ;;  %v545_v54 = vsel %vm544_vm2, %v540_v39, %v476_v62  ;;  %v2609_v62 = vld [vmem:[%s4619_s3 + $0xb8] sm:$0xff]  ;;  %v707_v39 = vunpack.c.h.bf16 %v2608_v61 }
 0x1a5   :  { %v550_v36 = vsel %vm549_vm3, %v545_v54, %v3344_v59  ;;  %v709_v37 = vunpack.c.h.bf16 %v2609_v62  ;;  %v708_v35 = vunpack.c.l.bf16 %v2609_v62  ;;  %v652_v59 = vunpack.c.h.bf16 %v635_v40  ;;  %v2605_v40 = vld [vmem:[%s4619_s3 + $0x98] sm:$0xff] }
 0x1a6   :  { %v700_v61 = vunpack.c.l.bf16 %v2605_v40 }
 0x1a7   :  { %757 = vmatpush.msrb.mxu1 %v709_v37  ;;  %734 = vmatpush.msrb.mxu0 %v708_v35  ;;  %v702_v37 = vunpack.c.l.bf16 %v2606_v41 }
 0x1a8   :  { %814 = vmatpush.msrb.mxu3 %v652_v59 }
 0x1a9   :  { %758 = vmatpush.msrb.mxu1 %v707_v39  ;;  %735 = vmatpush.msrb.mxu0 %v706_v38  ;;  %v698_v38 = vunpack.c.l.bf16 %v2604_v42 }
 0x1aa   :  { %815 = vmatpush.msrb.mxu3 %v650_v50  ;;  %v2602_v50 = vld [vmem:[%s4619_s3 + $0x80] sm:$0xff] }
 0x1ab   :  { %v3361_v46 = vpop.permute.xlu1 %477  ;;  %v3363_v48 = vpop.permute.xlu0 %503 }
 0x1ac   :  { %v3402_v34 = vpop.permute.xlu2 %469  ;;  %v554_v60 = vsel %vm256_vm0, %v550_v36, %v3363_v48  ;;  %v2607_v48 = vld [vmem:[%s4619_s3 + $0xa8] sm:$0xff]  ;;  %v648_v36 = vunpack.c.h.bf16 %v633_v63 }
 0x1ad   :  { %v559_v54 = vsel %vm558_vm4, %v554_v60, %v3334_v53  ;;  %v705_v58 = vunpack.c.h.bf16 %v2607_v48  ;;  %v704_v52 = vunpack.c.l.bf16 %v2607_v48  ;;  %v647_v53 = vunpack.c.l.bf16 %v633_v63 }
 0x1ae   :  { %v564_v35 = vsel %vm563_vm5, %v559_v54, %v3339_v57  ;;  %816 = vmatpush.msrb.mxu3 %v648_v36  ;;  %v701_v60 = vunpack.c.h.bf16 %v2605_v40  ;;  %v699_v57 = vunpack.c.h.bf16 %v2604_v42  ;;  %v697_v48 = vunpack.c.h.bf16 %v2603_v45  ;;  %v2601_v54 = vld [vmem:[%s4619_s3 + $0x78] sm:$0xff]  ;;  %v2600_v40 = vld [vmem:[%s4619_s3 + $0x70] sm:$0xff] }
 0x1af   :  { %759 = vmatpush.msrb.mxu1 %v705_v58  ;;  %736 = vmatpush.msrb.mxu0 %v704_v52  ;;  %v569_v39 = vrot.slane %v564_v35, 1  ;;  %v695_v52 = vunpack.c.h.bf16 %v2602_v50  ;;  %v694_v63 = vunpack.c.l.bf16 %v2602_v50  ;;  %v692_v36 = vunpack.c.l.bf16 %v2601_v54 }
 0x1b0   :  { %793 = vmatpush.msrb.mxu2 %v647_v53  ;;  %v693_v53 = vunpack.c.h.bf16 %v2601_v54  ;;  %v690_v42 = vunpack.c.l.bf16 %v2600_v40 }
 0x1b1   :  { %760 = vmatpush.msrb.mxu1 %v703_v33  ;;  %737 = vmatpush.msrb.mxu0 %v702_v37  ;;  %v571_v33 = vmax.f32 %v564_v35, %v569_v39  ;;  %v541_v37 = vsel %vm539_vm1, %v3304_v43, %v3365_v51  ;;  %v691_v35 = vunpack.c.h.bf16 %v2600_v40 }
 0x1b3   :  { %v3392_v55 = vpop.permute.xlu1 %489  ;;  %v3394_v56 = vpop.permute.xlu0 %467  ;;  %761 = vmatpush.msrb.mxu1 %v701_v60  ;;  %738 = vmatpush.msrb.mxu0 %v700_v61  ;;  %v546_v60 = vsel %vm544_vm2, %v541_v37, %v3361_v46  ;;  %v585_v61 = vrot.slane %v571_v33, 1  ;;  %v587_v45 = vrot.slane %v571_v33, 2 }
 0x1b4   :  { %v3438_v59 = vpop.permute.xlu2 %481  ;;  %v551_v39 = vsel %vm549_vm3, %v546_v60, %v3392_v55  ;;  %v542_v55 = vsel %vm539_vm1, %v3309_v44, %v3394_v56  ;;  %v2652_v44 = vld [vmem:[%s4621_s5 + $0x1d4] sm:$0xff]  ;;  %v2650_v56 = vld [vmem:[%s4621_s5 + $0x1c8] sm:$0xff] }
 0x1b5   :  { %762 = vmatpush.msrb.mxu1 %v699_v57  ;;  %739 = vmatpush.msrb.mxu0 %v698_v38  ;;  %v1052_v60 = vunpack.c.l.bf16 %v2652_v44 }
 0x1b7   :  { %763 = vmatpush.msrb.mxu1 %v697_v48  ;;  %740 = vmatpush.msrb.mxu0 %v696_v49  ;;  %v615_v49 = vsel %vm614_vm6, %v571_v33, %v585_v61  ;;  %v1053_v61 = vunpack.c.h.bf16 %v2652_v44 }
 0x1b9   :  { %764 = vmatpush.msrb.mxu1 %v695_v52  ;;  %741 = vmatpush.msrb.mxu0 %v694_v63  ;;  %v589_v52 = vrot.slane %v571_v33, 3 }
 0x1ba   :  { %1141 = vmatpush.msra.mxu2 %v1053_v61 }
 0x1bb   :  { %v506_v62 = vpop.permute.xlu1 %505  ;;  %v3428_v0 = vpop.permute.xlu0 %479  ;;  %765 = vmatpush.msrb.mxu1 %v693_v53  ;;  %742 = vmatpush.msrb.mxu0 %v692_v36 }
 0x1bc   :  { %v555_v57 = vsel %vm256_vm0, %v551_v39, %v506_v62  ;;  %v494_v38 = vpop.permute.xlu2 %493  ;;  %v617_v62 = vsel %vm616_vm7, %v615_v49, %v587_v45  ;;  %v543_v45 = vsel %vm539_vm1, %v3320_v47, %v3402_v34 }
 0x1bd   :  { %766 = vmatpush.msrb.mxu1 %v691_v35  ;;  %743 = vmatpush.msrb.mxu0 %v690_v42  ;;  %v619_v37 = vsel %vm618_vm8, %v617_v62, %v589_v52  ;;  %v1049_v35 = vunpack.c.l.bf16 %v2650_v56  ;;  %v2668_v62 = vld [vmem:[%s4621_s5 + $0x234] sm:$0xff]  ;;  %v2644_v52 = vld [vmem:[%s4621_s5 + $0x1a4] sm:$0xff] }
 0x1bf   :  { %1095 = vmatpush.msra.mxu0 %v1052_v60  ;;  %v3511_v60 = vld [vmem:[%s4621_s5 + $0x21c] sm:$0xff] }
 0x1c1   :  { %1096 = vmatpush.msra.mxu0 %v1049_v35 }
 0x1c3   :  { %v518_v58 = vpop.permute.xlu1 %517  ;;  %v492_v41 = vpop.permute.xlu0 %491 }
 0x1c4   :  { %v560_v43 = vsel %vm558_vm4, %v555_v57, %v518_v58  ;;  %v547_v58 = vsel %vm544_vm2, %v542_v55, %v3428_v0  ;;  %v2648_v0 = vld [vmem:[%s4621_s5 + $0x1bc] sm:$0xff]  ;;  %v532_v42 = vpop.permute.xlu2 %531 }
 0x1c5   :  { %v552_v63 = vsel %vm549_vm3, %v547_v58, %v492_v41  ;;  %v1047_v49 = vunpack.c.h.bf16 %v2648_v0 }
 0x1cb   :  { %v530_v51 = vpop.permute.xlu1 %529  ;;  %v508_v48 = vpop.permute.xlu0 %507 }
 0x1cc   :  { %v565_v46 = vsel %vm563_vm5, %v560_v43, %v530_v51  ;;  %v556_v36 = vsel %vm256_vm0, %v552_v63, %v508_v48  ;;  %v1050_v43 = vunpack.c.h.bf16 %v2650_v56  ;;  %v2646_v51 = vld [vmem:[%s4621_s5 + $0x1b0] sm:$0xff]  ;;  %v1076_v56 = vunpack.c.l.bf16 %v2668_v62 }
 0x1cd   :  { %v573_v50 = vrot.slane %v565_v46, 1  ;;  %v1043_v47 = vunpack.c.l.bf16 %v2646_v51  ;;  %v1044_v34 = vunpack.c.h.bf16 %v2646_v51 }
 0x1ce   :  { %1142 = vmatpush.msra.mxu2 %v1050_v43  ;;  %1126 = vmatpush.msra.mxu1 %v1076_v56 }
 0x1cf   :  { %v575_v54 = vmax.f32 %v565_v46, %v573_v50  ;;  %v1046_v46 = vunpack.c.l.bf16 %v2648_v0  ;;  %v548_v50 = vsel %vm544_vm2, %v543_v45, %v3438_v59  ;;  %v1077_v0 = vunpack.c.h.bf16 %v2668_v62 }
 0x1d0   :  { %v553_v63 = vsel %vm549_vm3, %v548_v50, %v494_v38  ;;  %1143 = vmatpush.msra.mxu2 %v1047_v49  ;;  %v2638_v50 = vld [vmem:[%s4621_s5 + $0x180] sm:$0xff] }
 0x1d1   :  { %v592_v53 = vrot.slane %v575_v54, 4  ;;  %v594_v33 = vrot.slane %v575_v54, 5  ;;  %1097 = vmatpush.msra.mxu0 %v1046_v46  ;;  %1172 = vmatpush.msra.mxu3 %v1077_v0 }
 0x1d2   :  { %1144 = vmatpush.msra.mxu2 %v1044_v34 }
 0x1d3   :  { %v510_v41 = vpop.permute.xlu1 %509  ;;  %v520_v40 = vpop.permute.xlu0 %519  ;;  %v621_v57 = vsel %vm620_vm9, %v619_v37, %v592_v53  ;;  %v596_v53 = vrot.slane %v575_v54, 6  ;;  %v2666_v37 = vld [vmem:[%s4621_s5 + $0x228] sm:$0xff]  ;;  %v1040_v54 = vunpack.c.l.bf16 %v2644_v52  ;;  %1098 = vmatpush.msra.mxu0 %v1043_v47 }
 0x1d4   :  { %v561_v39 = vsel %vm558_vm4, %v556_v36, %v520_v40  ;;  %v623_v58 = vsel %vm622_vm10, %v621_v57, %v594_v33  ;;  %v2642_v36 = vld [vmem:[%s4621_s5 + $0x198] sm:$0xff]  ;;  %v557_v44 = vsel %vm256_vm0, %v553_v63, %v510_v41  ;;  %v1041_v40 = vunpack.c.h.bf16 %v2644_v52 }
 0x1d5   :  { %v566_v48 = vsel %vm563_vm5, %v561_v39, %v532_v42  ;;  %v625_v38 = vsel %vm624_vm11, %v623_v58, %v596_v53  ;;  %v1037_v41 = vunpack.c.l.bf16 %v2642_v36  ;;  %v1038_v42 = vunpack.c.h.bf16 %v2642_v36  ;;  %v2640_v39 = vld [vmem:[%s4621_s5 + $0x18c] sm:$0xff]  ;;  %1099 = vmatpush.msra.mxu0 %v1040_v54  ;;  %v2636_v52 = vld [vmem:[%s4621_s5 + $0x174] sm:$0xff] }
 0x1d6   :  { %v577_v55 = vrot.slane %v566_v48, 1  ;;  %v1073_v57 = vunpack.c.l.bf16 %v2666_v37  ;;  %v1074_v43 = vunpack.c.h.bf16 %v2666_v37  ;;  %1145 = vmatpush.msra.mxu2 %v1041_v40  ;;  %v1034_v58 = vunpack.c.l.bf16 %v2640_v39 }
 0x1d7   :  { %v1035_v47 = vunpack.c.h.bf16 %v2640_v39  ;;  %1100 = vmatpush.msra.mxu0 %v1037_v41  ;;  %v1031_v36 = vunpack.c.l.bf16 %v2638_v50  ;;  %v1032_v37 = vunpack.c.h.bf16 %v2638_v50  ;;  %v1028_v0 = vunpack.c.l.bf16 %v2636_v52  ;;  %v2632_v41 = vld [vmem:[%s4621_s5 + $0x15c] sm:$0xff]  ;;  %v2662_v50 = vld [vmem:[%s4621_s5 + $0x210] sm:$0xff] }
 0x1d8   :  { %v579_v59 = vmax.f32 %v566_v48, %v577_v55  ;;  %v1070_v55 = vunpack.c.l.bf16 %v3511_v60  ;;  %1127 = vmatpush.msra.mxu1 %v1073_v57  ;;  %1173 = vmatpush.msra.mxu3 %v1074_v43 }
 0x1d9   :  { %1146 = vmatpush.msra.mxu2 %v1038_v42  ;;  %1101 = vmatpush.msra.mxu0 %v1034_v58 }
 0x1da   :  { %v599_v33 = vrot.slane %v579_v59, 1  ;;  %v601_v51 = vrot.slane %v579_v59, 2  ;;  %v603_v45 = vrot.slane %v579_v59, 3  ;;  %v605_v34 = vrot.slane %v579_v59, 4  ;;  %1128 = vmatpush.msra.mxu1 %v1070_v55 }
 0x1db   :  { %v534_v61 = vpop.permute.xlu1 %533  ;;  %v522_v35 = vpop.permute.xlu0 %521  ;;  %1147 = vmatpush.msra.mxu2 %v1035_v47  ;;  %1102 = vmatpush.msra.mxu0 %v1031_v36  ;;  %v1068_v47 = vunpack.c.h.bf16 %v2662_v50 }
 0x1dc   :  { %v562_v48 = vsel %vm558_vm4, %v557_v44, %v522_v35  ;;  %v627_v46 = vsel %vm626_vm12, %v625_v38, %v599_v33  ;;  %v628_v53 = vsel %vm614_vm6, %v601_v51, %v603_v45  ;;  %v2634_v44 = vld [vmem:[%s4621_s5 + $0x168] sm:$0xff]  ;;  %v1029_v33 = vunpack.c.h.bf16 %v2636_v52  ;;  %v2626_v52 = vld [vmem:[%s4621_s5 + $0x138] sm:$0xff] }
 0x1dd   :  { %v567_v49 = vsel %vm563_vm5, %v562_v48, %v534_v61  ;;  %2618 = vmatmul.msk.f32.vlgmr.msrb.gmra.mxu2 %vm723_vm13, %v627_v46  ;;  %2620 = vmatmul.msk.f32.vlgmr.msrb.gmra.mxu3 %vm723_vm13, %v627_v46  ;;  %v629_v38 = vsel %vm616_vm7, %v628_v53, %v605_v34  ;;  %v1025_v61 = vunpack.c.l.bf16 %v2634_v44  ;;  %v1026_v35 = vunpack.c.h.bf16 %v2634_v44  ;;  %v2628_v34 = vld [vmem:[%s4621_s5 + $0x144] sm:$0xff]  ;;  %v2658_v44 = vld [vmem:[%s4621_s5 + $0x1f8] sm:$0xff] }
 0x1de   :  { %v581_v62 = vrot.slane %v567_v49, 1  ;;  %1148 = vmatpush.msra.mxu2 %v1032_v37  ;;  %1103 = vmatpush.msra.mxu0 %v1028_v0  ;;  %v720_v57 = vrot.slane %v627_v46, 1  ;;  %v1022_v51 = vunpack.c.l.bf16 %v2632_v41  ;;  %v1023_v48 = vunpack.c.h.bf16 %v2632_v41 }
 0x1df   :  { %v1071_v46 = vunpack.c.h.bf16 %v3511_v60  ;;  %v2660_v60 = vld [vmem:[%s4621_s5 + $0x204] sm:$0xff]  ;;  %v1017_v36 = vunpack.c.h.bf16 %v2628_v34  ;;  %v1014_v0 = vunpack.c.h.bf16 %v2626_v52 }
 0x1e0   :  { %v583_v63 = vmax.f32 %v567_v49, %v581_v62  ;;  %1149 = vmatpush.msra.mxu2 %v1029_v33  ;;  %1104 = vmatpush.msra.mxu0 %v1025_v61  ;;  %v2630_v49 = vld [vmem:[%s4621_s5 + $0x150] sm:$0xff]  ;;  %v1067_v62 = vunpack.c.l.bf16 %v2662_v50  ;;  %v1064_v53 = vunpack.c.l.bf16 %v2660_v60  ;;  %v1065_v37 = vunpack.c.h.bf16 %v2660_v60  ;;  %v3601_v60 = vld [vmem:[%s4621_s5 + $0xa8] sm:$0xff] }
 0x1e1   :  { %v1019_v55 = vunpack.c.l.bf16 %v2630_v49  ;;  %v1020_v58 = vunpack.c.h.bf16 %v2630_v49  ;;  %1174 = vmatpush.msra.mxu3 %v1071_v46  ;;  %v1062_v33 = vunpack.c.h.bf16 %v2658_v44  ;;  %v2669_v49 = vld [vmem:[%s4621_s5 + $0x23c] sm:$0xf]  ;;  %v3591_v50 = vld [vmem:[%s4621_s5 + $0x114] sm:$0xff] }
 0x1e2   :  { %v608_v56 = vrot.slane %v583_v63, 5  ;;  %v610_v59 = vrot.slane %v583_v63, 6  ;;  %v612_v54 = vrot.slane %v583_v63, 7  ;;  %1150 = vmatpush.msra.mxu2 %v1026_v35  ;;  %1105 = vmatpush.msra.mxu0 %v1022_v51  ;;  %v1016_v63 = vunpack.c.l.bf16 %v2628_v34  ;;  %v2653_v51 = vld [vmem:[%s4621_s5 + $0x1dc] sm:$0xf] }
 0x1e3   :  { %1129 = vmatpush.msra.mxu1 %v1067_v62  ;;  %1175 = vmatpush.msra.mxu3 %v1068_v47  ;;  %v955_v47 = vunpack.c.l.bf16 %v3591_v50  ;;  %v2651_v34 = vld [vmem:[%s4621_s5 + $0x1d0] sm:$0xf] }
 0x1e4   :  { %v630_v40 = vsel %vm618_vm8, %v629_v38, %v608_v56  ;;  %1151 = vmatpush.msra.mxu2 %v1023_v48  ;;  %1106 = vmatpush.msra.mxu0 %v1019_v55  ;;  %v1013_v56 = vunpack.c.l.bf16 %v2626_v52  ;;  %v2624_v38 = vld [vmem:[%s4621_s5 + $0x12c] sm:$0xff]  ;;  %v1054_v55 = vunpack.c.l.bf16 %v2653_v51  ;;  %v1051_v52 = vunpack.c.l.bf16 %v2651_v34 }
 0x1e5   :  { %v631_v42 = vsel %vm620_vm9, %v630_v40, %v610_v59  ;;  %v1061_v59 = vunpack.c.l.bf16 %v2658_v44  ;;  %1130 = vmatpush.msra.mxu1 %v1064_v53  ;;  %1176 = vmatpush.msra.mxu3 %v1065_v37  ;;  %v1010_v40 = vunpack.c.l.bf16 %v2624_v38  ;;  %v1011_v35 = vunpack.c.h.bf16 %v2624_v38  ;;  %v2667_v53 = vld [vmem:[%s4621_s5 + $0x230] sm:$0xf]  ;;  %v2665_v38 = vld [vmem:[%s4621_s5 + $0x224] sm:$0xf] }
 0x1e6   :  { %v632_v39 = vsel %vm622_vm10, %v631_v42, %v612_v54  ;;  %1152 = vmatpush.msra.mxu2 %v1020_v58  ;;  %1107 = vmatpush.msra.mxu0 %v1016_v63  ;;  %v2656_v54 = vld [vmem:[%s4621_s5 + $0x1ec] sm:$0xff]  ;;  %v2622_v42 = vld [vmem:[%s4621_s5 + $0x120] sm:$0xff]  ;;  %v1078_v58 = vunpack.c.l.bf16 %v2669_v49  ;;  %v928_v63 = vunpack.c.l.bf16 %v3601_v60  ;;  %v1075_v37 = vunpack.c.l.bf16 %v2667_v53  ;;  %v3673_v53 = vld [vmem:[%s4621_s5 + $0x78] sm:$0xff] }
 0x1e7   :  { %v721_v43 = vrot.slane %v632_v39, 1  ;;  %2619 = vmatmul.msk.f32.gmra.mxu2 %vm723_vm13, %v632_v39  ;;  %2621 = vmatmul.msk.f32.gmra.mxu3 %vm723_vm13, %v632_v39  ;;  %v1058_v61 = vunpack.c.l.bf16 %v2656_v54  ;;  %v1059_v41 = vunpack.c.h.bf16 %v2656_v54  ;;  %v2654_v39 = vld [vmem:[%s4621_s5 + $0x1e0] sm:$0xff]  ;;  %v1008_v48 = vunpack.c.h.bf16 %v2622_v42 }
 0x1e8   :  { %1153 = vmatpush.msra.mxu2 %v1017_v36  ;;  %1108 = vmatpush.msra.mxu0 %v1013_v56  ;;  %v1056_v46 = vunpack.c.h.bf16 %v2654_v39  ;;  %v3610_v36 = vld [vmem:[%s4621_s5 + $0x108] sm:$0xff]  ;;  %v2649_v56 = vld [vmem:[%s4621_s5 + $0x1c4] sm:$0xf]  ;;  %v3628_v54 = vld [vmem:[%s4621_s5 + $0xfc] sm:$0xff] }
 0x1e9   :  { %v722_v45 = vsel %vm626_vm12, %v720_v57, %v721_v43  ;;  %1131 = vmatpush.msra.mxu1 %v1061_v59  ;;  %1177 = vmatpush.msra.mxu3 %v1062_v33  ;;  %v1007_v57 = vunpack.c.l.bf16 %v2622_v42  ;;  %v952_v44 = vunpack.c.l.bf16 %v3610_v36  ;;  %v3619_v59 = vld [vmem:[%s4621_s5 + $0x9c] sm:$0xff]  ;;  %v3655_v49 = vld [vmem:[%s4621_s5 + $0x84] sm:$0xff] }
 0x1ea   :  { %2614 = vmatmul.msk.f32.vlgmr.msrb.gmra.mxu0 %vm723_vm13, %v722_v45  ;;  %2616 = vmatmul.msk.f32.vlgmr.msrb.gmra.mxu1 %vm723_vm13, %v722_v45  ;;  %v3583_v45 = vld [vmem:[%s4621_s5 + $0xb4] sm:$0xff]  ;;  %v925_v33 = vunpack.c.l.bf16 %v3619_v59 }
 0x1eb   :  { %1154 = vmatpush.msra.mxu2 %v1014_v0  ;;  %1109 = vmatpush.msra.mxu0 %v1010_v40  ;;  %v931_v62 = vunpack.c.l.bf16 %v3583_v45  ;;  %v1048_v0 = vunpack.c.l.bf16 %v2649_v56  ;;  %v1072_v40 = vunpack.c.l.bf16 %v2665_v38  ;;  %v2659_v56 = vld [vmem:[%s4621_s5 + $0x200] sm:$0xf] }
 0x1ec   :  { %1132 = vmatpush.msra.mxu1 %v1058_v61  ;;  %1178 = vmatpush.msra.mxu3 %v1059_v41  ;;  %v949_v61 = vunpack.c.l.bf16 %v3628_v54  ;;  %v3637_v41 = vld [vmem:[%s4621_s5 + $0x90] sm:$0xff] }
 0x1ed   :  { %1155 = vmatpush.msra.mxu2 %v1011_v35  ;;  %1110 = vmatpush.msra.mxu0 %v1007_v57  ;;  %v2647_v35 = vld [vmem:[%s4621_s5 + $0x1b8] sm:$0xf] }
 0x1ee   :  { %1179 = vmatpush.msra.mxu3 %v1056_v46  ;;  %v1045_v42 = vunpack.c.l.bf16 %v2647_v35  ;;  %v2663_v57 = vld [vmem:[%s4621_s5 + $0x218] sm:$0xf]  ;;  %v2645_v46 = vld [vmem:[%s4621_s5 + $0x1ac] sm:$0xf] }
 0x1ef   :  { %1156 = vmatpush.msra.mxu2 %v1008_v48  ;;  %1237 = vmatpush.msrb.mxu0 %v931_v62  ;;  %v1069_v51 = vunpack.c.l.bf16 %v2663_v57  ;;  %v919_v62 = vunpack.c.l.bf16 %v3655_v49  ;;  %v3700_v57 = vld [vmem:[%s4621_s5 + $0xcc] sm:$0xff] }
 0x1f0   :  { %1218 = vmatpush.msrb.mxu3 %v1078_v58  ;;  %v2661_v58 = vld [vmem:[%s4621_s5 + $0x20c] sm:$0xf] }
 0x1f1   :  { %1268 = vmatpush.msrb.mxu2 %v955_v47  ;;  %1238 = vmatpush.msrb.mxu0 %v928_v63  ;;  %v3664_v47 = vld [vmem:[%s4621_s5 + $0xe4] sm:$0xff]  ;;  %v1066_v34 = vunpack.c.l.bf16 %v2661_v58  ;;  %v2643_v63 = vld [vmem:[%s4621_s5 + $0x1a0] sm:$0xf] }
 0x1f2   :  { %2615 = vmatmul.msk.f32.gmra.mxu0 %vm723_vm13, %v721_v43  ;;  %2617 = vmatmul.msk.f32.gmra.mxu1 %vm723_vm13, %v721_v43  ;;  %v1055_v43 = vunpack.c.l.bf16 %v2654_v39  ;;  %v922_v39 = vunpack.c.l.bf16 %v3637_v41 }
 0x1f3   :  { %1219 = vmatpush.msrb.mxu3 %v1075_v37  ;;  %1269 = vmatpush.msrb.mxu2 %v952_v44  ;;  %v1039_v37 = vunpack.c.l.bf16 %v2643_v63  ;;  %v916_v44 = vunpack.c.l.bf16 %v3673_v53 }
 0x1f4   :  { %1133 = vmatpush.msra.mxu1 %v1055_v43  ;;  %v3646_v43 = vld [vmem:[%s4621_s5 + $0xf0] sm:$0xff]  ;;  %1239 = vmatpush.msrb.mxu0 %v925_v33  ;;  %v1063_v33 = vunpack.c.l.bf16 %v2659_v56 }
 0x1f5   :  { %v946_v48 = vunpack.c.l.bf16 %v3646_v43  ;;  %1220 = vmatpush.msrb.mxu3 %v1072_v40  ;;  %1270 = vmatpush.msrb.mxu2 %v949_v61  ;;  %v2641_v40 = vld [vmem:[%s4621_s5 + $0x194] sm:$0xf]  ;;  %v3691_v61 = vld [vmem:[%s4621_s5 + $0x6c] sm:$0xff] }
 0x1f6   :  { %1187 = vmatpush.msrb.mxu1 %v1054_v55  ;;  %v1042_v55 = vunpack.c.l.bf16 %v2645_v46  ;;  %1240 = vmatpush.msrb.mxu0 %v922_v39  ;;  %v1036_v35 = vunpack.c.l.bf16 %v2641_v40  ;;  %v2657_v39 = vld [vmem:[%s4621_s5 + $0x1f4] sm:$0xf]  ;;  %v2639_v46 = vld [vmem:[%s4621_s5 + $0x188] sm:$0xf]  ;;  %v2635_v40 = vld [vmem:[%s4621_s5 + $0x170] sm:$0xf] }
 0x1f7   :  { %1221 = vmatpush.msrb.mxu3 %v1069_v51  ;;  %1271 = vmatpush.msrb.mxu2 %v946_v48  ;;  %v1060_v51 = vunpack.c.l.bf16 %v2657_v39  ;;  %v937_v48 = vunpack.c.l.bf16 %v3700_v57  ;;  %v3727_v56 = vld [vmem:[%s4621_s5 + $0x54] sm:$0xff] }
 0x1f8   :  { %1188 = vmatpush.msrb.mxu1 %v1051_v52  ;;  %v943_v52 = vunpack.c.l.bf16 %v3664_v47  ;;  %1241 = vmatpush.msrb.mxu0 %v919_v62  ;;  %v1033_v62 = vunpack.c.l.bf16 %v2639_v46 }
 0x1f9   :  { %1222 = vmatpush.msrb.mxu3 %v1066_v34  ;;  %v2655_v34 = vld [vmem:[%s4621_s5 + $0x1e8] sm:$0xf] }
 0x1fa   :  { %1189 = vmatpush.msrb.mxu1 %v1048_v0  ;;  %v3682_v0 = vld [vmem:[%s4621_s5 + $0xd8] sm:$0xff]  ;;  %1272 = vmatpush.msrb.mxu2 %v943_v52  ;;  %v3718_v52 = vld [vmem:[%s4621_s5 + $0xc0] sm:$0xff]  ;;  %v1057_v63 = vunpack.c.l.bf16 %v2655_v34  ;;  %v3754_v34 = vld [vmem:[%s4621_s5 + $0x30] sm:$0xff] }
 0x1fb   :  { %v940_v38 = vunpack.c.l.bf16 %v3682_v0  ;;  %1242 = vmatpush.msrb.mxu0 %v916_v44  ;;  %1223 = vmatpush.msrb.mxu3 %v1063_v33  ;;  %v2637_v44 = vld [vmem:[%s4621_s5 + $0x17c] sm:$0xf] }
 0x1fc   :  { %1190 = vmatpush.msrb.mxu1 %v1045_v42  ;;  %v913_v42 = vunpack.c.l.bf16 %v3691_v61  ;;  %v1030_v33 = vunpack.c.l.bf16 %v2637_v44  ;;  %v2629_v44 = vld [vmem:[%s4621_s5 + $0x14c] sm:$0xf] }
 0x1fd   :  { %1273 = vmatpush.msrb.mxu2 %v940_v38  ;;  %1224 = vmatpush.msrb.mxu3 %v1060_v51  ;;  %v907_v38 = vunpack.c.l.bf16 %v3727_v56  ;;  %v2633_v51 = vld [vmem:[%s4621_s5 + $0x164] sm:$0xf] }
 0x1fe   :  { %1191 = vmatpush.msrb.mxu1 %v1042_v55  ;;  %v3709_v55 = vld [vmem:[%s4621_s5 + $0x60] sm:$0xff]  ;;  %1243 = vmatpush.msrb.mxu0 %v913_v42  ;;  %v1027_v42 = vunpack.c.l.bf16 %v2635_v40  ;;  %v1024_v46 = vunpack.c.l.bf16 %v2633_v51 }
 0x1ff   :  { %v910_v58 = vunpack.c.l.bf16 %v3709_v55  ;;  %1274 = vmatpush.msrb.mxu2 %v937_v48  ;;  %1225 = vmatpush.msrb.mxu3 %v1057_v63  ;;  %v3745_v48 = vld [vmem:[%s4621_s5 + $0x3c] sm:$0xff] }
 0x200   :  { %1192 = vmatpush.msrb.mxu1 %v1039_v37  ;;  %v934_v37 = vunpack.c.l.bf16 %v3718_v52 }
 0x201   :  { %1244 = vmatpush.msrb.mxu0 %v910_v58  ;;  %v2631_v58 = vld [vmem:[%s4621_s5 + $0x158] sm:$0xf] }
 0x202   :  { %1193 = vmatpush.msrb.mxu1 %v1036_v35  ;;  %v3736_v35 = vld [vmem:[%s4621_s5 + $0x48] sm:$0xff]  ;;  %1275 = vmatpush.msrb.mxu2 %v934_v37  ;;  %v1021_v63 = vunpack.c.l.bf16 %v2631_v58  ;;  %v898_v37 = vunpack.c.l.bf16 %v3754_v34 }
 0x203   :  { %v904_v39 = vunpack.c.l.bf16 %v3736_v35  ;;  %1245 = vmatpush.msrb.mxu0 %v907_v38  ;;  %v1018_v38 = vunpack.c.l.bf16 %v2629_v44  ;;  %v3781_v58 = vld [vmem:[%s4621_s5 + $0xc] sm:$0xff] }
 0x204   :  { %1194 = vmatpush.msrb.mxu1 %v1033_v62  ;;  %v901_v62 = vunpack.c.l.bf16 %v3745_v48 }
 0x205   :  { %1246 = vmatpush.msrb.mxu0 %v904_v39  ;;  %v3772_v39 = vld [vmem:[%s4621_s5 + $0x18] sm:$0xff] }
 0x206   :  { %1195 = vmatpush.msrb.mxu1 %v1030_v33  ;;  %v3763_v33 = vld [vmem:[%s4621_s5 + $0x24] sm:$0xff] }
 0x207   :  { %1247 = vmatpush.msrb.mxu0 %v901_v62  ;;  %v895_v40 = vunpack.c.l.bf16 %v3763_v33  ;;  %v2625_v62 = vld [vmem:[%s4621_s5 + $0x134] sm:$0xf] }
 0x208   :  { %1196 = vmatpush.msrb.mxu1 %v1027_v42  ;;  %v2627_v42 = vld [vmem:[%s4621_s5 + $0x140] sm:$0xf]  ;;  %v1012_v44 = vunpack.c.l.bf16 %v2625_v62 }
 0x209   :  { %1248 = vmatpush.msrb.mxu0 %v898_v37  ;;  %v1015_v51 = vunpack.c.l.bf16 %v2627_v42  ;;  %v824_v42 = vld [vmem:[#allocation6] sm:$0x3] }
 0x20a   :  { %1197 = vmatpush.msrb.mxu1 %v1024_v46  ;;  %v892_v46 = vunpack.c.l.bf16 %v3772_v39  ;;  %v826_v62 = vperm.slane %v824_v42, 0  ;;  %v827_v5 = vperm.slane %v824_v42, 1  ;;  %v956_v42 = vunpack.c.h.bf16 %v3591_v50  ;;  %v863_v50 = vld [vmem:[%s4621_s5 + $0x98] sm:$0xf] }
 0x20b   :  { %1249 = vmatpush.msrb.mxu0 %v895_v40 }
 0x20c   :  { %1198 = vmatpush.msrb.mxu1 %v1021_v63 }
 0x20d   :  { %1250 = vmatpush.msrb.mxu0 %v892_v46 }
 0x20e   :  { %1199 = vmatpush.msrb.mxu1 %v1018_v38  ;;  %v889_v38 = vunpack.c.l.bf16 %v3781_v58 }
 0x210   :  { %1200 = vmatpush.msrb.mxu1 %v1015_v51  ;;  %1251 = vmatpush.msrb.mxu0 %v889_v38  ;;  %v886_v51 = vunpack.c.l.bf16 %v3790_v4 }
 0x212   :  { %1201 = vmatpush.msrb.mxu1 %v1012_v44  ;;  %1252 = vmatpush.msrb.mxu0 %v886_v51  ;;  %v929_v51 = vunpack.c.h.bf16 %v3601_v60  ;;  %v926_v60 = vunpack.c.h.bf16 %v3619_v59  ;;  %v879_v59 = vld [vmem:[%s4621_s5 + $0xf8] sm:$0xf] }
 0x214   :  { %1202 = vmatpush.msrb.mxu1 %v1009_v3  ;;  %v869_v3 = vld [vmem:[%s4621_s5 + $0xbc] sm:$0xf] }
 0x260   :  { %v795_v63 = vpop.f32.mrf.mxu2  ;;  %v818_v37 = vpop.f32.mrf.mxu3 }
 0x267   :  { %v745_v40 = vpop.f32.mrf.mxu0  ;;  %v768_v2 = vpop.f32.mrf.mxu1 }
 0x268   :  { %v796_v46 = vadd.f32 %v795_v63, %v745_v40  ;;  %v819_v6 = vadd.f32 %v818_v37, %v768_v2  ;;  %v865_v40 = vld [vmem:[%s4621_s5 + $0xa4] sm:$0xf] }
 0x26a   :  { %v830_v8 = vadd.f32 %v826_v62, %v796_v46  ;;  %v831_v7 = vadd.f32 %v827_v5, %v819_v6  ;;  %v798_v10 = vpop.f32.mrf.mxu2  ;;  %v821_v9 = vpop.f32.mrf.mxu3  ;;  %v885_v6 = vld [vmem:[%s4621_s5 + $0x11c] sm:$0xf] }
 0x26c   :  { %v3793_v16 = vmax.f32 %v830_v8, 0.0  ;;  %v3795_v44 = vmax.f32 %v831_v7, 0.0 }
 0x26e   :  { %v1086_v8 = vrot.slane %v3795_v44, 1 }
 0x26f   :  { %v748_v12 = vpop.f32.mrf.mxu0  ;;  %v771_v11 = vpop.f32.mrf.mxu1 }
 0x270   :  { %v799_v14 = vadd.f32 %v798_v10, %v748_v12  ;;  %v822_v13 = vadd.f32 %v821_v9, %v771_v11  ;;  %v867_v10 = vld [vmem:[%s4621_s5 + $0xb0] sm:$0xf]  ;;  %v932_v11 = vunpack.c.h.bf16 %v3583_v45  ;;  %v933_v12 = vunpack.c.l.bf16 %v869_v3 }
 0x271   :  { %v957_v45 = vunpack.c.l.bf16 %v885_v6  ;;  %v930_v46 = vunpack.c.l.bf16 %v867_v10  ;;  %v927_v3 = vunpack.c.l.bf16 %v865_v40  ;;  %v950_v6 = vunpack.c.h.bf16 %v3628_v54  ;;  %v859_v54 = vld [vmem:[%s4621_s5 + $0x80] sm:$0xf] }
 0x272   :  { %v832_v1 = vadd.f32 %v826_v62, %v799_v14  ;;  %v833_v38 = vadd.f32 %v827_v5, %v822_v13  ;;  %v1083_v5 = vrot.slane %v3793_v16, 1  ;;  %v883_v13 = vld [vmem:[%s4621_s5 + $0x110] sm:$0xf]  ;;  %v881_v62 = vld [vmem:[%s4621_s5 + $0x104] sm:$0xf]  ;;  %v924_v10 = vunpack.c.l.bf16 %v863_v50 }
 0x273   :  { %v947_v40 = vunpack.c.h.bf16 %v3646_v43  ;;  %v855_v43 = vld [vmem:[%s4621_s5 + $0x68] sm:$0xf] }
 0x274   :  { %v3797_v63 = vmax.f32 %v832_v1, 0.0  ;;  %v3799_v2 = vmax.f32 %v833_v38, 0.0  ;;  %v953_v1 = vunpack.c.h.bf16 %v3610_v36  ;;  %v954_v38 = vunpack.c.l.bf16 %v883_v13  ;;  %v861_v36 = vld [vmem:[%s4621_s5 + $0x8c] sm:$0xf]  ;;  %v857_v13 = vld [vmem:[%s4621_s5 + $0x74] sm:$0xf] }
 0x275   :  { %v915_v50 = vunpack.c.l.bf16 %v857_v13 }
 0x276   :  { %v3808_v9 = vrot.slane %v3797_v63, 1  ;;  %v3811_v7 = vrot.slane %v3799_v2, 1 }
 0x278   :  { %v3824_v14 = vsel %vm626_vm12, %v1083_v5, %v3808_v9  ;;  %v3828_v37 = vsel %vm626_vm12, %v1086_v8, %v3811_v7  ;;  %v951_v5 = vunpack.c.l.bf16 %v881_v62  ;;  %v923_v8 = vunpack.c.h.bf16 %v3637_v41 }
 0x279   :  { %1111 = vmatmul.f32.vlgmr.msra.gmra.mxu0 %v3824_v14  ;;  %2670 = vmatmul.msk.f32.vlgmr.msra.gmra.mxu1 %vm256_vm0, %v3828_v37  ;;  %v921_v41 = vunpack.c.l.bf16 %v861_v36 }
 0x27a   :  { %1157 = vmatmul.f32.vlgmr.msra.gmra.mxu2 %v3824_v14  ;;  %2672 = vmatmul.msk.f32.vlgmr.msra.gmra.mxu3 %vm256_vm0, %v3828_v37 }
 0x27b   :  { %1283 = vmatpush.msra.mxu3 %v932_v11  ;;  %1329 = vmatpush.msra.mxu2 %v933_v12  ;;  %v920_v11 = vunpack.c.h.bf16 %v3655_v49  ;;  %v877_v12 = vld [vmem:[%s4621_s5 + $0xec] sm:$0xf]  ;;  %v917_v49 = vunpack.c.h.bf16 %v3673_v53  ;;  %v914_v53 = vunpack.c.h.bf16 %v3691_v61  ;;  %v873_v61 = vld [vmem:[%s4621_s5 + $0xd4] sm:$0xf] }
 0x27c   :  { %1314 = vmatpush.msra.mxu1 %v956_v42  ;;  %1360 = vmatpush.msra.mxu0 %v957_v45  ;;  %v948_v42 = vunpack.c.l.bf16 %v879_v59  ;;  %v918_v45 = vunpack.c.l.bf16 %v859_v54  ;;  %v945_v62 = vunpack.c.l.bf16 %v877_v12  ;;  %v939_v36 = vunpack.c.l.bf16 %v873_v61  ;;  %v847_v54 = vld [vmem:[%s4621_s5 + $0x38] sm:$0xf]  ;;  %v845_v12 = vld [vmem:[%s4621_s5 + $0x2c] sm:$0xf] }
 0x27d   :  { %1284 = vmatpush.msra.mxu3 %v929_v51  ;;  %1330 = vmatpush.msra.mxu2 %v930_v46  ;;  %v875_v51 = vld [vmem:[%s4621_s5 + $0xe0] sm:$0xf]  ;;  %v944_v46 = vunpack.c.h.bf16 %v3664_v47  ;;  %v853_v47 = vld [vmem:[%s4621_s5 + $0x5c] sm:$0xf]  ;;  %v897_v13 = vunpack.c.l.bf16 %v845_v12 }
 0x27e   :  { %1315 = vmatpush.msra.mxu1 %v953_v1  ;;  %1361 = vmatpush.msra.mxu0 %v954_v38  ;;  %v941_v1 = vunpack.c.h.bf16 %v3682_v0  ;;  %v942_v38 = vunpack.c.l.bf16 %v875_v51  ;;  %v851_v0 = vld [vmem:[%s4621_s5 + $0x50] sm:$0xf]  ;;  %v2770_v51 = vld [vmem:[#allocation10 + $0x30] sm:$0xff]  }
 0x27f   :  { %1285 = vmatpush.msra.mxu3 %v926_v60  ;;  %1331 = vmatpush.msra.mxu2 %v927_v3  ;;  %v911_v60 = vunpack.c.h.bf16 %v3709_v55  ;;  %v912_v3 = vunpack.c.l.bf16 %v855_v43  ;;  %v909_v55 = vunpack.c.l.bf16 %v853_v47  ;;  %v906_v59 = vunpack.c.l.bf16 %v851_v0  ;;  %v2779_v0 = vld [vmem:[#allocation10 + $0x78] sm:$0xff]  }
 0x280   :  { %1316 = vmatpush.msra.mxu1 %v950_v6  ;;  %1362 = vmatpush.msra.mxu0 %v951_v5  ;;  %v908_v6 = vunpack.c.h.bf16 %v3727_v56  ;;  %v871_v5 = vld [vmem:[%s4621_s5 + $0xc8] sm:$0xf]  ;;  %v905_v56 = vunpack.c.h.bf16 %v3736_v35  ;;  %v899_v35 = vunpack.c.h.bf16 %v3754_v34  ;;  %v841_v34 = vld [vmem:[%s4621_s5 + $0x14] sm:$0xf] }
 0x281   :  { %1286 = vmatpush.msra.mxu3 %v923_v8  ;;  %1332 = vmatpush.msra.mxu2 %v924_v10  ;;  %v849_v8 = vld [vmem:[%s4621_s5 + $0x44] sm:$0xf]  ;;  %v938_v10 = vunpack.c.h.bf16 %v3700_v57  ;;  %v935_v57 = vunpack.c.h.bf16 %v3718_v52  ;;  %v843_v52 = vld [vmem:[%s4621_s5 + $0x20] sm:$0xf] }
 0x282   :  { %1114 = vmatmul.f32.gmra.mxu0 %v3808_v9  ;;  %2671 = vmatmul.msk.f32.gmra.mxu1 %vm256_vm0, %v3811_v7 }
 0x283   :  { %1160 = vmatmul.f32.gmra.mxu2 %v3808_v9  ;;  %2673 = vmatmul.msk.f32.gmra.mxu3 %vm256_vm0, %v3811_v7 }
 0x284   :  { %1287 = vmatpush.msra.mxu3 %v920_v11  ;;  %1333 = vmatpush.msra.mxu2 %v921_v41  ;;  %v936_v11 = vunpack.c.l.bf16 %v871_v5  ;;  %v900_v41 = vunpack.c.l.bf16 %v847_v54  ;;  %v2748_v5 = vunpack.c.h.bf16 %v2779_v0 }
 0x285   :  { %1317 = vmatpush.msra.mxu1 %v947_v40  ;;  %1363 = vmatpush.msra.mxu0 %v948_v42  ;;  %v893_v40 = vunpack.c.h.bf16 %v3772_v39  ;;  %v894_v42 = vunpack.c.l.bf16 %v843_v52 }
 0x286   :  { %1288 = vmatpush.msra.mxu3 %v917_v49  ;;  %1334 = vmatpush.msra.mxu2 %v918_v45  ;;  %v890_v49 = vunpack.c.h.bf16 %v3781_v58 }
 0x287   :  { %1318 = vmatpush.msra.mxu1 %v944_v46  ;;  %1364 = vmatpush.msra.mxu0 %v945_v62  ;;  %v2769_v46 = vld [vmem:[#allocation10 + $0x28] sm:$0xff]  }
 0x288   :  { %1289 = vmatpush.msra.mxu3 %v914_v53  ;;  %1335 = vmatpush.msra.mxu2 %v915_v50  ;;  %v2708_v53 = vunpack.c.h.bf16 %v2769_v46  ;;  %v2707_v50 = vunpack.c.l.bf16 %v2769_v46  ;;  %v2783_v46 = vld [vmem:[#allocation10 + $0x98] sm:$0xff]  }
 0x289   :  { %1319 = vmatpush.msra.mxu1 %v941_v1  ;;  %1365 = vmatpush.msra.mxu0 %v942_v38 }
 0x28a   :  { %1290 = vmatpush.msra.mxu3 %v911_v60  ;;  %1336 = vmatpush.msra.mxu2 %v912_v3  ;;  %v2767_v3 = vld [vmem:[#allocation10 + $0x18] sm:$0xff]  }
 0x28b   :  { %1203 = vmatmul.f32.vlgmr.msrb.gmra.mxu1 %v3824_v14  ;;  %2674 = vmatmul.msk.f32.vlgmr.msrb.gmra.mxu3 %vm256_vm0, %v3828_v37  ;;  %v902_v14 = vunpack.c.h.bf16 %v3745_v48  ;;  %v903_v37 = vunpack.c.l.bf16 %v849_v8  ;;  %v896_v48 = vunpack.c.h.bf16 %v3763_v33  ;;  %v839_v33 = vld [vmem:[%s4621_s5 + $0x8] sm:$0xf]  ;;  %v2700_v61 = vunpack.c.h.bf16 %v2767_v3  ;;  %v2766_v8 = vld [vmem:[#allocation10 + $0x10] sm:$0xff]  }
 0x28c   :  { %1253 = vmatmul.f32.vlgmr.msrb.gmra.mxu0 %v3793_v16  ;;  %2676 = vmatmul.msk.f32.vlgmr.msrb.gmra.mxu2 %vm256_vm0, %v3795_v44  ;;  %v888_v39 = vunpack.c.l.bf16 %v839_v33 }
 0x28d   :  { %1291 = vmatpush.msra.mxu3 %v908_v6  ;;  %1337 = vmatpush.msra.mxu2 %v909_v55  ;;  %v2699_v55 = vunpack.c.l.bf16 %v2767_v3  ;;  %v2763_v3 = vunpack.c.l.bf16 %v2783_v46 }
 0x28e   :  { %1320 = vmatpush.msra.mxu1 %v938_v10  ;;  %1366 = vmatpush.msra.mxu0 %v939_v36  ;;  %v2696_v10 = vunpack.c.h.bf16 %v2766_v8  ;;  %v2747_v36 = vunpack.c.l.bf16 %v2779_v0  ;;  %v2774_v0 = vld [vmem:[#allocation10 + $0x50] sm:$0xff]  }
 0x28f   :  { %1292 = vmatpush.msra.mxu3 %v905_v56  ;;  %1338 = vmatpush.msra.mxu2 %v906_v59  ;;  %v2778_v56 = vld [vmem:[#allocation10 + $0x70] sm:$0xff]  }
 0x290   :  { %1321 = vmatpush.msra.mxu1 %v935_v57  ;;  %1367 = vmatpush.msra.mxu0 %v936_v11  ;;  %v2695_v57 = vunpack.c.l.bf16 %v2766_v8  ;;  %v2744_v11 = vunpack.c.h.bf16 %v2778_v56 }
 0x291   :  { %1293 = vmatpush.msra.mxu3 %v902_v14  ;;  %1339 = vmatpush.msra.mxu2 %v903_v37  ;;  %v2765_v14 = vld [vmem:[#allocation10 + $0x8] sm:$0xff]  }
 0x292   :  { %v2692_v37 = vunpack.c.h.bf16 %v2765_v14  ;;  %v2691_v52 = vunpack.c.l.bf16 %v2765_v14  ;;  %v2727_v14 = vunpack.c.l.bf16 %v2774_v0 }
 0x293   :  { %1294 = vmatpush.msra.mxu3 %v899_v35  ;;  %1340 = vmatpush.msra.mxu2 %v900_v41  ;;  %v2743_v35 = vunpack.c.l.bf16 %v2778_v56  ;;  %v2777_v41 = vld [vmem:[#allocation10 + $0x68] sm:$0xff]  }
 0x294   :  { %1206 = vmatmul.f32.gmra.mxu1 %v3808_v9  ;;  %2675 = vmatmul.msk.f32.gmra.mxu3 %vm256_vm0, %v3811_v7  ;;  %v891_v9 = vunpack.c.l.bf16 %v841_v34  ;;  %v887_v7 = vunpack.c.h.bf16 %v3790_v4  ;;  %v2771_v4 = vld [vmem:[#allocation10 + $0x38] sm:$0xff]   ;;  %v2686_v34 = vld [vmem:[#allocation10] sm:$0xff]  }
 0x295   :  { %1256 = vmatmul.f32.gmra.mxu0 %v3797_v63  ;;  %2677 = vmatmul.msk.f32.gmra.mxu2 %vm256_vm0, %v3799_v2  ;;  %v2716_v58 = vunpack.c.h.bf16 %v2771_v4  ;;  %v2715_v45 = vunpack.c.l.bf16 %v2771_v4  ;;  %v2688_v33 = vunpack.c.h.bf16 %v2686_v34 }
 0x296   :  { %1295 = vmatpush.msra.mxu3 %v896_v48  ;;  %1341 = vmatpush.msra.mxu2 %v897_v13  ;;  %v2740_v48 = vunpack.c.h.bf16 %v2777_v41  ;;  %v3959_v13 = vld [vmem:[#allocation8] sm:$0x7] }
 0x297   :  { %1546 = vmatpush.msrb.mxu1 %v2716_v58  ;;  %v1377_v4 = vperm.slane %v3959_v13, 0  ;;  %v2687_v58 = vunpack.c.l.bf16 %v2686_v34 }
 0x298   :  { %1296 = vmatpush.msra.mxu3 %v893_v40  ;;  %1342 = vmatpush.msra.mxu2 %v894_v42 }
 0x299   :  { %1547 = vmatpush.msrb.mxu1 %v2715_v45 }
 0x29a   :  { %1297 = vmatpush.msra.mxu3 %v890_v49  ;;  %1343 = vmatpush.msra.mxu2 %v891_v9  ;;  %v2739_v49 = vunpack.c.l.bf16 %v2777_v41  ;;  %v2776_v9 = vld [vmem:[#allocation10 + $0x60] sm:$0xff]  }
 0x29b   :  { %v2736_v45 = vunpack.c.h.bf16 %v2776_v9 }
 0x29c   :  { %1298 = vmatpush.msra.mxu3 %v887_v7  ;;  %1344 = vmatpush.msra.mxu2 %v888_v39 }
 0x29d   :  { %1299 = vmatmul.f32.vlgmr.msra.gmra.mxu3 %v3793_v16  ;;  %2678 = vmatmul.msk.f32.vlgmr.msra.gmra.mxu1 %vm256_vm0, %v3795_v44 }
 0x29e   :  { %1345 = vmatmul.f32.vlgmr.msra.gmra.mxu2 %v3793_v16  ;;  %2680 = vmatmul.msk.f32.vlgmr.msra.gmra.mxu0 %vm256_vm0, %v3795_v44  ;;  %v2712_v16 = vunpack.c.h.bf16 %v2770_v51  ;;  %v2711_v44 = vunpack.c.l.bf16 %v2770_v51 }
 0x29f   :  { %1566 = vmatpush.msrb.mxu3 %v2748_v5 }
 0x2a0   :  { %1548 = vmatpush.msrb.mxu1 %v2712_v16 }
 0x2a1   :  { %1567 = vmatpush.msrb.mxu3 %v2747_v36 }
 0x2a2   :  { %1549 = vmatpush.msrb.mxu1 %v2711_v44  ;;  %v2775_v44 = vld [vmem:[#allocation10 + $0x58] sm:$0xff]  }
 0x2a3   :  { %1568 = vmatpush.msrb.mxu3 %v2744_v11 }
 0x2a4   :  { %1550 = vmatpush.msrb.mxu1 %v2708_v53  ;;  %v2732_v53 = vunpack.c.h.bf16 %v2775_v44 }
 0x2a5   :  { %1302 = vmatmul.f32.gmra.mxu3 %v3797_v63  ;;  %2679 = vmatmul.msk.f32.gmra.mxu1 %vm256_vm0, %v3799_v2 }
 0x2a6   :  { %1348 = vmatmul.f32.gmra.mxu2 %v3797_v63  ;;  %2681 = vmatmul.msk.f32.gmra.mxu0 %vm256_vm0, %v3799_v2  ;;  %v2768_v63 = vld [vmem:[#allocation10 + $0x20] sm:$0xff]  }
 0x2a7   :  { %1551 = vmatpush.msrb.mxu1 %v2707_v50  ;;  %v2704_v1 = vunpack.c.h.bf16 %v2768_v63  ;;  %v2703_v60 = vunpack.c.l.bf16 %v2768_v63  ;;  %1569 = vmatpush.msrb.mxu3 %v2743_v35  ;;  %v2764_v50 = vunpack.c.h.bf16 %v2783_v46 }
 0x2a9   :  { %1552 = vmatpush.msrb.mxu1 %v2704_v1  ;;  %1570 = vmatpush.msrb.mxu3 %v2740_v48 }
 0x2aa   :  { %1594 = vmatpush.msrb.mxu0 %v2764_v50 }
 0x2ab   :  { %1553 = vmatpush.msrb.mxu1 %v2703_v60  ;;  %1571 = vmatpush.msrb.mxu3 %v2739_v49  ;;  %v2731_v60 = vunpack.c.l.bf16 %v2775_v44 }
 0x2ac   :  { %1595 = vmatpush.msrb.mxu0 %v2763_v3 }
 0x2ad   :  { %1554 = vmatpush.msrb.mxu1 %v2700_v61  ;;  %1572 = vmatpush.msrb.mxu3 %v2736_v45 }
 0x2af   :  { %1555 = vmatpush.msrb.mxu1 %v2699_v55  ;;  %v2782_v55 = vld [vmem:[#allocation10 + $0x90] sm:$0xff]  }
 0x2b0   :  { %v2760_v36 = vunpack.c.h.bf16 %v2782_v55 }
 0x2b1   :  { %1556 = vmatpush.msrb.mxu1 %v2696_v10  ;;  %v2728_v10 = vunpack.c.h.bf16 %v2774_v0 }
 0x2b2   :  { %1596 = vmatpush.msrb.mxu0 %v2760_v36 }
 0x2b3   :  { %1557 = vmatpush.msrb.mxu1 %v2695_v57 }
 0x2b5   :  { %1558 = vmatpush.msrb.mxu1 %v2692_v37  ;;  %v2759_v37 = vunpack.c.l.bf16 %v2782_v55 }
 0x2b7   :  { %1559 = vmatpush.msrb.mxu1 %v2691_v52  ;;  %1597 = vmatpush.msrb.mxu0 %v2759_v37 }
 0x2b9   :  { %1560 = vmatpush.msrb.mxu1 %v2688_v33  ;;  %v2780_v33 = vld [vmem:[#allocation10 + $0x80] sm:$0xff]  }
 0x2bb   :  { %1561 = vmatpush.msrb.mxu1 %v2687_v58 }
 0x2f6   :  { %v1112_v43 = vpop.f32.mrf.mxu0  ;;  %v1135_v62 = vpop.f32.mrf.mxu1 }
 0x2f7   :  { %v1136_v40 = vadd.f32 %v1135_v62, %v1112_v43  ;;  %v2735_v43 = vunpack.c.l.bf16 %v2776_v9 }
 0x2f9   :  { %1573 = vmatpush.msrb.mxu3 %v2735_v43 }
 0x2fb   :  { %1574 = vmatpush.msrb.mxu3 %v2732_v53 }
 0x2fd   :  { %v3949_v2 = vpop.f32.mrf.mxu2  ;;  %v3951_v38 = vpop.f32.mrf.mxu3  ;;  %1575 = vmatpush.msrb.mxu3 %v2731_v60 }
 0x2fe   :  { %v1182_v43 = vadd.f32 %v3951_v38, %v3949_v2  ;;  %v1379_v38 = vperm.slane %v3959_v13, 2 }
 0x2ff   :  { %v3953_v47 = vpop.f32.mrf.mxu0  ;;  %v1138_v6 = vpop.f32.mrf.mxu1  ;;  %1576 = vmatpush.msrb.mxu3 %v2728_v10 }
 0x300   :  { %v1139_v61 = vadd.f32 %v1138_v6, %v3953_v47  ;;  %v2773_v47 = vld [vmem:[#allocation10 + $0x48] sm:$0xff]  }
 0x301   :  { %v2781_v6 = vld [vmem:[#allocation10 + $0x88] sm:$0xff]   ;;  %1577 = vmatpush.msrb.mxu3 %v2727_v14  ;;  %v2723_v48 = vunpack.c.l.bf16 %v2773_v47 }
 0x302   :  { %v2756_v52 = vunpack.c.h.bf16 %v2781_v6  ;;  %v2755_v34 = vunpack.c.l.bf16 %v2781_v6 }
 0x304   :  { %1598 = vmatpush.msrb.mxu0 %v2756_v52 }
 0x306   :  { %v3955_v59 = vpop.f32.mrf.mxu2  ;;  %v3957_v54 = vpop.f32.mrf.mxu3  ;;  %1599 = vmatpush.msrb.mxu0 %v2755_v34 }
 0x308   :  { %v3961_v42 = vpop.f32.mrf.mxu1 }
 0x309   :  { %v1254_v12 = vpop.f32.mrf.mxu0 }
 0x30a   :  { %v1255_v7 = vadd.f32 %v1254_v12, %v1136_v40  ;;  %v2724_v12 = vunpack.c.h.bf16 %v2773_v47  ;;  %v2772_v40 = vld [vmem:[#allocation10 + $0x40] sm:$0xff]  }
 0x30b   :  { %v2720_v9 = vunpack.c.h.bf16 %v2772_v40 }
 0x30c   :  { %1578 = vmatpush.msrb.mxu3 %v2724_v12 }
 0x30e   :  { %v3963_v39 = vpop.f32.mrf.mxu3  ;;  %1579 = vmatpush.msrb.mxu3 %v2723_v48 }
 0x30f   :  { %v1277_v51 = vpop.f32.mrf.mxu2 }
 0x310   :  { %v1278_v16 = vadd.f32 %v1277_v51, %v1255_v7  ;;  %v2752_v7 = vunpack.c.h.bf16 %v2780_v33  ;;  %v2719_v51 = vunpack.c.l.bf16 %v2772_v40  ;;  %1580 = vmatpush.msrb.mxu3 %v2720_v9 }
 0x311   :  { %v3968_v8 = vpop.f32.mrf.mxu1 }
 0x312   :  { %v1383_v62 = vadd.f32 %v1377_v4, %v1278_v16  ;;  %v1257_v1 = vpop.f32.mrf.mxu0  ;;  %v2751_v16 = vunpack.c.l.bf16 %v2780_v33  ;;  %1600 = vmatpush.msrb.mxu0 %v2752_v7  ;;  %1581 = vmatpush.msrb.mxu3 %v2719_v51 }
 0x313   :  { %v1258_v56 = vadd.f32 %v1257_v1, %v1139_v61  ;;  %v1378_v61 = vperm.slane %v3959_v13, 1 }
 0x314   :  { %v1389_v63 = vmax.f32 %v1383_v62, 0.0  ;;  %v1228_v62 = vadd.f32 %v3963_v39, %v3961_v42  ;;  %1601 = vmatpush.msrb.mxu0 %v2751_v16 }
 0x316   :  { %v1395_v5 = vsel %vm622_vm10, %v1389_v63, 0.0  ;;  %v1423_v44 = vrot.slane %v1389_v63, 7 }
 0x317   :  { %v1230_v57 = vpop.f32.mrf.mxu3  ;;  %v1396_v35 = vrot.slane %v1395_v5, 4 }
 0x318   :  { %v1280_v11 = vpop.f32.mrf.mxu2 }
 0x319   :  { %v1281_v41 = vadd.f32 %v1280_v11, %v1258_v56  ;;  %v1397_v58 = vadd.f32 %v1396_v35, %v1395_v5  ;;  %v1185_v11 = vadd.f32 %v3957_v54, %v3955_v59  ;;  %v1231_v35 = vadd.f32 %v1230_v57, %v3968_v8 }
 0x31a   :  { %v1323_v53 = vpop.f32.mrf.mxu1 }
 0x31b   :  { %v1386_v49 = vadd.f32 %v1377_v4, %v1281_v41  ;;  %v1398_v50 = vrot.slane %v1397_v58, 2  ;;  %v1369_v60 = vpop.f32.mrf.mxu0 }
 0x31d   :  { %v1392_v45 = vmax.f32 %v1386_v49, 0.0  ;;  %v1399_v5 = vadd.f32 %v1398_v50, %v1397_v58 }
 0x31f   :  { %v1424_v46 = vrot.slane %v1392_v45, 7  ;;  %v1400_v52 = vrot.slane %v1399_v5, 1 }
 0x320   :  { %v1300_v4 = vpop.f32.mrf.mxu3 }
 0x321   :  { %v1425_v1 = vsel %vm614_vm6, %v1423_v44, %v1424_v46  ;;  %v1301_v3 = vadd.f32 %v1300_v4, %v1182_v43  ;;  %v1346_v0 = vpop.f32.mrf.mxu2  ;;  %v1401_v8 = vadd.f32 %v1400_v52, %v1399_v5 }
 0x322   :  { %v1435_v55 = vsel %vm622_vm10, %v1425_v1, 0.0  ;;  %v1347_v2 = vadd.f32 %v1346_v0, %v1228_v62  ;;  %v1326_v40 = vpop.f32.mrf.mxu1 }
 0x323   :  { %v1436_v42 = vrot.slane %v1435_v55, 4  ;;  %v1324_v39 = vadd.f32 %v1323_v53, %v1301_v3  ;;  %v1372_v9 = vpop.f32.mrf.mxu0 }
 0x324   :  { %v1370_v63 = vadd.f32 %v1369_v60, %v1347_v2 }
 0x325   :  { %v1437_v10 = vadd.f32 %v1436_v42, %v1435_v55  ;;  %v1384_v36 = vadd.f32 %v1378_v61, %v1324_v39 }
 0x326   :  { %v1385_v56 = vadd.f32 %v1379_v38, %v1370_v63 }
 0x327   :  { %v1390_v14 = vmax.f32 %v1384_v36, 0.0  ;;  %v1438_v37 = vrot.slane %v1437_v10, 2 }
 0x328   :  { %v1391_v41 = vmax.f32 %v1385_v56, 0.0  ;;  %v1303_v47 = vpop.f32.mrf.mxu3 }
 0x329   :  { %v1402_v13 = vsel %vm622_vm10, %v1390_v14, 0.0  ;;  %v1304_v6 = vadd.f32 %v1303_v47, %v1185_v11  ;;  %v1349_v12 = vpop.f32.mrf.mxu2  ;;  %v1439_v48 = vadd.f32 %v1438_v37, %v1437_v10  ;;  %v1426_v53 = vrot.slane %v1390_v14, 7 }
 0x32a   :  { %v1410_v34 = vsel %vm1409_vm14, %v1391_v41, 0.0  ;;  %v1350_v33 = vadd.f32 %v1349_v12, %v1231_v35  ;;  %v1403_v49 = vrot.slane %v1402_v13, 4  ;;  %v1429_v50 = vrot.slane %v1391_v41, 7 }
 0x32b   :  { %v1327_v59 = vadd.f32 %v1326_v40, %v1304_v6  ;;  %v1440_v54 = vrot.slane %v1439_v48, 1  ;;  %v1411_v7 = vrot.slane %v1410_v34, 4  ;;  %v2796_v40 = vld [vmem:[#allocation11] ss:$0 sm:$0xff] }
 0x32c   :  { %v1373_v58 = vadd.f32 %v1372_v9, %v1350_v33  ;;  %v1404_v16 = vadd.f32 %v1403_v49, %v1402_v13 }
 0x32d   :  { %v1387_v45 = vadd.f32 %v1378_v61, %v1327_v59  ;;  %v1441_v57 = vadd.f32 %v1440_v54, %v1439_v48  ;;  %v1412_v46 = vadd.f32 %v1411_v7, %v1410_v34 }
 0x32e   :  { %v1388_v51 = vadd.f32 %v1379_v38, %v1373_v58  ;;  %v1405_v60 = vrot.slane %v1404_v16, 2  ;;  %v1702_v58 = vunpack.c.l.bf16 %v3190_v31 }
 0x32f   :  { %v1393_v43 = vmax.f32 %v1387_v45, 0.0  ;;  %v1456_v44 = vsel %vm614_vm6, %v1401_v8, %v1441_v57  ;;  %v1413_v0 = vrot.slane %v1412_v46, 2  ;;  %v1705_v45 = vunpack.c.h.bf16 %v3195_v32 }
 0x330   :  { %v1394_v62 = vmax.f32 %v1388_v51, 0.0  ;;  %1562 = vmatmul.f32.vlgmr.msrb.gmra.mxu1 %v1456_v44  ;;  %v1406_v39 = vadd.f32 %v1405_v60, %v1404_v16  ;;  %v1698_v8 = vunpack.c.l.bf16 %v3180_v29  ;;  %v1701_v57 = vunpack.c.h.bf16 %v3185_v30 }
 0x331   :  { %v1427_v4 = vrot.slane %v1393_v43, 7  ;;  %v1414_v5 = vadd.f32 %v1413_v0, %v1412_v46 }
 0x332   :  { %v1430_v1 = vrot.slane %v1394_v62, 7  ;;  %v1407_v11 = vrot.slane %v1406_v39, 1 }
 0x333   :  { %v1428_v3 = vsel %vm614_vm6, %v1426_v53, %v1427_v4  ;;  %v1415_v37 = vrot.slane %v1414_v5, 1 }
 0x334   :  { %v1442_v61 = vsel %vm622_vm10, %v1428_v3, 0.0  ;;  %v1431_v55 = vsel %vm614_vm6, %v1429_v50, %v1430_v1  ;;  %v1408_v13 = vadd.f32 %v1407_v11, %v1406_v39 }
 0x335   :  { %v1443_v2 = vrot.slane %v1442_v61, 4  ;;  %v1449_v38 = vsel %vm1409_vm14, %v1431_v55, 0.0  ;;  %v1416_v12 = vadd.f32 %v1415_v37, %v1414_v5 }
 0x336   :  { %v1450_v42 = vrot.slane %v1449_v38, 4 }
 0x337   :  { %v1444_v63 = vadd.f32 %v1443_v2, %v1442_v61 }
 0x338   :  { %v1451_v10 = vadd.f32 %v1450_v42, %v1449_v38 }
 0x339   :  { %v1445_v36 = vrot.slane %v1444_v63, 2 }
 0x33a   :  { %v1452_v56 = vrot.slane %v1451_v10, 2 }
 0x33b   :  { %v1446_v14 = vadd.f32 %v1445_v36, %v1444_v63 }
 0x33c   :  { %v1453_v35 = vadd.f32 %v1452_v56, %v1451_v10 }
 0x33d   :  { %v1447_v41 = vrot.slane %v1446_v14, 1 }
 0x33e   :  { %v1454_v47 = vrot.slane %v1453_v35, 1 }
 0x33f   :  { %v1448_v6 = vadd.f32 %v1447_v41, %v1446_v14 }
 0x340   :  { %v1455_v52 = vadd.f32 %v1454_v47, %v1453_v35 }
 0x341   :  { %v1457_v48 = vsel %vm614_vm6, %v1408_v13, %v1448_v6 }
 0x342   :  { %1582 = vmatmul.f32.vlgmr.msrb.gmra.mxu3 %v1457_v48  ;;  %v1458_v34 = vsel %vm614_vm6, %v1416_v12, %v1455_v52 }
 0x343   :  { %2682 = vmatmul.msk.f32.vlgmr.msrb.gmra.mxu0 %vm256_vm0, %v1458_v34 }
 0x3ad   :  { %v1563_v33 = vpop.f32.mrf.mxu1 }
 0x3ae   :  { %v1564_v49 = vadd.f32 %v2796_v40, %v1563_v33 }
 0x3c0   :  { %v1603_v54 = vpop.f32.mrf.mxu0 }
 0x3c5   :  { %v1583_v9 = vpop.f32.mrf.mxu3 }
 0x3c6   :  { %v1584_v59 = vadd.f32 %v1583_v9, %v1564_v49 }
 0x3c8   :  { %v3994_v7 = vadd.f32 %v1603_v54, %v1584_v59 }
 0x3c9   :  { %2924 = dma.done.wait [#allocation4], 4096 }
 0x3ca   :  { %2925 = vsyncadd [#allocation4], 4294963200  ;;  %v1703_v51 = vunpack.c.h.bf16 %v3190_v31  ;;  %1716 = vmatpush.msrb.mxu2 %v1702_v58  ;;  %1776 = vmatpush.msra.mxu3 %v1705_v45  ;;  %v1694_v16 = vunpack.c.l.bf16 %v3170_v27  ;;  %v1697_v43 = vunpack.c.h.bf16 %v3175_v28  ;;  %v1704_v44 = vunpack.c.l.bf16 %v3195_v32  ;;  %v4694_v42 = vld [vmem:[#allocation37_spill] sm:$0xff]  ;;  %v4695_v63 = vld [vmem:[#allocation35_spill] sm:$0xff] }
 0x3cb   :  { %v1699_v46 = vunpack.c.h.bf16 %v3180_v29  ;;  %v1700_v62 = vunpack.c.l.bf16 %v3185_v30  ;;  %v1695_v53 = vunpack.c.h.bf16 %v3170_v27  ;;  %v1690_v4 = vunpack.c.l.bf16 %v3160_v25  ;;  %v4696_v10 = vld [vmem:[#allocation36_spill] sm:$0xff]  ;;  %v4697_v56 = vld [vmem:[#allocation33_spill] sm:$0xff]  ;;  %v4698_v14 = vld [vmem:[#allocation34_spill] sm:$0xff] }
 0x3cc   :  { %1736 = vmatpush.msra.mxu0 %v1703_v51  ;;  %1717 = vmatpush.msrb.mxu2 %v1698_v8  ;;  %v1693_v31 = vunpack.c.h.bf16 %v3165_v26  ;;  %v1696_v50 = vunpack.c.l.bf16 %v3175_v28  ;;  %v1691_v1 = vunpack.c.h.bf16 %v3160_v25  ;;  %v1686_v29 = vunpack.c.l.bf16 %v3150_v23  ;;  %v4699_v35 = vld [vmem:[#allocation31_spill] sm:$0xff]  ;;  %v4700_v47 = vld [vmem:[#allocation32_spill] sm:$0xff]  ;;  %v4701_v52 = vld [vmem:[#allocation29_spill] sm:$0xff] }
 0x3cd   :  { %1777 = vmatpush.msra.mxu3 %v1701_v57  ;;  %1756 = vmatpush.msra.mxu1 %v1704_v44  ;;  %v1689_v30 = vunpack.c.h.bf16 %v3155_v24  ;;  %v1692_v27 = vunpack.c.l.bf16 %v3165_v26  ;;  %v1687_v32 = vunpack.c.h.bf16 %v3150_v23  ;;  %v1682_v60 = vunpack.c.l.bf16 %v3140_v21  ;;  %v4702_v34 = vld [vmem:[#allocation30_spill] sm:$0xff]  ;;  %v4703_v9 = vld [vmem:[#allocation27_spill] sm:$0xff]  ;;  %v4704_v54 = vld [vmem:[#allocation28_spill] sm:$0xff] }
 0x3ce   :  { %1737 = vmatpush.msra.mxu0 %v1699_v46  ;;  %1718 = vmatpush.msrb.mxu2 %v1694_v16  ;;  %v1685_v28 = vunpack.c.h.bf16 %v3145_v22  ;;  %v1688_v25 = vunpack.c.l.bf16 %v3155_v24  ;;  %v1683_v3 = vunpack.c.h.bf16 %v3140_v21  ;;  %v1678_v0 = vunpack.c.l.bf16 %v3130_v19  ;;  %v4705_v57 = vld [vmem:[#allocation25_spill] sm:$0xff]  ;;  %v4706_v16 = vld [vmem:[#allocation26_spill] sm:$0xff] }
 0x3cf   :  { %1778 = vmatpush.msra.mxu3 %v1697_v43  ;;  %1757 = vmatpush.msra.mxu1 %v1700_v62  ;;  %v1681_v26 = vunpack.c.h.bf16 %v3135_v20  ;;  %v1684_v23 = vunpack.c.l.bf16 %v3145_v22  ;;  %v1679_v61 = vunpack.c.h.bf16 %v3130_v19  ;;  %v1674_v55 = vunpack.c.l.bf16 %v3120_v17  ;;  %v4707_v62 = vld [vmem:[#allocation23_spill] sm:$0xff] }
 0x3d0   :  { %1738 = vmatpush.msra.mxu0 %v1695_v53  ;;  %1719 = vmatpush.msrb.mxu2 %v1690_v4  ;;  %v1677_v24 = vunpack.c.h.bf16 %v3125_v18  ;;  %v1680_v21 = vunpack.c.l.bf16 %v3135_v20  ;;  %v1675_v2 = vunpack.c.h.bf16 %v3120_v17  ;;  %v1670_v38 = vunpack.c.l.bf16 %v3110_v15  ;;  %v4708_v4 = vld [vmem:[#allocation24_spill] sm:$0xff] }
 0x3d1   :  { %1779 = vmatpush.msra.mxu3 %v1693_v31  ;;  %1758 = vmatpush.msra.mxu1 %v1696_v50  ;;  %v1673_v22 = vunpack.c.h.bf16 %v4694_v42  ;;  %v1676_v19 = vunpack.c.l.bf16 %v3125_v18  ;;  %v1671_v39 = vunpack.c.h.bf16 %v3110_v15  ;;  %v1666_v5 = vunpack.c.l.bf16 %v4695_v63 }
 0x3d2   :  { %1739 = vmatpush.msra.mxu0 %v1691_v1  ;;  %1720 = vmatpush.msrb.mxu2 %v1686_v29  ;;  %v1669_v20 = vunpack.c.h.bf16 %v4696_v10  ;;  %v1672_v17 = vunpack.c.l.bf16 %v4694_v42  ;;  %v1667_v36 = vunpack.c.h.bf16 %v4695_v63  ;;  %v1662_v11 = vunpack.c.l.bf16 %v4697_v56 }
 0x3d3   :  { %1780 = vmatpush.msra.mxu3 %v1689_v30  ;;  %1759 = vmatpush.msra.mxu1 %v1692_v27  ;;  %v1665_v18 = vunpack.c.h.bf16 %v4698_v14  ;;  %v1668_v15 = vunpack.c.l.bf16 %v4696_v10  ;;  %v1663_v37 = vunpack.c.h.bf16 %v4697_v56  ;;  %v1658_v41 = vunpack.c.l.bf16 %v4699_v35  ;;  %v1706_v30 = vld [vmem:[%s4625_s9] sm:$0xf] }
 0x3d4   :  { %1740 = vmatpush.msra.mxu0 %v1687_v32  ;;  %1721 = vmatpush.msrb.mxu2 %v1682_v60  ;;  %v1661_v13 = vunpack.c.h.bf16 %v4700_v47  ;;  %v1664_v6 = vunpack.c.l.bf16 %v4698_v14  ;;  %v1659_v12 = vunpack.c.h.bf16 %v4699_v35  ;;  %v1654_v48 = vunpack.c.l.bf16 %v4701_v52 }
 0x3d5   :  { %1781 = vmatpush.msra.mxu3 %v1685_v28  ;;  %1760 = vmatpush.msra.mxu1 %v1688_v25  ;;  %v1657_v40 = vunpack.c.h.bf16 %v4702_v34  ;;  %v1660_v33 = vunpack.c.l.bf16 %v4700_v47  ;;  %v1655_v49 = vunpack.c.h.bf16 %v4701_v52  ;;  %v1650_v59 = vunpack.c.l.bf16 %v4703_v9 }
 0x3d6   :  { %1741 = vmatpush.msra.mxu0 %v1683_v3  ;;  %1722 = vmatpush.msrb.mxu2 %v1678_v0  ;;  %v1653_v58 = vunpack.c.h.bf16 %v4704_v54  ;;  %v1656_v45 = vunpack.c.l.bf16 %v4702_v34  ;;  %v1651_v8 = vunpack.c.h.bf16 %v4703_v9  ;;  %v1646_v51 = vunpack.c.l.bf16 %v4705_v57 }
 0x3d7   :  { %1782 = vmatpush.msra.mxu3 %v1681_v26  ;;  %1761 = vmatpush.msra.mxu1 %v1684_v23  ;;  %v1649_v43 = vunpack.c.h.bf16 %v4706_v16  ;;  %v1652_v44 = vunpack.c.l.bf16 %v4704_v54  ;;  %v1647_v46 = vunpack.c.h.bf16 %v4705_v57  ;;  %v1642_v53 = vunpack.c.l.bf16 %v4707_v62 }
 0x3d8   :  { %1742 = vmatpush.msra.mxu0 %v1679_v61  ;;  %1723 = vmatpush.msrb.mxu2 %v1674_v55  ;;  %v1645_v31 = vunpack.c.h.bf16 %v4708_v4  ;;  %v1648_v50 = vunpack.c.l.bf16 %v4706_v16  ;;  %v1643_v1 = vunpack.c.h.bf16 %v4707_v62  ;;  %v1644_v29 = vunpack.c.l.bf16 %v4708_v4 }
 0x3d9   :  { %1783 = vmatpush.msra.mxu3 %v1677_v24  ;;  %1762 = vmatpush.msra.mxu1 %v1680_v21  ;;  %v1709_v27 = vperm.slane %v1706_v30, 1  ;;  %v1710_v32 = vperm.slane %v1706_v30, 2  ;;  %v1708_v28 = vperm.slane %v1706_v30, 0  ;;  %v1711_v3 = vperm.slane %v1706_v30, 3 }
 0x3da   :  { %1743 = vmatpush.msra.mxu0 %v1675_v2  ;;  %1724 = vmatpush.msrb.mxu2 %v1670_v38 }
 0x3db   :  { %1784 = vmatpush.msra.mxu3 %v1673_v22  ;;  %1763 = vmatpush.msra.mxu1 %v1676_v19 }
 0x3dc   :  { %1744 = vmatpush.msra.mxu0 %v1671_v39  ;;  %1725 = vmatpush.msrb.mxu2 %v1666_v5 }
 0x3dd   :  { %1785 = vmatpush.msra.mxu3 %v1669_v20  ;;  %1764 = vmatpush.msra.mxu1 %v1672_v17 }
 0x3de   :  { %1745 = vmatpush.msra.mxu0 %v1667_v36  ;;  %1726 = vmatpush.msrb.mxu2 %v1662_v11 }
 0x3df   :  { %1786 = vmatpush.msra.mxu3 %v1665_v18  ;;  %1765 = vmatpush.msra.mxu1 %v1668_v15 }
 0x3e0   :  { %1746 = vmatpush.msra.mxu0 %v1663_v37  ;;  %1727 = vmatpush.msrb.mxu2 %v1658_v41 }
 0x3e1   :  { %1787 = vmatpush.msra.mxu3 %v1661_v13  ;;  %1766 = vmatpush.msra.mxu1 %v1664_v6 }
 0x3e2   :  { %1747 = vmatpush.msra.mxu0 %v1659_v12  ;;  %1728 = vmatpush.msrb.mxu2 %v1654_v48 }
 0x3e3   :  { %1788 = vmatpush.msra.mxu3 %v1657_v40  ;;  %1767 = vmatpush.msra.mxu1 %v1660_v33 }
 0x3e4   :  { %1748 = vmatpush.msra.mxu0 %v1655_v49  ;;  %1729 = vmatpush.msrb.mxu2 %v1650_v59 }
 0x3e5   :  { %1789 = vmatpush.msra.mxu3 %v1653_v58  ;;  %1768 = vmatpush.msra.mxu1 %v1656_v45 }
 0x3e6   :  { %1749 = vmatpush.msra.mxu0 %v1651_v8  ;;  %1730 = vmatpush.msrb.mxu2 %v1646_v51 }
 0x3e7   :  { %1790 = vmatpush.msra.mxu3 %v1649_v43  ;;  %1769 = vmatpush.msra.mxu1 %v1652_v44 }
 0x3e8   :  { %1750 = vmatpush.msra.mxu0 %v1647_v46  ;;  %1731 = vmatpush.msrb.mxu2 %v1642_v53 }
 0x3e9   :  { %1791 = vmatpush.msra.mxu3 %v1645_v31  ;;  %1732 = vmatmul.f32.vlgmr.msrb.gmra.mxu2 %v3994_v7 }
 0x3ea   :  { %1792 = vmatmul.f32.vlgmr.msra.gmra.mxu3 %v3994_v7  ;;  %1770 = vmatpush.msra.mxu1 %v1648_v50 }
 0x3eb   :  { %1751 = vmatpush.msra.mxu0 %v1643_v1 }
 0x3ec   :  { %1752 = vmatmul.f32.vlgmr.msra.gmra.mxu0 %v3994_v7  ;;  %1771 = vmatpush.msra.mxu1 %v1644_v29 }
 0x3ed   :  { %1772 = vmatmul.f32.vlgmr.msra.gmra.mxu1 %v3994_v7 }
 0x469   :  { %v1753_v60 = vpop.f32.mrf.mxu0 }
 0x46a   :  { %v1754_v25 = vadd.f32 %v1753_v60, %v1709_v27  ;;  %v1773_v0 = vpop.f32.mrf.mxu1 }
 0x46b   :  { %v1774_v23 = vadd.f32 %v1773_v0, %v1710_v32 }
 0x46c   :  { %v4067_v26 = vmax.f32 %v1754_v25, 0.0  ;;  %v1733_v61 = vpop.f32.mrf.mxu2 }
 0x46d   :  { %v1793_v55 = vpop.f32.mrf.mxu3  ;;  %v1734_v24 = vadd.f32 %v1733_v61, %v1708_v28  ;;  %v4069_v21 = vmax.f32 %v1774_v23, 0.0 }
 0x46e   :  { %4709 = vst [vmem:[#allocation37_spill] sm:$0xff] %v4067_v26  ;;  %v1794_v7 = vadd.f32 %v1793_v55, %v1711_v3 }
 0x46f   :  { %4710 = vst [vmem:[#allocation35_spill] sm:$0xff] %v4069_v21  ;;  %v4071_v2 = vmax.f32 %v1734_v24, 0.0 }
 0x470   :  { %v4073_v38 = vmax.f32 %v1794_v7, 0.0 }
 0x472   :  { %4711 = vst [vmem:[#allocation36_spill] sm:$0xff] %v4073_v38 }
 0x473   :  { %2926 = dma.done.wait [#allocation4 + $0x1], 16384 }
 0x474   :  { %2927 = vsyncadd [#allocation4 + $0x1], 4294950912  ;;  %v4075_v42 = vld [vmem:[#allocation3 + $0xf0] sm:$0xff]  ;;  %v4077_v22 = vld [vmem:[#allocation3 + $0xe0] sm:$0xff]  ;;  %vm2550_vm15 = vcmask 1024  }
 0x475   :  { %v4079_v19 = vld [vmem:[#allocation3 + $0xd0] sm:$0xff]  ;;  %v1992_v39 = vunpack.c.l.bf16 %v4075_v42  ;;  %v1988_v63 = vunpack.c.l.bf16 %v4077_v22  ;;  %v4085_v10 = vld [vmem:[#allocation3 + $0xc0] sm:$0xff] }
 0x476   :  { %v4083_v5 = vld [vmem:[#allocation3 + $0x3f0] sm:$0xff]  ;;  %v4090_v36 = vld [vmem:[#allocation3 + $0x3e0] sm:$0xff]  ;;  %v1984_v56 = vunpack.c.l.bf16 %v4079_v19  ;;  %v1980_v52 = vunpack.c.l.bf16 %v4085_v10 }
 0x477   :  { %v2184_v20 = vunpack.c.l.bf16 %v4083_v5  ;;  %v4088_v17 = vld [vmem:[#allocation3 + $0x1f0] sm:$0xff]  ;;  %2198 = vmatpush.msra.mxu2 %v1992_v39  ;;  %v2180_v14 = vunpack.c.l.bf16 %v4090_v36  ;;  %v4095_v18 = vld [vmem:[#allocation3 + $0x1e0] sm:$0xff] }
 0x478   :  { %v2056_v11 = vunpack.c.l.bf16 %v4088_v17  ;;  %v4097_v15 = vld [vmem:[#allocation3 + $0x2f0] sm:$0xff]  ;;  %v2052_v41 = vunpack.c.l.bf16 %v4095_v18  ;;  %v4108_v12 = vld [vmem:[#allocation3 + $0x2e0] sm:$0xff] }
 0x479   :  { %v4099_v37 = vld [vmem:[#allocation3 + $0x3d0] sm:$0xff]  ;;  %2258 = vmatpush.msrb.mxu3 %v2184_v20  ;;  %v2120_v47 = vunpack.c.l.bf16 %v4097_v15  ;;  %2199 = vmatpush.msra.mxu2 %v1988_v63  ;;  %v2116_v34 = vunpack.c.l.bf16 %v4108_v12  ;;  %v4113_v40 = vld [vmem:[#allocation3 + $0x3c0] sm:$0xff] }
 0x47a   :  { %v4101_v35 = vld [vmem:[#allocation3 + $0xb0] sm:$0xff]  ;;  %v2176_v13 = vunpack.c.l.bf16 %v4099_v37  ;;  %2218 = vmatpush.msrb.mxu0 %v2056_v11  ;;  %v4115_v33 = vld [vmem:[#allocation3 + $0x1c0] sm:$0xff]  ;;  %v2172_v9 = vunpack.c.l.bf16 %v4113_v40 }
 0x47b   :  { %v4106_v6 = vld [vmem:[#allocation3 + $0x1d0] sm:$0xff]  ;;  %2259 = vmatpush.msrb.mxu3 %v2180_v14  ;;  %v4117_v49 = vld [vmem:[#allocation3 + $0xa0] sm:$0xff]  ;;  %2238 = vmatpush.msrb.mxu1 %v2120_v47  ;;  %v1976_v58 = vunpack.c.l.bf16 %v4101_v35  ;;  %v2044_v45 = vunpack.c.l.bf16 %v4115_v33 }
 0x47c   :  { %v2048_v48 = vunpack.c.l.bf16 %v4106_v6  ;;  %v4120_v59 = vld [vmem:[#allocation3 + $0x2d0] sm:$0xff]  ;;  %2200 = vmatpush.msra.mxu2 %v1984_v56  ;;  %2219 = vmatpush.msrb.mxu0 %v2052_v41  ;;  %v4129_v51 = vld [vmem:[#allocation3 + $0x2c0] sm:$0xff]  ;;  %v1972_v4 = vunpack.c.l.bf16 %v4117_v49 }
 0x47d   :  { %v4122_v54 = vld [vmem:[#allocation3 + $0x3b0] sm:$0xff]  ;;  %v2112_v8 = vunpack.c.l.bf16 %v4120_v59  ;;  %v4131_v16 = vld [vmem:[#allocation3 + $0x3a0] sm:$0xff]  ;;  %2260 = vmatpush.msrb.mxu3 %v2176_v13  ;;  %2239 = vmatpush.msrb.mxu1 %v2116_v34  ;;  %v2108_v46 = vunpack.c.l.bf16 %v4129_v51 }
 0x47e   :  { %v4127_v57 = vld [vmem:[#allocation3 + $0x1b0] sm:$0xff]  ;;  %v2168_v44 = vunpack.c.l.bf16 %v4122_v54  ;;  %v4137_v62 = vld [vmem:[#allocation3 + $0x1a0] sm:$0xff]  ;;  %2201 = vmatpush.msra.mxu2 %v1980_v52  ;;  %2220 = vmatpush.msrb.mxu0 %v2048_v48  ;;  %v2164_v29 = vunpack.c.l.bf16 %v4131_v16 }
 0x47f   :  { %v4133_v43 = vld [vmem:[#allocation3 + $0x90] sm:$0xff]  ;;  %v2040_v31 = vunpack.c.l.bf16 %v4127_v57  ;;  %2261 = vmatpush.msrb.mxu3 %v2172_v9  ;;  %v4145_v1 = vld [vmem:[#allocation3 + $0x80] sm:$0xff]  ;;  %2240 = vmatpush.msrb.mxu1 %v2112_v8  ;;  %v2036_v28 = vunpack.c.l.bf16 %v4137_v62 }
 0x480   :  { %v4139_v53 = vld [vmem:[#allocation3 + $0x2b0] sm:$0xff]  ;;  %v4151_v32 = vld [vmem:[#allocation3 + $0x2a0] sm:$0xff]  ;;  %2202 = vmatpush.msra.mxu2 %v1976_v58  ;;  %v1968_v60 = vunpack.c.l.bf16 %v4133_v43  ;;  %2221 = vmatpush.msrb.mxu0 %v2044_v45  ;;  %v1964_v24 = vunpack.c.l.bf16 %v4145_v1 }
 0x481   :  { %v4143_v50 = vld [vmem:[#allocation3 + $0x390] sm:$0xff]  ;;  %v2104_v30 = vunpack.c.l.bf16 %v4139_v53  ;;  %v4155_v25 = vld [vmem:[#allocation3 + $0x380] sm:$0xff]  ;;  %2262 = vmatpush.msrb.mxu3 %v2168_v44  ;;  %2241 = vmatpush.msrb.mxu1 %v2108_v46  ;;  %v2100_v61 = vunpack.c.l.bf16 %v4151_v32 }
 0x482   :  { %v4149_v27 = vld [vmem:[#allocation3 + $0x190] sm:$0xff]  ;;  %v2160_v23 = vunpack.c.l.bf16 %v4143_v50  ;;  %v4163_v55 = vld [vmem:[#allocation3 + $0x180] sm:$0xff]  ;;  %2203 = vmatpush.msra.mxu2 %v1972_v4  ;;  %2222 = vmatpush.msrb.mxu0 %v2040_v31  ;;  %v2156_v56 = vunpack.c.l.bf16 %v4155_v25 }
 0x483   :  { %v4157_v3 = vld [vmem:[#allocation3 + $0x290] sm:$0xff]  ;;  %v2032_v7 = vunpack.c.l.bf16 %v4149_v27  ;;  %v4169_v63 = vld [vmem:[#allocation3 + $0x280] sm:$0xff]  ;;  %2263 = vmatpush.msrb.mxu3 %v2164_v29  ;;  %2242 = vmatpush.msrb.mxu1 %v2104_v30  ;;  %v2028_v47 = vunpack.c.l.bf16 %v4163_v55 }
 0x484   :  { %v4159_v0 = vld [vmem:[#allocation3 + $0x70] sm:$0xff]  ;;  %v4171_v20 = vld [vmem:[#allocation3 + $0x60] sm:$0xff]  ;;  %v2096_v11 = vunpack.c.l.bf16 %v4157_v3  ;;  %2204 = vmatpush.msra.mxu2 %v1968_v60  ;;  %2223 = vmatpush.msrb.mxu0 %v2036_v28  ;;  %v2092_v9 = vunpack.c.l.bf16 %v4169_v63 }
 0x485   :  { %v4167_v39 = vld [vmem:[#allocation3 + $0x370] sm:$0xff]  ;;  %v1960_v41 = vunpack.c.l.bf16 %v4159_v0  ;;  %v4179_v13 = vld [vmem:[#allocation3 + $0x360] sm:$0xff]  ;;  %2264 = vmatpush.msrb.mxu3 %v2160_v23  ;;  %2243 = vmatpush.msrb.mxu1 %v2100_v61  ;;  %v1956_v45 = vunpack.c.l.bf16 %v4171_v20 }
 0x486   :  { %v4175_v14 = vld [vmem:[#allocation3 + $0x170] sm:$0xff]  ;;  %v2152_v34 = vunpack.c.l.bf16 %v4167_v39  ;;  %v4187_v58 = vld [vmem:[#allocation3 + $0x160] sm:$0xff]  ;;  %2205 = vmatpush.msra.mxu2 %v1964_v24  ;;  %2224 = vmatpush.msrb.mxu0 %v2032_v7  ;;  %v2148_v31 = vunpack.c.l.bf16 %v4179_v13 }
 0x487   :  { %v4181_v52 = vld [vmem:[#allocation3 + $0x270] sm:$0xff]  ;;  %v2024_v8 = vunpack.c.l.bf16 %v4175_v14  ;;  %v4193_v46 = vld [vmem:[#allocation3 + $0x260] sm:$0xff]  ;;  %2265 = vmatpush.msrb.mxu3 %v2156_v56  ;;  %2244 = vmatpush.msrb.mxu1 %v2096_v11  ;;  %v2020_v28 = vunpack.c.l.bf16 %v4187_v58 }
 0x488   :  { %v4183_v48 = vld [vmem:[#allocation3 + $0x50] sm:$0xff]  ;;  %4713 = vst [vmem:[#allocation34_spill] sm:$0xff] %v4193_v46  ;;  %v4195_v4 = vld [vmem:[#allocation3 + $0x40] sm:$0xff]  ;;  %v2088_v29 = vunpack.c.l.bf16 %v4181_v52  ;;  %2206 = vmatpush.msra.mxu2 %v1960_v41  ;;  %2225 = vmatpush.msrb.mxu0 %v2028_v47  ;;  %v2084_v56 = vunpack.c.l.bf16 %v4193_v46 }
 0x489   :  { %v4191_v44 = vld [vmem:[#allocation3 + $0x350] sm:$0xff]  ;;  %v1952_v60 = vunpack.c.l.bf16 %v4183_v48  ;;  %v4203_v23 = vld [vmem:[#allocation3 + $0x340] sm:$0xff]  ;;  %2266 = vmatpush.msrb.mxu3 %v2152_v34  ;;  %2245 = vmatpush.msrb.mxu1 %v2092_v9  ;;  %v1948_v41 = vunpack.c.l.bf16 %v4195_v4 }
 0x48a   :  { %4712 = vst [vmem:[#allocation33_spill] sm:$0xff] %v4191_v44  ;;  %v4199_v30 = vld [vmem:[#allocation3 + $0x150] sm:$0xff]  ;;  %v2144_v7 = vunpack.c.l.bf16 %v4191_v44  ;;  %v4211_v11 = vld [vmem:[#allocation3 + $0x140] sm:$0xff]  ;;  %2207 = vmatpush.msra.mxu2 %v1956_v45  ;;  %2226 = vmatpush.msrb.mxu0 %v2024_v8  ;;  %v2140_v9 = vunpack.c.l.bf16 %v4203_v23 }
 0x48b   :  { %4714 = vst [vmem:[#allocation31_spill] sm:$0xff] %v4199_v30  ;;  %v4205_v61 = vld [vmem:[#allocation3 + $0x250] sm:$0xff]  ;;  %v2016_v47 = vunpack.c.l.bf16 %v4199_v30  ;;  %v4217_v26 = vld [vmem:[#allocation3 + $0x240] sm:$0xff]  ;;  %2267 = vmatpush.msrb.mxu3 %v2148_v31  ;;  %2246 = vmatpush.msrb.mxu1 %v2088_v29  ;;  %v2012_v8 = vunpack.c.l.bf16 %v4211_v11 }
 0x48c   :  { %4715 = vst [vmem:[#allocation32_spill] sm:$0xff] %v4203_v23  ;;  %v4207_v24 = vld [vmem:[#allocation3 + $0x30] sm:$0xff]  ;;  %v4219_v34 = vld [vmem:[#allocation3 + $0x20] sm:$0xff]  ;;  %v2080_v38 = vunpack.c.l.bf16 %v4205_v61  ;;  %2208 = vmatpush.msra.mxu2 %v1952_v60  ;;  %2227 = vmatpush.msrb.mxu0 %v2020_v28 }
 0x48d   :  { %4716 = vst [vmem:[#allocation29_spill] sm:$0xff] %v4205_v61  ;;  %v4215_v21 = vld [vmem:[#allocation3 + $0x330] sm:$0xff]  ;;  %v1944_v45 = vunpack.c.l.bf16 %v4207_v24  ;;  %v4227_v30 = vld [vmem:[#allocation3 + $0x320] sm:$0xff]  ;;  %2268 = vmatpush.msrb.mxu3 %v2144_v7  ;;  %2247 = vmatpush.msrb.mxu1 %v2084_v56  ;;  %v2076_v61 = vunpack.c.l.bf16 %v4217_v26  ;;  %v1940_v60 = vunpack.c.l.bf16 %v4219_v34 }
 0x48e   :  { %4717 = vst [vmem:[#allocation30_spill] sm:$0xff] %v4207_v24  ;;  %v4223_v46 = vld [vmem:[#allocation3 + $0x130] sm:$0xff]  ;;  %v2136_v29 = vunpack.c.l.bf16 %v4215_v21  ;;  %v4235_v23 = vld [vmem:[#allocation3 + $0x120] sm:$0xff]  ;;  %2209 = vmatpush.msra.mxu2 %v1948_v41  ;;  %2228 = vmatpush.msrb.mxu0 %v2016_v47  ;;  %v2132_v56 = vunpack.c.l.bf16 %v4227_v30 }
 0x48f   :  { %4718 = vst [vmem:[#allocation27_spill] sm:$0xff] %v4211_v11  ;;  %v4229_v44 = vld [vmem:[#allocation3 + $0x230] sm:$0xff]  ;;  %v2008_v28 = vunpack.c.l.bf16 %v4223_v46  ;;  %v4241_v24 = vld [vmem:[#allocation3 + $0x220] sm:$0xff]  ;;  %2269 = vmatpush.msrb.mxu3 %v2140_v9  ;;  %2248 = vmatpush.msrb.mxu1 %v2080_v38  ;;  %v2004_v47 = vunpack.c.l.bf16 %v4235_v23 }
 0x490   :  { %4719 = vst [vmem:[#allocation28_spill] sm:$0xff] %v4215_v21  ;;  %v4231_v31 = vld [vmem:[#allocation3 + $0x10] sm:$0xff]  ;;  %v4243_v7 = vld [vmem:[#allocation3] sm:$0xff]  ;;  %2210 = vmatpush.msra.mxu2 %v1944_v45  ;;  %2229 = vmatpush.msrb.mxu0 %v2012_v8  ;;  %v2068_v38 = vunpack.c.l.bf16 %v4241_v24  ;;  %v1993_v8 = vunpack.c.h.bf16 %v4075_v42  ;;  %v2181_v42 = vunpack.c.h.bf16 %v4090_v36  ;;  %v2049_v36 = vunpack.c.h.bf16 %v4106_v6 }
 0x491   :  { %4720 = vst [vmem:[#allocation25_spill] sm:$0xff] %v4217_v26  ;;  %v4239_v11 = vld [vmem:[#allocation3 + $0x310] sm:$0xff]  ;;  %v2072_v26 = vunpack.c.l.bf16 %v4229_v44  ;;  %v1936_v41 = vunpack.c.l.bf16 %v4231_v31  ;;  %2270 = vmatpush.msrb.mxu3 %v2136_v29  ;;  %2249 = vmatpush.msrb.mxu1 %v2076_v61  ;;  %v2185_v29 = vunpack.c.h.bf16 %v4083_v5  ;;  %v2041_v6 = vunpack.c.h.bf16 %v4127_v57 }
 0x492   :  { %4721 = vst [vmem:[#allocation26_spill] sm:$0xff] %v4219_v34  ;;  %v4247_v21 = vld [vmem:[#allocation3 + $0x110] sm:$0xff]  ;;  %v2128_v9 = vunpack.c.l.bf16 %v4239_v11  ;;  %v4255_v34 = vld [vmem:[#allocation3 + $0x100] sm:$0xff]  ;;  %2211 = vmatpush.msra.mxu2 %v1940_v60  ;;  %2230 = vmatpush.msrb.mxu0 %v2008_v28  ;;  %v1989_v28 = vunpack.c.h.bf16 %v4077_v22  ;;  %v2053_v22 = vunpack.c.h.bf16 %v4095_v18  ;;  %v2173_v18 = vunpack.c.h.bf16 %v4113_v40 }
 0x493   :  { %4722 = vst [vmem:[#allocation23_spill] sm:$0xff] %v4223_v46  ;;  %v4251_v46 = vld [vmem:[#allocation3 + $0x300] sm:$0xff]  ;;  %v2000_v45 = vunpack.c.l.bf16 %v4247_v21  ;;  %2271 = vmatpush.msrb.mxu3 %v2132_v56  ;;  %2250 = vmatpush.msrb.mxu1 %v2072_v26  ;;  %v2057_v26 = vunpack.c.h.bf16 %v4088_v17  ;;  %v1985_v56 = vunpack.c.h.bf16 %v4079_v19  ;;  %v2177_v17 = vunpack.c.h.bf16 %v4099_v37 }
 0x494   :  { %4723 = vst [vmem:[#allocation24_spill] sm:$0xff] %v4227_v30  ;;  %v4259_v30 = vld [vmem:[#allocation3 + $0x210] sm:$0xff]  ;;  %v2124_v61 = vunpack.c.l.bf16 %v4251_v46  ;;  %2212 = vmatpush.msra.mxu2 %v1936_v41  ;;  %2231 = vmatpush.msrb.mxu0 %v2004_v47  ;;  %v4265_v60 = vld [vmem:[#allocation3 + $0x200] sm:$0xff]  ;;  %v2121_v41 = vunpack.c.h.bf16 %v4097_v15  ;;  %v2117_v19 = vunpack.c.h.bf16 %v4108_v12  ;;  %v1977_v47 = vunpack.c.h.bf16 %v4101_v35 }
 0x495   :  { %4724 = vst [vmem:[#allocation38_spill] sm:$0xff] %v4229_v44  ;;  %v1932_v44 = vunpack.c.l.bf16 %v4243_v7  ;;  %2272 = vmatpush.msrb.mxu3 %v2128_v9  ;;  %2251 = vmatpush.msrb.mxu1 %v2068_v38  ;;  %v2060_v5 = vunpack.c.l.bf16 %v4265_v60  ;;  %v2045_v15 = vunpack.c.h.bf16 %v4115_v33  ;;  %v2169_v37 = vunpack.c.h.bf16 %v4122_v54 }
 0x496   :  { %4725 = vst [vmem:[#allocation39_spill] sm:$0xff] %v4241_v24  ;;  %v1996_v24 = vunpack.c.l.bf16 %v4255_v34  ;;  %2232 = vmatpush.msrb.mxu0 %v2000_v45  ;;  %v2109_v35 = vunpack.c.h.bf16 %v4129_v51  ;;  %v1969_v12 = vunpack.c.h.bf16 %v4133_v43  ;;  %v2165_v40 = vunpack.c.h.bf16 %v4131_v16  ;;  %v4732_v45 = vld [vmem:[#allocation27_spill] sm:$0xff] }
 0x497   :  { %4726 = vst [vmem:[#allocation40_spill] sm:$0xff] %v4247_v21  ;;  %v2064_v21 = vunpack.c.l.bf16 %v4259_v30  ;;  %2213 = vmatpush.msra.mxu2 %v1932_v44  ;;  %2273 = vmatpush.msrb.mxu3 %v2124_v61  ;;  %v1981_v44 = vunpack.c.h.bf16 %v4085_v10  ;;  %v1973_v10 = vunpack.c.h.bf16 %v4117_v49  ;;  %v2037_v33 = vunpack.c.h.bf16 %v4137_v62 }
 0x498   :  { %2233 = vmatpush.msrb.mxu0 %v1996_v24  ;;  %v2105_v49 = vunpack.c.h.bf16 %v4139_v53  ;;  %v2161_v54 = vunpack.c.h.bf16 %v4143_v50  ;;  %v2033_v57 = vunpack.c.h.bf16 %v4149_v27  ;;  %v2101_v51 = vunpack.c.h.bf16 %v4151_v32  ;;  %2214 = vmatmul.f32.vlgmr.msra.gmra.mxu2 %v4071_v2 }
 0x499   :  { %2278 = vmatpush.msrb.mxu2 %v1993_v8  ;;  %2338 = vmatpush.msra.mxu3 %v2185_v29  ;;  %v1961_v16 = vunpack.c.h.bf16 %v4159_v0  ;;  %v2157_v43 = vunpack.c.h.bf16 %v4155_v25  ;;  %v2029_v62 = vunpack.c.h.bf16 %v4163_v55  ;;  %v2097_v53 = vunpack.c.h.bf16 %v4157_v3  ;;  %v4734_v29 = vld [vmem:[#allocation29_spill] sm:$0xff] }
 0x49a   :  { %2252 = vmatpush.msrb.mxu1 %v2064_v21  ;;  %2298 = vmatpush.msra.mxu0 %v2057_v26  ;;  %v2113_v21 = vunpack.c.h.bf16 %v4120_v59  ;;  %v1965_v59 = vunpack.c.h.bf16 %v4145_v1  ;;  %v1957_v50 = vunpack.c.h.bf16 %v4171_v20  ;;  %v2153_v1 = vunpack.c.h.bf16 %v4167_v39  ;;  %v4727_v20 = vld [vmem:[#allocation33_spill] sm:$0xff]  ;;  %v4735_v26 = vld [vmem:[#allocation28_spill] sm:$0xff] }
 0x49b   :  { %2279 = vmatpush.msrb.mxu2 %v1989_v28  ;;  %2339 = vmatpush.msra.mxu3 %v2181_v42  ;;  %v2025_v27 = vunpack.c.h.bf16 %v4175_v14  ;;  %v1953_v32 = vunpack.c.h.bf16 %v4183_v48  ;;  %v2093_v25 = vunpack.c.h.bf16 %v4169_v63  ;;  %v2149_v3 = vunpack.c.h.bf16 %v4179_v13  ;;  %v4728_v48 = vld [vmem:[#allocation31_spill] sm:$0xff]  ;;  %v4729_v63 = vld [vmem:[#allocation30_spill] sm:$0xff] }
 0x49c   :  { %2253 = vmatpush.msrb.mxu1 %v2060_v5  ;;  %2299 = vmatpush.msra.mxu0 %v2053_v22  ;;  %v2021_v0 = vunpack.c.h.bf16 %v4187_v58  ;;  %v1949_v55 = vunpack.c.h.bf16 %v4195_v4  ;;  %v2089_v39 = vunpack.c.h.bf16 %v4181_v52  ;;  %v2145_v14 = vunpack.c.h.bf16 %v4727_v20  ;;  %v4730_v13 = vld [vmem:[#allocation34_spill] sm:$0xff]  ;;  %v4731_v58 = vld [vmem:[#allocation32_spill] sm:$0xff]  ;;  %v4736_v22 = vld [vmem:[#allocation23_spill] sm:$0xff] }
 0x49d   :  { %2280 = vmatpush.msrb.mxu2 %v1985_v56  ;;  %2340 = vmatpush.msra.mxu3 %v2177_v17  ;;  %v2017_v24 = vunpack.c.h.bf16 %v4728_v48  ;;  %v1945_v9 = vunpack.c.h.bf16 %v4729_v63  ;;  %v2085_v38 = vunpack.c.h.bf16 %v4730_v13  ;;  %v2141_v4 = vunpack.c.h.bf16 %v4731_v58  ;;  %v4733_v52 = vld [vmem:[#allocation26_spill] sm:$0xff]  ;;  %v4319_v5 = vld [vmem:[#allocation3 + $0xf8] sm:$0xff] }
 0x49e   :  { %2318 = vmatpush.msra.mxu1 %v2121_v41  ;;  %2300 = vmatpush.msra.mxu0 %v2049_v36  ;;  %v2013_v8 = vunpack.c.h.bf16 %v4732_v45  ;;  %v1941_v61 = vunpack.c.h.bf16 %v4733_v52  ;;  %v2081_v28 = vunpack.c.h.bf16 %v4734_v29  ;;  %v2137_v42 = vunpack.c.h.bf16 %v4735_v26  ;;  %v4738_v36 = vld [vmem:[#allocation36_spill] sm:$0xff]  ;;  %v4377_v63 = vld [vmem:[#allocation3 + $0x2e8] sm:$0xff] }
 0x49f   :  { %2281 = vmatpush.msrb.mxu2 %v1981_v44  ;;  %2341 = vmatpush.msra.mxu3 %v2173_v18  ;;  %v1937_v56 = vunpack.c.h.bf16 %v4231_v31  ;;  %v2009_v41 = vunpack.c.h.bf16 %v4736_v22  ;;  %v4737_v44 = vld [vmem:[#allocation25_spill] sm:$0xff]  ;;  %v4382_v13 = vld [vmem:[#allocation3 + $0x88] sm:$0xff] }
 0x4a0   :  { %2319 = vmatpush.msra.mxu1 %v2117_v19  ;;  %2301 = vmatpush.msra.mxu0 %v2045_v15  ;;  %v2077_v17 = vunpack.c.h.bf16 %v4737_v44  ;;  %v1933_v19 = vunpack.c.h.bf16 %v4243_v7  ;;  %v4326_v15 = vld [vmem:[#allocation3 + $0xe8] sm:$0xff]  ;;  %v4740_v31 = vld [vmem:[#allocation37_spill] sm:$0xff]  ;;  %v1966_v26 = vunpack.c.l.bf16 %v4382_v13 }
 0x4a1   :  { %2282 = vmatpush.msrb.mxu2 %v1977_v47  ;;  %2342 = vmatpush.msra.mxu3 %v2169_v37  ;;  %v4739_v47 = vld [vmem:[#allocation24_spill] sm:$0xff]  ;;  %v4741_v37 = vld [vmem:[#allocation38_spill] sm:$0xff] }
 0x4a2   :  { %2320 = vmatpush.msra.mxu1 %v2113_v21  ;;  %2302 = vmatpush.msra.mxu0 %v2041_v6  ;;  %v2133_v18 = vunpack.c.h.bf16 %v4739_v47  ;;  %v1994_v21 = vunpack.c.l.bf16 %v4319_v5  ;;  %v2073_v6 = vunpack.c.h.bf16 %v4741_v37  ;;  %v4333_v7 = vld [vmem:[#allocation3 + $0xd8] sm:$0xff]  ;;  %v4388_v45 = vld [vmem:[#allocation3 + $0x1c8] sm:$0xff] }
 0x4a3   :  { %2283 = vmatpush.msrb.mxu2 %v1973_v10  ;;  %2343 = vmatpush.msra.mxu3 %v2165_v40  ;;  %v2005_v10 = vunpack.c.h.bf16 %v4235_v23  ;;  %v4742_v40 = vld [vmem:[#allocation40_spill] sm:$0xff]  ;;  %v4744_v23 = vld [vmem:[#allocation39_spill] sm:$0xff] }
 0x4a4   :  { %2321 = vmatpush.msra.mxu1 %v2109_v35  ;;  %2303 = vmatpush.msra.mxu0 %v2037_v33  ;;  %v2129_v35 = vunpack.c.h.bf16 %v4239_v11  ;;  %v2001_v33 = vunpack.c.h.bf16 %v4742_v40  ;;  %v1986_v11 = vunpack.c.l.bf16 %v4333_v7  ;;  %v4370_v20 = vld [vmem:[#allocation3 + $0x98] sm:$0xff]  ;;  %v4403_v22 = vld [vmem:[#allocation3 + $0x2c8] sm:$0xff] }
 0x4a5   :  { %2284 = vmatpush.msrb.mxu2 %v1969_v12  ;;  %2344 = vmatpush.msra.mxu3 %v2161_v54  ;;  %v1990_v12 = vunpack.c.l.bf16 %v4326_v15  ;;  %v2069_v54 = vunpack.c.h.bf16 %v4744_v23  ;;  %v1970_v58 = vunpack.c.l.bf16 %v4370_v20  ;;  %v4394_v29 = vld [vmem:[#allocation3 + $0x78] sm:$0xff] }
 0x4a6   :  { %2322 = vmatpush.msra.mxu1 %v2105_v49  ;;  %2304 = vmatpush.msra.mxu0 %v2033_v57  ;;  %v4337_v49 = vld [vmem:[#allocation3 + $0x3f8] sm:$0xff]  ;;  %v2125_v57 = vunpack.c.h.bf16 %v4251_v46  ;;  %v1962_v47 = vunpack.c.l.bf16 %v4394_v29 }
 0x4a7   :  { %2285 = vmatpush.msrb.mxu2 %v1965_v59  ;;  %2345 = vmatpush.msra.mxu3 %v2157_v43  ;;  %v4743_v59 = vld [vmem:[#allocation35_spill] sm:$0xff]  ;;  %v2186_v43 = vunpack.c.l.bf16 %v4337_v49  ;;  %v4425_v23 = vld [vmem:[#allocation3 + $0x198] sm:$0xff] }
 0x4a8   :  { %2323 = vmatpush.msra.mxu1 %v2101_v51  ;;  %2305 = vmatpush.msra.mxu0 %v2029_v62  ;;  %v4343_v51 = vld [vmem:[#allocation3 + $0xc8] sm:$0xff]  ;;  %v1997_v62 = vunpack.c.h.bf16 %v4255_v34 }
 0x4a9   :  { %2286 = vmatpush.msrb.mxu2 %v1961_v16  ;;  %2346 = vmatpush.msra.mxu3 %v2153_v1  ;;  %v4346_v16 = vld [vmem:[#allocation3 + $0x3e8] sm:$0xff]  ;;  %v1982_v46 = vunpack.c.l.bf16 %v4343_v51  ;;  %v2065_v1 = vunpack.c.h.bf16 %v4259_v30  ;;  %v2061_v30 = vunpack.c.h.bf16 %v4265_v60 }
 0x4aa   :  { %2324 = vmatpush.msra.mxu1 %v2097_v53  ;;  %2306 = vmatpush.msra.mxu0 %v2025_v27  ;;  %v4350_v53 = vld [vmem:[#allocation3 + $0xb8] sm:$0xff] }
 0x4ab   :  { %2287 = vmatpush.msrb.mxu2 %v1957_v50  ;;  %2347 = vmatpush.msra.mxu3 %v2149_v3  ;;  %v4352_v50 = vld [vmem:[#allocation3 + $0x1f8] sm:$0xff]  ;;  %v1978_v34 = vunpack.c.l.bf16 %v4350_v53 }
 0x4ac   :  { %2325 = vmatpush.msra.mxu1 %v2093_v25  ;;  %2307 = vmatpush.msra.mxu0 %v2021_v0  ;;  %v4356_v27 = vld [vmem:[#allocation3 + $0x3d8] sm:$0xff]  ;;  %v4359_v25 = vld [vmem:[#allocation3 + $0xa8] sm:$0xff]  ;;  %v2058_v3 = vunpack.c.l.bf16 %v4352_v50 }
 0x4ad   :  { %2288 = vmatpush.msrb.mxu2 %v1953_v32  ;;  %2348 = vmatpush.msra.mxu3 %v2145_v14  ;;  %v2182_v32 = vunpack.c.l.bf16 %v4346_v16  ;;  %v4364_v0 = vld [vmem:[#allocation3 + $0x1e8] sm:$0xff]  ;;  %v1974_v48 = vunpack.c.l.bf16 %v4359_v25 }
 0x4ae   :  { %2326 = vmatpush.msra.mxu1 %v2089_v39  ;;  %2308 = vmatpush.msra.mxu0 %v2017_v24  ;;  %v2178_v39 = vunpack.c.l.bf16 %v4356_v27  ;;  %v4372_v14 = vld [vmem:[#allocation3 + $0x3c8] sm:$0xff]  ;;  %v4375_v24 = vld [vmem:[#allocation3 + $0x1d8] sm:$0xff] }
 0x4af   :  { %2289 = vmatpush.msrb.mxu2 %v1949_v55  ;;  %2349 = vmatpush.msra.mxu3 %v2141_v4  ;;  %v4366_v55 = vld [vmem:[#allocation3 + $0x2f8] sm:$0xff]  ;;  %v2174_v4 = vunpack.c.l.bf16 %v4372_v14  ;;  %v2050_v52 = vunpack.c.l.bf16 %v4375_v24 }
 0x4b0   :  { %2327 = vmatpush.msra.mxu1 %v2085_v38  ;;  %2309 = vmatpush.msra.mxu0 %v2013_v8  ;;  %v2122_v60 = vunpack.c.l.bf16 %v4366_v55  ;;  %v4384_v38 = vld [vmem:[#allocation3 + $0x3b8] sm:$0xff] }
 0x4b1   :  { %2290 = vmatpush.msrb.mxu2 %v1945_v9  ;;  %2274 = vmatmul.f32.vlgmr.msrb.gmra.mxu3 %v4738_v36  ;;  %v2054_v9 = vunpack.c.l.bf16 %v4364_v0  ;;  %v4390_v8 = vld [vmem:[#allocation3 + $0x2d8] sm:$0xff] }
 0x4b2   :  { %2328 = vmatpush.msra.mxu1 %v2081_v28  ;;  %2350 = vmatpush.msra.mxu3 %v2137_v42  ;;  %v4396_v28 = vld [vmem:[#allocation3 + $0x3a8] sm:$0xff]  ;;  %v2170_v42 = vunpack.c.l.bf16 %v4384_v38  ;;  %v2114_v44 = vunpack.c.l.bf16 %v4390_v8 }
 0x4b3   :  { %2291 = vmatpush.msrb.mxu2 %v1941_v61  ;;  %2234 = vmatmul.f32.vlgmr.msrb.gmra.mxu0 %v4740_v31  ;;  %v2118_v61 = vunpack.c.l.bf16 %v4377_v63 }
 0x4b4   :  { %2310 = vmatpush.msra.mxu0 %v2009_v41  ;;  %2329 = vmatpush.msra.mxu1 %v2077_v17  ;;  %v2046_v41 = vunpack.c.l.bf16 %v4388_v45  ;;  %v4407_v17 = vld [vmem:[#allocation3 + $0x68] sm:$0xff] }
 0x4b5   :  { %2292 = vmatpush.msrb.mxu2 %v1937_v56  ;;  %2351 = vmatpush.msra.mxu3 %v2133_v18  ;;  %v4401_v56 = vld [vmem:[#allocation3 + $0x1b8] sm:$0xff]  ;;  %v2166_v18 = vunpack.c.l.bf16 %v4396_v28  ;;  %v1958_v40 = vunpack.c.l.bf16 %v4407_v17 }
 0x4b6   :  { %2254 = vmatmul.f32.vlgmr.msrb.gmra.mxu1 %v4743_v59  ;;  %2311 = vmatpush.msra.mxu0 %v2005_v10  ;;  %v4415_v10 = vld [vmem:[#allocation3 + $0x2b8] sm:$0xff]  ;;  %v2042_v37 = vunpack.c.l.bf16 %v4401_v56 }
 0x4b7   :  { %2293 = vmatpush.msrb.mxu2 %v1933_v19  ;;  %2330 = vmatpush.msra.mxu1 %v2073_v6  ;;  %v4409_v19 = vld [vmem:[#allocation3 + $0x398] sm:$0xff]  ;;  %v2110_v6 = vunpack.c.l.bf16 %v4403_v22 }
 0x4b8   :  { %2294 = vmatmul.f32.vlgmr.msrb.gmra.mxu2 %v4071_v2  ;;  %2352 = vmatpush.msra.mxu3 %v2129_v35  ;;  %v4419_v35 = vld [vmem:[#allocation3 + $0x58] sm:$0xff] }
 0x4b9   :  { %2358 = vmatpush.msra.mxu2 %v1994_v21  ;;  %2312 = vmatpush.msra.mxu0 %v2001_v33  ;;  %v4413_v21 = vld [vmem:[#allocation3 + $0x1a8] sm:$0xff]  ;;  %v2162_v33 = vunpack.c.l.bf16 %v4409_v19 }
 0x4ba   :  { %2331 = vmatpush.msra.mxu1 %v2069_v54  ;;  %2353 = vmatpush.msra.mxu3 %v2125_v57  ;;  %v4427_v54 = vld [vmem:[#allocation3 + $0x2a8] sm:$0xff]  ;;  %v2038_v57 = vunpack.c.l.bf16 %v4413_v21 }
 0x4bb   :  { %2359 = vmatpush.msra.mxu2 %v1990_v12  ;;  %2354 = vmatmul.f32.vlgmr.msra.gmra.mxu3 %v4738_v36  ;;  %v4421_v12 = vld [vmem:[#allocation3 + $0x388] sm:$0xff] }
 0x4bc   :  { %2418 = vmatpush.msrb.mxu3 %v2186_v43  ;;  %2313 = vmatpush.msra.mxu0 %v1997_v62  ;;  %v4431_v43 = vld [vmem:[#allocation3 + $0x48] sm:$0xff]  ;;  %v4433_v62 = vld [vmem:[#allocation3 + $0x378] sm:$0xff] }
 0x4bd   :  { %2360 = vmatpush.msra.mxu2 %v1986_v11  ;;  %2332 = vmatpush.msra.mxu1 %v2065_v1  ;;  %v2106_v11 = vunpack.c.l.bf16 %v4415_v10  ;;  %v2158_v1 = vunpack.c.l.bf16 %v4421_v12 }
 0x4be   :  { %2314 = vmatmul.f32.vlgmr.msra.gmra.mxu0 %v4740_v31  ;;  %2419 = vmatpush.msrb.mxu3 %v2182_v32  ;;  %v4437_v32 = vld [vmem:[#allocation3 + $0x188] sm:$0xff] }
 0x4bf   :  { %2361 = vmatpush.msra.mxu2 %v1982_v46  ;;  %2378 = vmatpush.msrb.mxu0 %v2058_v3  ;;  %v1954_v46 = vunpack.c.l.bf16 %v4419_v35  ;;  %v2034_v3 = vunpack.c.l.bf16 %v4425_v23 }
 0x4c0   :  { %2333 = vmatpush.msra.mxu1 %v2061_v30  ;;  %2420 = vmatpush.msrb.mxu3 %v2178_v39  ;;  %v2102_v30 = vunpack.c.l.bf16 %v4427_v54  ;;  %v4443_v39 = vld [vmem:[#allocation3 + $0x38] sm:$0xff] }
 0x4c1   :  { %2362 = vmatpush.msra.mxu2 %v1978_v34  ;;  %2334 = vmatmul.f32.vlgmr.msra.gmra.mxu1 %v4743_v59  ;;  %v4439_v34 = vld [vmem:[#allocation3 + $0x298] sm:$0xff] }
 0x4c2   :  { %2379 = vmatpush.msrb.mxu0 %v2054_v9  ;;  %2398 = vmatpush.msrb.mxu1 %v2122_v60  ;;  %v1950_v9 = vunpack.c.l.bf16 %v4431_v43  ;;  %v2154_v60 = vunpack.c.l.bf16 %v4433_v62 }
 0x4c3   :  { %2363 = vmatpush.msra.mxu2 %v1974_v48  ;;  %2421 = vmatpush.msrb.mxu3 %v2174_v4  ;;  %v4445_v48 = vld [vmem:[#allocation3 + $0x368] sm:$0xff] }
 0x4c4   :  { %2380 = vmatpush.msrb.mxu0 %v2050_v52  ;;  %2399 = vmatpush.msrb.mxu1 %v2118_v61  ;;  %4745 = vst [vmem:[#allocation33_spill] sm:$0xff] %v4445_v48  ;;  %v4451_v4 = vld [vmem:[#allocation3 + $0x288] sm:$0xff]  ;;  %v2030_v52 = vunpack.c.l.bf16 %v4437_v32  ;;  %v2098_v61 = vunpack.c.l.bf16 %v4439_v34 }
 0x4c5   :  { %2364 = vmatpush.msra.mxu2 %v1970_v58  ;;  %2422 = vmatpush.msrb.mxu3 %v2170_v42  ;;  %v4449_v58 = vld [vmem:[#allocation3 + $0x178] sm:$0xff]  ;;  %4746 = vst [vmem:[#allocation31_spill] sm:$0xff] %v4451_v4 }
 0x4c6   :  { %2381 = vmatpush.msrb.mxu0 %v2046_v41  ;;  %2400 = vmatpush.msrb.mxu1 %v2114_v44  ;;  %v4457_v42 = vld [vmem:[#allocation3 + $0x358] sm:$0xff]  ;;  %v1946_v41 = vunpack.c.l.bf16 %v4443_v39  ;;  %v2150_v44 = vunpack.c.l.bf16 %v4445_v48  ;;  %v4479_v48 = vld [vmem:[#allocation3 + $0x8] sm:$0xff] }
 0x4c7   :  { %2365 = vmatpush.msra.mxu2 %v1966_v26  ;;  %2423 = vmatpush.msrb.mxu3 %v2166_v18  ;;  %v4455_v26 = vld [vmem:[#allocation3 + $0x28] sm:$0xff]  ;;  %4748 = vst [vmem:[#allocation34_spill] sm:$0xff] %v4457_v42  ;;  %v4463_v18 = vld [vmem:[#allocation3 + $0x278] sm:$0xff] }
 0x4c8   :  { %2382 = vmatpush.msrb.mxu0 %v2042_v37  ;;  %2401 = vmatpush.msrb.mxu1 %v2110_v6  ;;  %4747 = vst [vmem:[#allocation30_spill] sm:$0xff] %v4455_v26  ;;  %v2026_v37 = vunpack.c.l.bf16 %v4449_v58  ;;  %v2094_v6 = vunpack.c.l.bf16 %v4451_v4  ;;  %v4481_v4 = vld [vmem:[#allocation3 + $0x338] sm:$0xff] }
 0x4c9   :  { %2366 = vmatpush.msra.mxu2 %v1962_v47  ;;  %2424 = vmatpush.msrb.mxu3 %v2162_v33  ;;  %v4461_v47 = vld [vmem:[#allocation3 + $0x168] sm:$0xff]  ;;  %4749 = vst [vmem:[#allocation32_spill] sm:$0xff] %v4463_v18 }
 0x4ca   :  { %2383 = vmatpush.msrb.mxu0 %v2038_v57  ;;  %2402 = vmatpush.msrb.mxu1 %v2106_v11  ;;  %v4469_v33 = vld [vmem:[#allocation3 + $0x348] sm:$0xff]  ;;  %v1942_v57 = vunpack.c.l.bf16 %v4455_v26  ;;  %v2146_v11 = vunpack.c.l.bf16 %v4457_v42  ;;  %4753 = vst [vmem:[#allocation28_spill] sm:$0xff] %v4481_v4  ;;  %v4487_v26 = vld [vmem:[#allocation3 + $0x258] sm:$0xff] }
 0x4cb   :  { %2367 = vmatpush.msra.mxu2 %v1958_v40  ;;  %2425 = vmatpush.msrb.mxu3 %v2158_v1  ;;  %v4467_v40 = vld [vmem:[#allocation3 + $0x18] sm:$0xff]  ;;  %4751 = vst [vmem:[#allocation26_spill] sm:$0xff] %v4469_v33  ;;  %v4475_v1 = vld [vmem:[#allocation3 + $0x268] sm:$0xff] }
 0x4cc   :  { %2384 = vmatpush.msrb.mxu0 %v2034_v3  ;;  %2403 = vmatpush.msrb.mxu1 %v2102_v30  ;;  %4750 = vst [vmem:[#allocation27_spill] sm:$0xff] %v4467_v40  ;;  %v2022_v3 = vunpack.c.l.bf16 %v4461_v47  ;;  %v2090_v30 = vunpack.c.l.bf16 %v4463_v18  ;;  %v4485_v42 = vld [vmem:[#allocation3 + $0x148] sm:$0xff] }
 0x4cd   :  { %2368 = vmatpush.msra.mxu2 %v1954_v46  ;;  %2426 = vmatpush.msrb.mxu3 %v2154_v60  ;;  %v4473_v46 = vld [vmem:[#allocation3 + $0x158] sm:$0xff]  ;;  %v2142_v60 = vunpack.c.l.bf16 %v4469_v33  ;;  %4754 = vst [vmem:[#allocation23_spill] sm:$0xff] %v4485_v42  ;;  %v4491_v18 = vld [vmem:[#allocation3 + $0x328] sm:$0xff]  ;;  %v2014_v33 = vunpack.c.l.bf16 %v4485_v42 }
 0x4ce   :  { %4752 = vst [vmem:[#allocation29_spill] sm:$0xff] %v4473_v46  ;;  %2385 = vmatpush.msrb.mxu0 %v2030_v52  ;;  %2404 = vmatpush.msrb.mxu1 %v2098_v61  ;;  %v2018_v52 = vunpack.c.l.bf16 %v4473_v46  ;;  %v2086_v61 = vunpack.c.l.bf16 %v4475_v1  ;;  %v4501_v46 = vld [vmem:[#allocation3 + $0x318] sm:$0xff]  ;;  %v4510_v42 = vld [vmem:[#allocation3 + $0x308] sm:$0xff] }
 0x4cf   :  { %2369 = vmatpush.msra.mxu2 %v1950_v9  ;;  %2427 = vmatpush.msrb.mxu3 %v2150_v44  ;;  %v1938_v9 = vunpack.c.l.bf16 %v4467_v40  ;;  %4755 = vst [vmem:[#allocation25_spill] sm:$0xff] %v4487_v26  ;;  %v2138_v44 = vunpack.c.l.bf16 %v4481_v4  ;;  %v4495_v40 = vld [vmem:[#allocation3 + $0x138] sm:$0xff]  ;;  %v1995_v4 = vunpack.c.h.bf16 %v4319_v5 }
 0x4d0   :  { %2386 = vmatpush.msrb.mxu0 %v2026_v37  ;;  %2405 = vmatpush.msrb.mxu1 %v2094_v6  ;;  %v2082_v37 = vunpack.c.l.bf16 %v4487_v26  ;;  %v4499_v6 = vld [vmem:[#allocation3 + $0x248] sm:$0xff]  ;;  %4756 = vst [vmem:[#allocation36_spill] sm:$0xff] %v4501_v46 }
 0x4d1   :  { %2370 = vmatpush.msra.mxu2 %v1946_v41  ;;  %2428 = vmatpush.msrb.mxu3 %v2146_v11  ;;  %v1934_v41 = vunpack.c.l.bf16 %v4479_v48  ;;  %v4504_v11 = vld [vmem:[#allocation3 + $0x128] sm:$0xff]  ;;  %4758 = vst [vmem:[#allocation37_spill] sm:$0xff] %v4510_v42  ;;  %v2078_v26 = vunpack.c.l.bf16 %v4499_v6 }
 0x4d2   :  { %2387 = vmatpush.msrb.mxu0 %v2022_v3  ;;  %2406 = vmatpush.msrb.mxu1 %v2090_v30  ;;  %4757 = vst [vmem:[#allocation24_spill] sm:$0xff] %v4504_v11  ;;  %v2010_v3 = vunpack.c.l.bf16 %v4495_v40  ;;  %v4508_v30 = vld [vmem:[#allocation3 + $0x238] sm:$0xff]  ;;  %v2006_v5 = vunpack.c.l.bf16 %v4504_v11 }
 0x4d3   :  { %2371 = vmatpush.msra.mxu2 %v1942_v57  ;;  %2429 = vmatpush.msrb.mxu3 %v2142_v60  ;;  %v2134_v57 = vunpack.c.l.bf16 %v4491_v18  ;;  %v4514_v60 = vld [vmem:[#allocation3 + $0x118] sm:$0xff] }
 0x4d4   :  { %2388 = vmatpush.msrb.mxu0 %v2018_v52  ;;  %2407 = vmatpush.msrb.mxu1 %v2086_v61  ;;  %v1991_v52 = vunpack.c.h.bf16 %v4326_v15  ;;  %v4518_v61 = vld [vmem:[#allocation3 + $0x228] sm:$0xff]  ;;  %v4527_v15 = vld [vmem:[#allocation3 + $0x218] sm:$0xff] }
 0x4d5   :  { %2372 = vmatpush.msra.mxu2 %v1938_v9  ;;  %2430 = vmatpush.msrb.mxu3 %v2138_v44  ;;  %v2130_v9 = vunpack.c.l.bf16 %v4501_v46  ;;  %v2126_v44 = vunpack.c.l.bf16 %v4510_v42  ;;  %v1987_v46 = vunpack.c.h.bf16 %v4333_v7  ;;  %v2070_v11 = vunpack.c.l.bf16 %v4518_v61 }
 0x4d6   :  { %2389 = vmatpush.msrb.mxu0 %v2014_v33  ;;  %2408 = vmatpush.msrb.mxu1 %v2082_v37  ;;  %v2002_v33 = vunpack.c.l.bf16 %v4514_v60  ;;  %v4525_v37 = vld [vmem:[#allocation3 + $0x108] sm:$0xff]  ;;  %v2187_v42 = vunpack.c.h.bf16 %v4337_v49 }
 0x4d7   :  { %2373 = vmatpush.msra.mxu2 %v1934_v41  ;;  %2431 = vmatpush.msrb.mxu3 %v2134_v57  ;;  %v2074_v41 = vunpack.c.l.bf16 %v4508_v30  ;;  %v1983_v57 = vunpack.c.h.bf16 %v4343_v51  ;;  %v1998_v7 = vunpack.c.l.bf16 %v4525_v37  ;;  %v2183_v51 = vunpack.c.h.bf16 %v4346_v16 }
 0x4d8   :  { %2374 = vmatmul.f32.vlgmr.msra.gmra.mxu2 %v4071_v2  ;;  %2390 = vmatpush.msrb.mxu0 %v2010_v3  ;;  %v4534_v3 = vld [vmem:[#allocation3 + $0x208] sm:$0xff]  ;;  %v1971_v16 = vunpack.c.h.bf16 %v4370_v20  ;;  %v2171_v20 = vunpack.c.h.bf16 %v4384_v38  ;;  %v2107_v38 = vunpack.c.h.bf16 %v4415_v10  ;;  %v2031_v10 = vunpack.c.h.bf16 %v4437_v32 }
 0x4d9   :  { %2438 = vmatpush.msrb.mxu2 %v1995_v4  ;;  %2409 = vmatpush.msrb.mxu1 %v2078_v26  ;;  %v2066_v4 = vunpack.c.l.bf16 %v4527_v15  ;;  %v1979_v26 = vunpack.c.h.bf16 %v4350_v53  ;;  %v2062_v49 = vunpack.c.l.bf16 %v4534_v3  ;;  %v2123_v53 = vunpack.c.h.bf16 %v4366_v55  ;;  %v4761_v32 = vld [vmem:[#allocation30_spill] sm:$0xff] }
 0x4da   :  { %2432 = vmatpush.msrb.mxu3 %v2130_v9  ;;  %2391 = vmatpush.msrb.mxu0 %v2006_v5  ;;  %v2059_v9 = vunpack.c.h.bf16 %v4352_v50  ;;  %v2051_v50 = vunpack.c.h.bf16 %v4375_v24  ;;  %v2047_v55 = vunpack.c.h.bf16 %v4388_v45  ;;  %v1963_v24 = vunpack.c.h.bf16 %v4394_v29 }
 0x4db   :  { %2439 = vmatpush.msrb.mxu2 %v1991_v52  ;;  %2410 = vmatpush.msrb.mxu1 %v2074_v41  ;;  %v1975_v52 = vunpack.c.h.bf16 %v4359_v25  ;;  %v2119_v25 = vunpack.c.h.bf16 %v4377_v63  ;;  %v2043_v63 = vunpack.c.h.bf16 %v4401_v56  ;;  %v1959_v45 = vunpack.c.h.bf16 %v4407_v17  ;;  %v4760_v41 = vld [vmem:[#allocation33_spill] sm:$0xff] }
 0x4dc   :  { %2433 = vmatpush.msrb.mxu3 %v2126_v44  ;;  %2392 = vmatpush.msrb.mxu0 %v2002_v33  ;;  %v2163_v29 = vunpack.c.h.bf16 %v4409_v19  ;;  %v1955_v56 = vunpack.c.h.bf16 %v4419_v35  ;;  %v2159_v17 = vunpack.c.h.bf16 %v4421_v12  ;;  %v2099_v19 = vunpack.c.h.bf16 %v4439_v34  ;;  %v4759_v12 = vld [vmem:[#allocation31_spill] sm:$0xff] }
 0x4dd   :  { %2440 = vmatpush.msrb.mxu2 %v1987_v46  ;;  %2411 = vmatpush.msrb.mxu1 %v2070_v11  ;;  %v2055_v46 = vunpack.c.h.bf16 %v4364_v0  ;;  %v2179_v11 = vunpack.c.h.bf16 %v4356_v27  ;;  %v1967_v0 = vunpack.c.h.bf16 %v4382_v13  ;;  %v2115_v27 = vunpack.c.h.bf16 %v4390_v8 }
 0x4de   :  { %2434 = vmatmul.f32.vlgmr.msrb.gmra.mxu3 %v4738_v36  ;;  %2393 = vmatpush.msrb.mxu0 %v1998_v7  ;;  %v2167_v13 = vunpack.c.h.bf16 %v4396_v28  ;;  %v2039_v8 = vunpack.c.h.bf16 %v4413_v21  ;;  %v2103_v28 = vunpack.c.h.bf16 %v4427_v54  ;;  %v1951_v21 = vunpack.c.h.bf16 %v4431_v43 }
 0x4df   :  { %2441 = vmatpush.msrb.mxu2 %v1983_v57  ;;  %2498 = vmatpush.msra.mxu3 %v2187_v42  ;;  %v2175_v42 = vunpack.c.h.bf16 %v4372_v14  ;;  %v2111_v14 = vunpack.c.h.bf16 %v4403_v22  ;;  %v2035_v22 = vunpack.c.h.bf16 %v4425_v23  ;;  %v2155_v35 = vunpack.c.h.bf16 %v4433_v62  ;;  %v4762_v62 = vld [vmem:[#allocation32_spill] sm:$0xff]  ;;  %v4763_v57 = vld [vmem:[#allocation34_spill] sm:$0xff] }
 0x4e0   :  { %2412 = vmatpush.msrb.mxu1 %v2066_v4  ;;  %2394 = vmatmul.f32.vlgmr.msrb.gmra.mxu0 %v4740_v31  ;;  %v1947_v23 = vunpack.c.h.bf16 %v4443_v39  ;;  %v2027_v54 = vunpack.c.h.bf16 %v4449_v58  ;;  %v2095_v5 = vunpack.c.h.bf16 %v4759_v12  ;;  %v2151_v43 = vunpack.c.h.bf16 %v4760_v41  ;;  %v4764_v58 = vld [vmem:[#allocation27_spill] sm:$0xff]  ;;  %v4765_v4 = vld [vmem:[#allocation29_spill] sm:$0xff] }
 0x4e1   :  { %2442 = vmatpush.msrb.mxu2 %v1979_v26  ;;  %2458 = vmatpush.msra.mxu0 %v2059_v9  ;;  %v1943_v44 = vunpack.c.h.bf16 %v4761_v32  ;;  %v2023_v34 = vunpack.c.h.bf16 %v4461_v47  ;;  %v2091_v33 = vunpack.c.h.bf16 %v4762_v62  ;;  %v2147_v39 = vunpack.c.h.bf16 %v4763_v57 }
 0x4e2   :  { %2499 = vmatpush.msra.mxu3 %v2183_v51  ;;  %2413 = vmatpush.msrb.mxu1 %v2062_v49  ;;  %v1939_v7 = vunpack.c.h.bf16 %v4764_v58  ;;  %v2019_v26 = vunpack.c.h.bf16 %v4765_v4  ;;  %v2087_v9 = vunpack.c.h.bf16 %v4475_v1  ;;  %v4766_v51 = vld [vmem:[#allocation26_spill] sm:$0xff]  ;;  %v1935_v47 = vunpack.c.h.bf16 %v4479_v48  ;;  %v4770_v48 = vld [vmem:[#allocation24_spill] sm:$0xff] }
 0x4e3   :  { %2443 = vmatpush.msrb.mxu2 %v1975_v52  ;;  %2414 = vmatmul.f32.vlgmr.msrb.gmra.mxu1 %v4743_v59  ;;  %v2143_v49 = vunpack.c.h.bf16 %v4766_v51  ;;  %v4767_v52 = vld [vmem:[#allocation23_spill] sm:$0xff]  ;;  %v2079_v1 = vunpack.c.h.bf16 %v4499_v6  ;;  %v2071_v6 = vunpack.c.h.bf16 %v4518_v61 }
 0x4e4   :  { %2459 = vmatpush.msra.mxu0 %v2055_v46  ;;  %2478 = vmatpush.msra.mxu1 %v2123_v53  ;;  %v2015_v46 = vunpack.c.h.bf16 %v4767_v52  ;;  %v4768_v53 = vld [vmem:[#allocation25_spill] sm:$0xff] }
 0x4e5   :  { %2500 = vmatpush.msra.mxu3 %v2179_v11  ;;  %2444 = vmatpush.msrb.mxu2 %v1971_v16  ;;  %v2083_v11 = vunpack.c.h.bf16 %v4768_v53  ;;  %v4769_v16 = vld [vmem:[#allocation28_spill] sm:$0xff] }
 0x4e6   :  { %2460 = vmatpush.msra.mxu0 %v2051_v50  ;;  %2479 = vmatpush.msra.mxu1 %v2119_v25  ;;  %v2139_v50 = vunpack.c.h.bf16 %v4769_v16  ;;  %v2011_v25 = vunpack.c.h.bf16 %v4495_v40  ;;  %v2003_v40 = vunpack.c.h.bf16 %v4514_v60 }
 0x4e7   :  { %2501 = vmatpush.msra.mxu3 %v2175_v42  ;;  %2445 = vmatpush.msrb.mxu2 %v1967_v0  ;;  %v2135_v42 = vunpack.c.h.bf16 %v4491_v18  ;;  %v2007_v0 = vunpack.c.h.bf16 %v4770_v48  ;;  %v4772_v18 = vld [vmem:[#allocation37_spill] sm:$0xff] }
 0x4e8   :  { %2461 = vmatpush.msra.mxu0 %v2047_v55  ;;  %2480 = vmatpush.msra.mxu1 %v2115_v27  ;;  %v2075_v55 = vunpack.c.h.bf16 %v4508_v30  ;;  %v4771_v27 = vld [vmem:[#allocation36_spill] sm:$0xff]  ;;  %v2067_v30 = vunpack.c.h.bf16 %v4527_v15  ;;  %v2188_v15 = vld [vmem:[%s4626_s10] sm:$0xf] }
 0x4e9   :  { %2502 = vmatpush.msra.mxu3 %v2171_v20  ;;  %2446 = vmatpush.msrb.mxu2 %v1963_v24  ;;  %v2131_v20 = vunpack.c.h.bf16 %v4771_v27  ;;  %v2127_v24 = vunpack.c.h.bf16 %v4772_v18 }
 0x4ea   :  { %2462 = vmatpush.msra.mxu0 %v2043_v63  ;;  %2481 = vmatpush.msra.mxu1 %v2111_v14  ;;  %v1999_v63 = vunpack.c.h.bf16 %v4525_v37 }
 0x4eb   :  { %2503 = vmatpush.msra.mxu3 %v2167_v13  ;;  %2447 = vmatpush.msrb.mxu2 %v1959_v45 }
 0x4ec   :  { %2463 = vmatpush.msra.mxu0 %v2039_v8  ;;  %2482 = vmatpush.msra.mxu1 %v2107_v38  ;;  %v2191_v8 = vperm.slane %v2188_v15, 1 }
 0x4ed   :  { %2504 = vmatpush.msra.mxu3 %v2163_v29  ;;  %2448 = vmatpush.msrb.mxu2 %v1955_v56 }
 0x4ee   :  { %2464 = vmatpush.msra.mxu0 %v2035_v22  ;;  %2483 = vmatpush.msra.mxu1 %v2103_v28 }
 0x4ef   :  { %2505 = vmatpush.msra.mxu3 %v2159_v17  ;;  %2449 = vmatpush.msrb.mxu2 %v1951_v21 }
 0x4f0   :  { %2465 = vmatpush.msra.mxu0 %v2031_v10  ;;  %2484 = vmatpush.msra.mxu1 %v2099_v19 }
 0x4f1   :  { %2506 = vmatpush.msra.mxu3 %v2155_v35  ;;  %2450 = vmatpush.msrb.mxu2 %v1947_v23 }
 0x4f2   :  { %2466 = vmatpush.msra.mxu0 %v2027_v54  ;;  %2485 = vmatpush.msra.mxu1 %v2095_v5 }
 0x4f3   :  { %2507 = vmatpush.msra.mxu3 %v2151_v43  ;;  %2451 = vmatpush.msrb.mxu2 %v1943_v44  ;;  %v2522_v43 = vld [vmem:[%s4627_s11] sm:$0xf]  ;;  %v2193_v44 = vperm.slane %v2188_v15, 3 }
 0x4f4   :  { %2467 = vmatpush.msra.mxu0 %v2023_v34  ;;  %2486 = vmatpush.msra.mxu1 %v2091_v33  ;;  %v2524_v62 = vperm.slane %v2522_v43, 0  ;;  %v2525_v57 = vperm.slane %v2522_v43, 1 }
 0x4f5   :  { %2508 = vmatpush.msra.mxu3 %v2147_v39  ;;  %2452 = vmatpush.msrb.mxu2 %v1939_v7  ;;  %v2526_v7 = vperm.slane %v2522_v43, 2 }
 0x4f6   :  { %2468 = vmatpush.msra.mxu0 %v2019_v26  ;;  %2487 = vmatpush.msra.mxu1 %v2087_v9 }
 0x4f7   :  { %2509 = vmatpush.msra.mxu3 %v2143_v49  ;;  %2453 = vmatpush.msrb.mxu2 %v1935_v47 }
 0x4f8   :  { %2469 = vmatpush.msra.mxu0 %v2015_v46  ;;  %2488 = vmatpush.msra.mxu1 %v2083_v11 }
 0x4f9   :  { %2510 = vmatpush.msra.mxu3 %v2139_v50  ;;  %2454 = vmatmul.f32.vlgmr.msrb.gmra.mxu2 %v4071_v2  ;;  %v2063_v2 = vunpack.c.h.bf16 %v4534_v3  ;;  %v2190_v3 = vperm.slane %v2188_v15, 0 }
 0x4fa   :  { %2470 = vmatpush.msra.mxu0 %v2011_v25  ;;  %2489 = vmatpush.msra.mxu1 %v2079_v1  ;;  %v2527_v25 = vperm.slane %v2522_v43, 3 }
 0x4fb   :  { %2511 = vmatpush.msra.mxu3 %v2135_v42 }
 0x4fc   :  { %2471 = vmatpush.msra.mxu0 %v2007_v0  ;;  %2490 = vmatpush.msra.mxu1 %v2075_v55 }
 0x4fd   :  { %2512 = vmatpush.msra.mxu3 %v2131_v20 }
 0x4fe   :  { %2472 = vmatpush.msra.mxu0 %v2003_v40  ;;  %2491 = vmatpush.msra.mxu1 %v2071_v6  ;;  %v2797_v40 = vld [vmem:[#allocation5] ss:$0 sm:$0xff] }
 0x4ff   :  { %2513 = vmatpush.msra.mxu3 %v2127_v24 }
 0x500   :  { %2514 = vmatmul.f32.vlgmr.msra.gmra.mxu3 %v4738_v36  ;;  %2473 = vmatpush.msra.mxu0 %v1999_v63  ;;  %v2192_v36 = vperm.slane %v2188_v15, 2 }
 0x501   :  { %2492 = vmatpush.msra.mxu1 %v2067_v30  ;;  %2474 = vmatmul.f32.vlgmr.msra.gmra.mxu0 %v4740_v31 }
 0x503   :  { %2493 = vmatpush.msra.mxu1 %v2063_v2 }
 0x504   :  { %2494 = vmatmul.f32.vlgmr.msra.gmra.mxu1 %v4743_v59 }
 0x51b   :  { %v2215_v60 = vpop.f32.mrf.mxu2 }
 0x51c   :  { %v2216_v56 = vadd.f32 %v2215_v60, %v2190_v3 }
 0x530   :  { %v2235_v61 = vpop.f32.mrf.mxu0 }
 0x531   :  { %v2236_v17 = vadd.f32 %v2235_v61, %v2216_v56 }
 0x533   :  { %v2255_v37 = vpop.f32.mrf.mxu1 }
 0x534   :  { %v2275_v13 = vpop.f32.mrf.mxu3  ;;  %v2256_v35 = vadd.f32 %v2255_v37, %v2236_v17 }
 0x536   :  { %v2276_v5 = vadd.f32 %v2275_v13, %v2256_v35 }
 0x538   :  { %v2518_v34 = vmax.f32 %v2276_v5, 0.0 }
 0x53a   :  { %v2532_v9 = vmul.f32 %v2524_v62, %v2518_v34 }
 0x53b   :  { %v2295_v14 = vpop.f32.mrf.mxu2  ;;  %v2315_v45 = vpop.f32.mrf.mxu0 }
 0x53c   :  { %v2296_v31 = vadd.f32 %v2295_v14, %v2191_v8  ;;  %v2536_v11 = vsel %vm616_vm7, %v2532_v9, 0.0 }
 0x53e   :  { %v2335_v38 = vpop.f32.mrf.mxu1  ;;  %v2355_v28 = vpop.f32.mrf.mxu3  ;;  %v2316_v21 = vadd.f32 %v2315_v45, %v2296_v31 }
 0x540   :  { %v2336_v23 = vadd.f32 %v2335_v38, %v2316_v21 }
 0x542   :  { %v2356_v41 = vadd.f32 %v2355_v28, %v2336_v23 }
 0x544   :  { %v2519_v33 = vmax.f32 %v2356_v41, 0.0 }
 0x546   :  { %v2533_v51 = vmul.f32 %v2525_v57, %v2519_v33 }
 0x548   :  { %v2537_v16 = vsel %vm616_vm7, %v2533_v51, 0.0 }
 0x549   :  { %v2538_v48 = vadd.f32 %v2537_v16, %v2536_v11 }
 0x55b   :  { %v2375_v29 = vpop.f32.mrf.mxu2 }
 0x55c   :  { %v2376_v22 = vadd.f32 %v2375_v29, %v2192_v36 }
 0x55d   :  { %v2395_v59 = vpop.f32.mrf.mxu0 }
 0x55e   :  { %v2396_v10 = vadd.f32 %v2395_v59, %v2376_v22 }
 0x560   :  { %v2415_v19 = vpop.f32.mrf.mxu1 }
 0x561   :  { %v2416_v54 = vadd.f32 %v2415_v19, %v2396_v10  ;;  %v2435_v12 = vpop.f32.mrf.mxu3 }
 0x563   :  { %v2436_v32 = vadd.f32 %v2435_v12, %v2416_v54 }
 0x565   :  { %v2520_v58 = vmax.f32 %v2436_v32, 0.0 }
 0x567   :  { %v2534_v52 = vmul.f32 %v2526_v7, %v2520_v58 }
 0x569   :  { %v2539_v42 = vsel %vm616_vm7, %v2534_v52, 0.0 }
 0x56a   :  { %v2540_v55 = vadd.f32 %v2539_v42, %v2538_v48 }
 0x57c   :  { %v2455_v39 = vpop.f32.mrf.mxu2 }
 0x57d   :  { %v2456_v4 = vadd.f32 %v2455_v39, %v2193_v44 }
 0x57e   :  { %v2475_v26 = vpop.f32.mrf.mxu0 }
 0x57f   :  { %v2476_v49 = vadd.f32 %v2475_v26, %v2456_v4 }
 0x581   :  { %v2495_v47 = vpop.f32.mrf.mxu1 }
 0x582   :  { %v2496_v46 = vadd.f32 %v2495_v47, %v2476_v49 }
 0x583   :  { %v2515_v53 = vpop.f32.mrf.mxu3 }
 0x584   :  { %v2516_v50 = vadd.f32 %v2515_v53, %v2496_v46 }
 0x586   :  { %v2521_v1 = vmax.f32 %v2516_v50, 0.0 }
 0x588   :  { %v2535_v0 = vmul.f32 %v2527_v25, %v2521_v1 }
 0x58a   :  { %v2541_v27 = vsel %vm616_vm7, %v2535_v0, 0.0 }
 0x58b   :  { %v2542_v20 = vadd.f32 %v2541_v27, %v2540_v55 }
 0x58d   :  { %2543 = vadd.xlane.f32.xlu0 %v2542_v20 }
 0x600   :  { %v2544_v6 = vpop.xlane.xlu0 %2543 }
 0x601   :  { %v2549_v18 = vadd.f32 %v2797_v40, %v2544_v6 }
 0x603   :  { %2551 = vst.msk [vmem:[%s4631_s15] sm:$0x3] %vm2550_vm15, %v2549_v18 }
 0x604   :  { %2556 = vsyncpa [#allocation7], 1 }
 0x605   :  { %2557 = vsyncpa [#allocation9], 1 }
 0x606   :  { %2558 = vsyncpa [#allocation12], 1 }
 0x607   :  { %2559 = vsyncmov [#allocation4] }
 0x60a   :  { %s2560_s3 = vpop.sfrf %2559 }
 0x60b   :  { %p2683_p0 = scmp.ne.s32.totalorder %s2560_s3, 0 }
 0x60d   :  { %2564 = shalt.err (%p2683_p0)  }
 0x60e   :  { %2566 = vsyncmov [#allocation4 + $0x1] }
 0x611   :  { %s2567_s27 = vpop.sfrf %2566 }
 0x612   :  { %p2684_p1 = scmp.ne.s32.totalorder %s2567_s27, 0 }
 0x614   :  { %2571 = shalt.err (%p2684_p1)  }

</bundles_post_ra>
